<compile_context>
chip_gen: v7x
topology: tpu7x:2x2x1
jax: 0.10.0
libtpu: 0.0.40
codegen_flags: <defaults>
</compile_context>

<pallas_src>
import functools
import numpy as np
import jax
import jax.numpy as jnp
from jax.experimental import pallas as pl
from jax.experimental.pallas import tpu as pltpu

EPS = 1e-5
RESIDENT_VMEM_CAP = 24 << 20          # resident (Mp, Cout) f32 cap (v7x-safe)


def _round_up(x, m):
    return ((x + m - 1) // m) * m


# --------------------------------------------------------------------------
# Pallas kernels
# --------------------------------------------------------------------------

def _stages_kernel(x_ref, w_ref, g_ref, b_ref, o_ref, *, counts):
    """All pyramid stages in one grid-less invocation, lane-dense output.

    x: (S, R, Cin) zero-padded pooled pixels, w: (S, Cin, Cmid),
    g/b: (S, 1, Cmid), o: (R, S*Cmid).
    counts: static true pixel count per stage (training-mode BN divisor);
    padded rows are zero in x so sums are exact, and they are masked out of
    the variance.  Garbage in padded output rows is never read by the wrapper.
    """
    outs = []
    for s, n in enumerate(counts):
        y = jnp.dot(x_ref[s], w_ref[s], preferred_element_type=jnp.float32)
        inv_n = 1.0 / float(n)
        mean = jnp.sum(y, axis=0, keepdims=True) * inv_n
        diff = y - mean
        rows = jax.lax.broadcasted_iota(jnp.int32, y.shape, 0)
        sq = jnp.where(rows < n, jnp.square(diff), 0.0)
        var = jnp.sum(sq, axis=0, keepdims=True) * inv_n
        scale = g_ref[s] * jax.lax.rsqrt(var + EPS)
        outs.append(jnp.maximum(diff * scale + b_ref[s], 0.0))
    o_ref[...] = jnp.concatenate(outs, axis=-1)


def _bottleneck_resident_kernel(x_ref, p_ref, w_ref, g_ref, b_ref, o_ref,
                                sum_ref, *, true_m, tile_m, n_tiles):
    """Fused bottleneck 1x1 conv + training-mode BN + ReLU (resident output).

    x: (tile_m, Cin) bf16, p: (tile_m, Kp=S*Cmid) bf16, w: (Kp+Cin, Cout) bf16,
    g/b: (1, Cout) f32, o: (Mp, Cout) f32 resident across the whole grid,
    sum_ref: (1, Cout) f32 running column sum.
    Weight row order matches torch.cat([prior_0..prior_{S-1}, feats], dim=C):
    w[:Kp] multiplies the concatenated priors, w[Kp:] the feature map.
    Grid axis MUST stay sequential ("arbitrary"): the batch-stat reduction
    assumes in-order tiles and a single resident output block.
    """
    i = pl.program_id(0)

    @pl.when(i == 0)
    def _init():
        sum_ref[...] = jnp.zeros_like(sum_ref)

    kp = p_ref.shape[1]
    y = jnp.dot(p_ref[...], w_ref[:kp, :], preferred_element_type=jnp.float32)
    y = y + jnp.dot(x_ref[...], w_ref[kp:, :],
                    preferred_element_type=jnp.float32)

    row0 = pl.multiple_of(i * tile_m, tile_m)
    o_ref[pl.ds(row0, tile_m), :] = y                 # stays in VMEM
    sum_ref[...] += jnp.sum(y, axis=0, keepdims=True)  # pad rows are zero

    @pl.when(i == pl.num_programs(0) - 1)
    def _finalize():
        inv_m = 1.0 / float(true_m)
        mean = sum_ref[...] * inv_m
        needs_mask = o_ref.shape[0] > true_m          # static

        def var_body(t, acc):
            r0 = pl.multiple_of(t * tile_m, tile_m)
            blk = o_ref[pl.ds(r0, tile_m), :]
            d = blk - mean
            if needs_mask:
                rows = r0 + jax.lax.broadcasted_iota(jnp.int32, blk.shape, 0)
                sq = jnp.where(rows < true_m, jnp.square(d), 0.0)
            else:
                sq = jnp.square(d)
            return acc + jnp.sum(sq, axis=0, keepdims=True)

        var = jax.lax.fori_loop(0, n_tiles, var_body,
                                jnp.zeros_like(mean)) * inv_m
        scale = g_ref[...] * jax.lax.rsqrt(var + EPS)
        shift = b_ref[...] - mean * scale

        def norm_body(t, carry):
            r0 = pl.multiple_of(t * tile_m, tile_m)
            blk = o_ref[pl.ds(r0, tile_m), :]
            o_ref[pl.ds(r0, tile_m), :] = jnp.maximum(blk * scale + shift, 0.0)
            return carry

        jax.lax.fori_loop(0, n_tiles, norm_body, 0)


def _bottleneck_conv_kernel(x_ref, p_ref, w_ref, o_ref):
    """Non-resident fallback: conv only, per-tile output, 'parallel' grid."""
    kp = p_ref.shape[1]
    y = jnp.dot(p_ref[...], w_ref[:kp, :], preferred_element_type=jnp.float32)
    y = y + jnp.dot(x_ref[...], w_ref[kp:, :],
                    preferred_element_type=jnp.float32)
    o_ref[...] = y


def _bn_relu_kernel(y_ref, scale_ref, shift_ref, o_ref):
    o_ref[...] = jnp.maximum(y_ref[...] * scale_ref[...] + shift_ref[...], 0.0)


# --------------------------------------------------------------------------
# Kernel wrappers
# --------------------------------------------------------------------------

def stages_conv_bn_relu(pooled, w, gamma, beta, *, counts):
    """pooled: (S, R, Cin) zero-padded; w: (S, Cin, Cmid); gamma/beta: (S,1,Cmid).

    Returns (R, S*Cmid); stage s occupies columns [s*Cmid, (s+1)*Cmid) and is
    valid only for its first counts[s] rows.
    """
    S, R, cin = pooled.shape
    cmid = w.shape[-1]
    kernel = functools.partial(_stages_kernel, counts=counts)
    return pl.pallas_call(
        kernel,
        out_shape=jax.ShapeDtypeStruct((R, S * cmid), jnp.float32),
    )(pooled, w, gamma, beta)


def bottleneck_fused(x2d, priors_cat, w, gamma, beta):
    """x2d: (M, Cin); priors_cat: (M, S*Cmid); w: (S*Cmid + Cin, Cout)."""
    M, cin = x2d.shape
    kp = priors_cat.shape[1]
    cout = w.shape[1]
    assert w.shape[0] == kp + cin

    # bf16 streamed operands (native MXU input on v5e/v6e/v7x); accumulation,
    # BN stats and elementwise epilogue stay f32.
    x_b = x2d.astype(jnp.bfloat16)
    p_b = priors_cat.astype(jnp.bfloat16)
    w_b = w.astype(jnp.bfloat16)
    g = gamma.reshape(1, -1).astype(jnp.float32)
    b = beta.reshape(1, -1).astype(jnp.float32)

    # Tile selection: single block for small M (block == full dims, no (8,128)
    # constraint, no grid loop); otherwise the largest 256-multiple tile that
    # divides M (no wrapper pad / trailing slice). Ragged M falls back to a
    # 256 tile with in-kernel row masking.
    if M <= 4096:
        tile_m = M
    else:
        tile_m = next((t for t in (2048, 1024, 512, 256) if M % t == 0), 256)
    Mp = _round_up(M, tile_m)
    if Mp != M:
        pad = ((0, Mp - M), (0, 0))
        x_b = jnp.pad(x_b, pad)
        p_b = jnp.pad(p_b, pad)
    n_tiles = Mp // tile_m

    resident_bytes = Mp * cout * 4
    est_vmem = (resident_bytes
                + 2 * 2 * tile_m * (cin + kp) * 2      # double-buffered bf16 in
                + (cin + kp) * cout * 2                # weights
                + (4 << 20))                           # slack
    vmem_limit = int(min(48 << 20, max(32 << 20, est_vmem)))

    if resident_bytes <= RESIDENT_VMEM_CAP:
        kernel = functools.partial(_bottleneck_resident_kernel,
                                   true_m=M, tile_m=tile_m, n_tiles=n_tiles)
        out = pl.pallas_call(
            kernel,
            out_shape=jax.ShapeDtypeStruct((Mp, cout), jnp.float32),
            grid=(n_tiles,),
            in_specs=[
                pl.BlockSpec((tile_m, cin), lambda i: (i, 0)),
                pl.BlockSpec((tile_m, kp), lambda i: (i, 0)),
                pl.BlockSpec((kp + cin, cout), lambda i: (0, 0)),
                pl.BlockSpec((1, cout), lambda i: (0, 0)),
                pl.BlockSpec((1, cout), lambda i: (0, 0)),
            ],
            out_specs=pl.BlockSpec((Mp, cout), lambda i: (0, 0)),
            scratch_shapes=[pltpu.VMEM((1, cout), jnp.float32)],
            compiler_params=pltpu.CompilerParams(
                dimension_semantics=("arbitrary",),   # resident output: MUST be sequential
                vmem_limit_bytes=vmem_limit),
        )(x_b, p_b, w_b, g, b)
        return out[:M] if Mp != M else out

    # --- Non-resident fallback (large Mp*Cout): tiled parallel conv, exact
    # two-pass stats in XLA, then a tiled parallel BN+ReLU pass.
    y = pl.pallas_call(
        _bottleneck_conv_kernel,
        out_shape=jax.ShapeDtypeStruct((Mp, cout), jnp.float32),
        grid=(n_tiles,),
        in_specs=[
            pl.BlockSpec((tile_m, cin), lambda i: (i, 0)),
            pl.BlockSpec((tile_m, kp), lambda i: (i, 0)),
            pl.BlockSpec((kp + cin, cout), lambda i: (0, 0)),
        ],
        out_specs=pl.BlockSpec((tile_m, cout), lambda i: (i, 0)),
        compiler_params=pltpu.CompilerParams(
            dimension_semantics=("parallel",)),
    )(x_b, p_b, w_b)
    yv = y[:M] if Mp != M else y
    mean = jnp.mean(yv, axis=0, keepdims=True)
    var = jnp.mean(jnp.square(yv - mean), axis=0, keepdims=True)
    scale = g * jax.lax.rsqrt(var + EPS)
    shift = b - mean * scale
    out = pl.pallas_call(
        _bn_relu_kernel,
        out_shape=jax.ShapeDtypeStruct((Mp, cout), jnp.float32),
        grid=(n_tiles,),
        in_specs=[
            pl.BlockSpec((tile_m, cout), lambda i: (i, 0)),
            pl.BlockSpec((1, cout), lambda i: (0, 0)),
            pl.BlockSpec((1, cout), lambda i: (0, 0)),
        ],
        out_specs=pl.BlockSpec((tile_m, cout), lambda i: (i, 0)),
        compiler_params=pltpu.CompilerParams(
            dimension_semantics=("parallel",)),
    )(y, scale, shift)
    return out[:M] if Mp != M else out


# --------------------------------------------------------------------------
# Glue: adaptive pooling / bilinear upsample as small precomputed linear maps
# --------------------------------------------------------------------------

def _adaptive_pool_matrix(in_size, out_size):
    m = np.zeros((out_size, in_size), np.float32)
    for i in range(out_size):
        start = (i * in_size) // out_size
        end = int(np.ceil((i + 1) * in_size / out_size))
        m[i, start:end] = 1.0 / (end - start)
    return jnp.asarray(m)


def _bilinear_upsample_matrix(in_size, out_size):
    # PyTorch F.upsample(..., mode='bilinear', align_corners=True), per axis
    m = np.zeros((out_size, in_size), np.float32)
    if in_size == 1 or out_size == 1:
        m[:, 0] = 1.0
    else:
        for i in range(out_size):
            src = i * (in_size - 1) / (out_size - 1)
            i0 = int(np.floor(src))
            i1 = min(i0 + 1, in_size - 1)
            frac = src - i0
            m[i, i0] += 1.0 - frac
            m[i, i1] += frac
    return jnp.asarray(m)


# --------------------------------------------------------------------------
# Parameters + forward
# --------------------------------------------------------------------------

def init_psp_params(key, in_features=64, out_features=32, sizes=(1, 2, 3, 6)):
    S = len(sizes)
    cmid = in_features // 4
    # NOTE: PyTorch uses in_features*(len(sizes)//4 + 1), which equals the real
    # concatenated channel count (in_features + S*cmid) only when S == 4.
    cin_bottle = in_features + S * cmid
    k_stage, k_bott = jax.random.split(key)
    stage_keys = jax.random.split(k_stage, S)
    stage_w = jnp.stack([
        jax.random.normal(stage_keys[i], (in_features, cmid), jnp.float32)
        * (1.0 / np.sqrt(in_features))
        for i in range(S)
    ])
    return {
        "stage_w": stage_w,                                   # (S, Cin, Cmid)
        # PyTorch BatchNorm2d(affine=True) init: weight=1, bias=0
        "stage_gamma": jnp.ones((S, 1, cmid), jnp.float32),
        "stage_beta": jnp.zeros((S, 1, cmid), jnp.float32),
        # row order = torch.cat([stage outputs..., feats], dim=channel)
        "bott_w": jax.random.normal(k_bott, (cin_bottle, out_features),
                                    jnp.float32) * (1.0 / np.sqrt(cin_bottle)),
        "bott_gamma": jnp.ones((out_features,), jnp.float32),
        "bott_beta": jnp.zeros((out_features,), jnp.float32),
    }


@functools.partial(jax.jit, static_argnames=("sizes",))
def psp_forward(params, feats_nchw, sizes=(1, 2, 3, 6)):
    # layout: input/output NCHW (PyTorch convention); kernels run channels-last
    N, C, H, W = feats_nchw.shape
    x = jnp.transpose(feats_nchw, (0, 2, 3, 1))               # NHWC
    cmid = params["stage_w"].shape[-1]
    R = _round_up(N * max(sizes) ** 2, 8)                     # common slab rows

    # --- pooled slabs for all stages (tiny linear maps), zero-padded + stacked
    slabs, counts = [], []
    for s in sizes:
        ph = _adaptive_pool_matrix(H, s)
        pw = _adaptive_pool_matrix(W, s)
        pooled = jnp.einsum("sh,tw,nhwc->nstc", ph, pw, x, precision="highest")
        slab = pooled.reshape(N * s * s, C)
        slab = jnp.pad(slab, ((0, R - N * s * s), (0, 0)))
        slabs.append(slab)
        counts.append(N * s * s)
    pooled_stacked = jnp.stack(slabs, axis=0)                 # (S, R, C)

    # --- one grid-less call for all stage conv+BN+ReLU paths (lane-dense out)
    stage_out = stages_conv_bn_relu(pooled_stacked,
                                    params["stage_w"],
                                    params["stage_gamma"],
                                    params["stage_beta"],
                                    counts=tuple(counts))     # (R, S*cmid)

    # --- bilinear upsample each stage output (align_corners=True linear maps)
    priors = []
    for idx, s in enumerate(sizes):
        y = stage_out[:N * s * s, idx * cmid:(idx + 1) * cmid]
        y = y.reshape(N, s, s, cmid)
        uh = _bilinear_upsample_matrix(s, H)
        uw = _bilinear_upsample_matrix(s, W)
        up = jnp.einsum("hs,wt,nstc->nhwc", uh, uw, y, precision="highest")
        priors.append(up.reshape(N * H * W, cmid))
    # one concatenated prior operand -> 2 DMAs / 2 wide dots per tile in kernel
    priors_cat = jnp.concatenate(priors, axis=-1)             # (M, S*cmid)

    # --- fused bottleneck (split-K conv over [priors, feats]) + BN + ReLU
    x2d = x.reshape(N * H * W, C)
    out2d = bottleneck_fused(x2d, priors_cat, params["bott_w"],
                             params["bott_gamma"], params["bott_beta"])
    out = out2d.reshape(N, H, W, -1)
    # the outer self.relu is idempotent on the already-ReLU'd bottleneck output
    return jnp.transpose(out, (0, 3, 1, 2))                   # back to NCHW


# --------------------------------------------------------------------------
# Pure-JAX reference (mirrors the PyTorch module) for a correctness check
# --------------------------------------------------------------------------

def _psp_reference(params, feats_nchw, sizes):
    N, C, H, W = feats_nchw.shape
    x = jnp.transpose(feats_nchw, (0, 2, 3, 1))
    cmid = params["stage_w"].shape[-1]
    priors = []
    for idx, s in enumerate(sizes):
        ph = _adaptive_pool_matrix(H, s)
        pw = _adaptive_pool_matrix(W, s)
        pooled = jnp.einsum("sh,tw,nhwc->nstc", ph, pw, x, precision="highest")
        y = jnp.einsum("nstc,cd->nstd", pooled, params["stage_w"][idx],
                       precision="highest")
        y2 = y.reshape(-1, cmid)
        mean = jnp.mean(y2, axis=0)
        var = jnp.mean(jnp.square(y2 - mean), axis=0)
        yn = (y - mean) * jax.lax.rsqrt(var + EPS)
        yr = jnp.maximum(yn * params["stage_gamma"][idx, 0]
                         + params["stage_beta"][idx, 0], 0.0)
        uh = _bilinear_upsample_matrix(s, H)
        uw = _bilinear_upsample_matrix(s, W)
        priors.append(jnp.einsum("hs,wt,nstc->nhwc", uh, uw, yr,
                                 precision="highest"))
    priors.append(x)
    cat = jnp.concatenate(priors, axis=-1)
    y = jnp.einsum("nhwc,cd->nhwd", cat, params["bott_w"], precision="highest")
    y2 = y.reshape(-1, y.shape[-1])
    mean = jnp.mean(y2, axis=0)
    var = jnp.mean(jnp.square(y2 - mean), axis=0)
    yn = (y - mean) * jax.lax.rsqrt(var + EPS)
    out = jnp.maximum(yn * params["bott_gamma"] + params["bott_beta"], 0.0)
    return jnp.transpose(out, (0, 3, 1, 2))


# --------------------------------------------------------------------------

if __name__ == "__main__":
    key = jax.random.PRNGKey(0)
    k_params, k_x = jax.random.split(key)

    N, C, H, W = 2, 64, 16, 16          # small shapes consistent with the module
    OUT_FEATURES = 32
    SIZES = (1, 2, 3, 6)

    params = init_psp_params(k_params, in_features=C, out_features=OUT_FEATURES,
                             sizes=SIZES)
    feats = jax.random.normal(k_x, (N, C, H, W), jnp.float32)

    out = psp_forward(params, feats, sizes=SIZES)
    out = jax.block_until_ready(out)

    assert out.shape == (N, OUT_FEATURES, H, W), out.shape
    assert bool(jnp.all(jnp.isfinite(out)))
    assert bool(jnp.all(out >= 0.0))    # ReLU output

    # structural correctness vs. a pure-JAX reference (tolerance covers bf16
    # streamed operands with f32 accumulation and default MXU precision vs the
    # precision="highest" reference)
    ref = jax.block_until_ready(_psp_reference(params, feats, SIZES))
    max_err = float(jnp.max(jnp.abs(out - ref)))
    assert max_err < 5e-2, f"max abs err vs reference: {max_err}"

    print("KERNEL_OK")
</pallas_src>

<mosaic_0001>
module attributes {stable_mosaic.version = 11 : i64} {
  func.func @_stages_kernel(%arg0: memref<4x72x64xf32, #tpu.memory_space<vmem>>, %arg1: memref<4x64x16xf32, #tpu.memory_space<vmem>>, %arg2: memref<4x1x16xf32, #tpu.memory_space<vmem>>, %arg3: memref<4x1x16xf32, #tpu.memory_space<vmem>>, %arg4: memref<72x64xf32, #tpu.memory_space<vmem>>) attributes {dimension_semantics = [], scalar_prefetch = 0 : i64, scratch_operands = 0 : i64, tpu.core_type = #tpu.core_type<tc>} {
    %c0 = arith.constant 0 : index
    %c0_0 = arith.constant 0 : index
    %c0_1 = arith.constant 0 : index
    %0 = vector.load %arg0[%c0, %c0_0, %c0_1] : memref<4x72x64xf32, #tpu.memory_space<vmem>>, vector<1x72x64xf32>
    %1 = vector.shape_cast %0 : vector<1x72x64xf32> to vector<72x64xf32>
    %c0_2 = arith.constant 0 : index
    %c0_3 = arith.constant 0 : index
    %c0_4 = arith.constant 0 : index
    %2 = vector.load %arg1[%c0_2, %c0_3, %c0_4] : memref<4x64x16xf32, #tpu.memory_space<vmem>>, vector<1x64x16xf32>
    %3 = vector.shape_cast %2 : vector<1x64x16xf32> to vector<64x16xf32>
    %cst = arith.constant dense<0.000000e+00> : vector<72x16xf32>
    %4 = tpu.matmul %1, %3, %cst {dimension_numbers = #tpu.dot_dimension_numbers<[1], [0], [0], [1], [0, 0, 1, 1], [], []>} : vector<72x64xf32>, vector<64x16xf32>, vector<72x16xf32> -> vector<72x16xf32>
    %cst_5 = arith.constant dense<0.000000e+00> : vector<16xf32>
    %5 = vector.multi_reduction <add>, %4, %cst_5 [0] : vector<72x16xf32> to vector<16xf32>
    %6 = vector.shape_cast %5 : vector<16xf32> to vector<1x16xf32>
    %cst_6 = arith.constant 5.000000e-01 : f32
    %7 = vector.broadcast %cst_6 : f32 to vector<1x16xf32>
    %8 = arith.mulf %6, %7 : vector<1x16xf32>
    %9 = vector.broadcast %8 : vector<1x16xf32> to vector<72x16xf32>
    %10 = arith.subf %4, %9 : vector<72x16xf32>
    %11 = tpu.iota {dimensions = array<i32: 0>} : vector<72x16xi32>
    %c2_i32 = arith.constant 2 : i32
    %12 = vector.broadcast %c2_i32 : i32 to vector<72x16xi32>
    %13 = arith.cmpi slt, %11, %12 : vector<72x16xi32>
    %14 = arith.mulf %10, %10 : vector<72x16xf32>
    %cst_7 = arith.constant 0.000000e+00 : f32
    %15 = vector.broadcast %cst_7 : f32 to vector<72x16xf32>
    %16 = arith.select %13, %14, %15 : vector<72x16xi1>, vector<72x16xf32>
    %cst_8 = arith.constant dense<0.000000e+00> : vector<16xf32>
    %17 = vector.multi_reduction <add>, %16, %cst_8 [0] : vector<72x16xf32> to vector<16xf32>
    %18 = vector.shape_cast %17 : vector<16xf32> to vector<1x16xf32>
    %cst_9 = arith.constant 5.000000e-01 : f32
    %19 = vector.broadcast %cst_9 : f32 to vector<1x16xf32>
    %20 = arith.mulf %18, %19 : vector<1x16xf32>
    %c0_10 = arith.constant 0 : index
    %c0_11 = arith.constant 0 : index
    %c0_12 = arith.constant 0 : index
    %21 = vector.load %arg2[%c0_10, %c0_11, %c0_12] : memref<4x1x16xf32, #tpu.memory_space<vmem>>, vector<1x1x16xf32>
    %22 = vector.shape_cast %21 : vector<1x1x16xf32> to vector<1x16xf32>
    %cst_13 = arith.constant 9.99999974E-6 : f32
    %23 = vector.broadcast %cst_13 : f32 to vector<1x16xf32>
    %24 = arith.addf %20, %23 : vector<1x16xf32>
    %25 = math.rsqrt %24 : vector<1x16xf32>
    %26 = arith.mulf %22, %25 : vector<1x16xf32>
    %27 = vector.broadcast %26 : vector<1x16xf32> to vector<72x16xf32>
    %28 = arith.mulf %10, %27 : vector<72x16xf32>
    %c0_14 = arith.constant 0 : index
    %c0_15 = arith.constant 0 : index
    %c0_16 = arith.constant 0 : index
    %29 = vector.load %arg3[%c0_14, %c0_15, %c0_16] : memref<4x1x16xf32, #tpu.memory_space<vmem>>, vector<1x1x16xf32>
    %30 = vector.shape_cast %29 : vector<1x1x16xf32> to vector<1x16xf32>
    %31 = vector.broadcast %30 : vector<1x16xf32> to vector<72x16xf32>
    %32 = arith.addf %28, %31 : vector<72x16xf32>
    %cst_17 = arith.constant 0.000000e+00 : f32
    %33 = vector.broadcast %cst_17 : f32 to vector<72x16xf32>
    %34 = arith.maximumf %32, %33 : vector<72x16xf32>
    %c1 = arith.constant 1 : index
    %c0_18 = arith.constant 0 : index
    %c0_19 = arith.constant 0 : index
    %35 = vector.load %arg0[%c1, %c0_18, %c0_19] : memref<4x72x64xf32, #tpu.memory_space<vmem>>, vector<1x72x64xf32>
    %36 = vector.shape_cast %35 : vector<1x72x64xf32> to vector<72x64xf32>
    %c1_20 = arith.constant 1 : index
    %c0_21 = arith.constant 0 : index
    %c0_22 = arith.constant 0 : index
    %37 = vector.load %arg1[%c1_20, %c0_21, %c0_22] : memref<4x64x16xf32, #tpu.memory_space<vmem>>, vector<1x64x16xf32>
    %38 = vector.shape_cast %37 : vector<1x64x16xf32> to vector<64x16xf32>
    %cst_23 = arith.constant dense<0.000000e+00> : vector<72x16xf32>
    %39 = tpu.matmul %36, %38, %cst_23 {dimension_numbers = #tpu.dot_dimension_numbers<[1], [0], [0], [1], [0, 0, 1, 1], [], []>} : vector<72x64xf32>, vector<64x16xf32>, vector<72x16xf32> -> vector<72x16xf32>
    %cst_24 = arith.constant dense<0.000000e+00> : vector<16xf32>
    %40 = vector.multi_reduction <add>, %39, %cst_24 [0] : vector<72x16xf32> to vector<16xf32>
    %41 = vector.shape_cast %40 : vector<16xf32> to vector<1x16xf32>
    %cst_25 = arith.constant 1.250000e-01 : f32
    %42 = vector.broadcast %cst_25 : f32 to vector<1x16xf32>
    %43 = arith.mulf %41, %42 : vector<1x16xf32>
    %44 = vector.broadcast %43 : vector<1x16xf32> to vector<72x16xf32>
    %45 = arith.subf %39, %44 : vector<72x16xf32>
    %46 = tpu.iota {dimensions = array<i32: 0>} : vector<72x16xi32>
    %c8_i32 = arith.constant 8 : i32
    %47 = vector.broadcast %c8_i32 : i32 to vector<72x16xi32>
    %48 = arith.cmpi slt, %46, %47 : vector<72x16xi32>
    %49 = arith.mulf %45, %45 : vector<72x16xf32>
    %cst_26 = arith.constant 0.000000e+00 : f32
    %50 = vector.broadcast %cst_26 : f32 to vector<72x16xf32>
    %51 = arith.select %48, %49, %50 : vector<72x16xi1>, vector<72x16xf32>
    %cst_27 = arith.constant dense<0.000000e+00> : vector<16xf32>
    %52 = vector.multi_reduction <add>, %51, %cst_27 [0] : vector<72x16xf32> to vector<16xf32>
    %53 = vector.shape_cast %52 : vector<16xf32> to vector<1x16xf32>
    %cst_28 = arith.constant 1.250000e-01 : f32
    %54 = vector.broadcast %cst_28 : f32 to vector<1x16xf32>
    %55 = arith.mulf %53, %54 : vector<1x16xf32>
    %c1_29 = arith.constant 1 : index
    %c0_30 = arith.constant 0 : index
    %c0_31 = arith.constant 0 : index
    %56 = vector.load %arg2[%c1_29, %c0_30, %c0_31] : memref<4x1x16xf32, #tpu.memory_space<vmem>>, vector<1x1x16xf32>
    %57 = vector.shape_cast %56 : vector<1x1x16xf32> to vector<1x16xf32>
    %cst_32 = arith.constant 9.99999974E-6 : f32
    %58 = vector.broadcast %cst_32 : f32 to vector<1x16xf32>
    %59 = arith.addf %55, %58 : vector<1x16xf32>
    %60 = math.rsqrt %59 : vector<1x16xf32>
    %61 = arith.mulf %57, %60 : vector<1x16xf32>
    %62 = vector.broadcast %61 : vector<1x16xf32> to vector<72x16xf32>
    %63 = arith.mulf %45, %62 : vector<72x16xf32>
    %c1_33 = arith.constant 1 : index
    %c0_34 = arith.constant 0 : index
    %c0_35 = arith.constant 0 : index
    %64 = vector.load %arg3[%c1_33, %c0_34, %c0_35] : memref<4x1x16xf32, #tpu.memory_space<vmem>>, vector<1x1x16xf32>
    %65 = vector.shape_cast %64 : vector<1x1x16xf32> to vector<1x16xf32>
    %66 = vector.broadcast %65 : vector<1x16xf32> to vector<72x16xf32>
    %67 = arith.addf %63, %66 : vector<72x16xf32>
    %cst_36 = arith.constant 0.000000e+00 : f32
    %68 = vector.broadcast %cst_36 : f32 to vector<72x16xf32>
    %69 = arith.maximumf %67, %68 : vector<72x16xf32>
    %c2 = arith.constant 2 : index
    %c0_37 = arith.constant 0 : index
    %c0_38 = arith.constant 0 : index
    %70 = vector.load %arg0[%c2, %c0_37, %c0_38] : memref<4x72x64xf32, #tpu.memory_space<vmem>>, vector<1x72x64xf32>
    %71 = vector.shape_cast %70 : vector<1x72x64xf32> to vector<72x64xf32>
    %c2_39 = arith.constant 2 : index
    %c0_40 = arith.constant 0 : index
    %c0_41 = arith.constant 0 : index
    %72 = vector.load %arg1[%c2_39, %c0_40, %c0_41] : memref<4x64x16xf32, #tpu.memory_space<vmem>>, vector<1x64x16xf32>
    %73 = vector.shape_cast %72 : vector<1x64x16xf32> to vector<64x16xf32>
    %cst_42 = arith.constant dense<0.000000e+00> : vector<72x16xf32>
    %74 = tpu.matmul %71, %73, %cst_42 {dimension_numbers = #tpu.dot_dimension_numbers<[1], [0], [0], [1], [0, 0, 1, 1], [], []>} : vector<72x64xf32>, vector<64x16xf32>, vector<72x16xf32> -> vector<72x16xf32>
    %cst_43 = arith.constant dense<0.000000e+00> : vector<16xf32>
    %75 = vector.multi_reduction <add>, %74, %cst_43 [0] : vector<72x16xf32> to vector<16xf32>
    %76 = vector.shape_cast %75 : vector<16xf32> to vector<1x16xf32>
    %cst_44 = arith.constant 0.055555556 : f32
    %77 = vector.broadcast %cst_44 : f32 to vector<1x16xf32>
    %78 = arith.mulf %76, %77 : vector<1x16xf32>
    %79 = vector.broadcast %78 : vector<1x16xf32> to vector<72x16xf32>
    %80 = arith.subf %74, %79 : vector<72x16xf32>
    %81 = tpu.iota {dimensions = array<i32: 0>} : vector<72x16xi32>
    %c18_i32 = arith.constant 18 : i32
    %82 = vector.broadcast %c18_i32 : i32 to vector<72x16xi32>
    %83 = arith.cmpi slt, %81, %82 : vector<72x16xi32>
    %84 = arith.mulf %80, %80 : vector<72x16xf32>
    %cst_45 = arith.constant 0.000000e+00 : f32
    %85 = vector.broadcast %cst_45 : f32 to vector<72x16xf32>
    %86 = arith.select %83, %84, %85 : vector<72x16xi1>, vector<72x16xf32>
    %cst_46 = arith.constant dense<0.000000e+00> : vector<16xf32>
    %87 = vector.multi_reduction <add>, %86, %cst_46 [0] : vector<72x16xf32> to vector<16xf32>
    %88 = vector.shape_cast %87 : vector<16xf32> to vector<1x16xf32>
    %cst_47 = arith.constant 0.055555556 : f32
    %89 = vector.broadcast %cst_47 : f32 to vector<1x16xf32>
    %90 = arith.mulf %88, %89 : vector<1x16xf32>
    %c2_48 = arith.constant 2 : index
    %c0_49 = arith.constant 0 : index
    %c0_50 = arith.constant 0 : index
    %91 = vector.load %arg2[%c2_48, %c0_49, %c0_50] : memref<4x1x16xf32, #tpu.memory_space<vmem>>, vector<1x1x16xf32>
    %92 = vector.shape_cast %91 : vector<1x1x16xf32> to vector<1x16xf32>
    %cst_51 = arith.constant 9.99999974E-6 : f32
    %93 = vector.broadcast %cst_51 : f32 to vector<1x16xf32>
    %94 = arith.addf %90, %93 : vector<1x16xf32>
    %95 = math.rsqrt %94 : vector<1x16xf32>
    %96 = arith.mulf %92, %95 : vector<1x16xf32>
    %97 = vector.broadcast %96 : vector<1x16xf32> to vector<72x16xf32>
    %98 = arith.mulf %80, %97 : vector<72x16xf32>
    %c2_52 = arith.constant 2 : index
    %c0_53 = arith.constant 0 : index
    %c0_54 = arith.constant 0 : index
    %99 = vector.load %arg3[%c2_52, %c0_53, %c0_54] : memref<4x1x16xf32, #tpu.memory_space<vmem>>, vector<1x1x16xf32>
    %100 = vector.shape_cast %99 : vector<1x1x16xf32> to vector<1x16xf32>
    %101 = vector.broadcast %100 : vector<1x16xf32> to vector<72x16xf32>
    %102 = arith.addf %98, %101 : vector<72x16xf32>
    %cst_55 = arith.constant 0.000000e+00 : f32
    %103 = vector.broadcast %cst_55 : f32 to vector<72x16xf32>
    %104 = arith.maximumf %102, %103 : vector<72x16xf32>
    %c3 = arith.constant 3 : index
    %c0_56 = arith.constant 0 : index
    %c0_57 = arith.constant 0 : index
    %105 = vector.load %arg0[%c3, %c0_56, %c0_57] : memref<4x72x64xf32, #tpu.memory_space<vmem>>, vector<1x72x64xf32>
    %106 = vector.shape_cast %105 : vector<1x72x64xf32> to vector<72x64xf32>
    %c3_58 = arith.constant 3 : index
    %c0_59 = arith.constant 0 : index
    %c0_60 = arith.constant 0 : index
    %107 = vector.load %arg1[%c3_58, %c0_59, %c0_60] : memref<4x64x16xf32, #tpu.memory_space<vmem>>, vector<1x64x16xf32>
    %108 = vector.shape_cast %107 : vector<1x64x16xf32> to vector<64x16xf32>
    %cst_61 = arith.constant dense<0.000000e+00> : vector<72x16xf32>
    %109 = tpu.matmul %106, %108, %cst_61 {dimension_numbers = #tpu.dot_dimension_numbers<[1], [0], [0], [1], [0, 0, 1, 1], [], []>} : vector<72x64xf32>, vector<64x16xf32>, vector<72x16xf32> -> vector<72x16xf32>
    %cst_62 = arith.constant dense<0.000000e+00> : vector<16xf32>
    %110 = vector.multi_reduction <add>, %109, %cst_62 [0] : vector<72x16xf32> to vector<16xf32>
    %111 = vector.shape_cast %110 : vector<16xf32> to vector<1x16xf32>
    %cst_63 = arith.constant 0.013888889 : f32
    %112 = vector.broadcast %cst_63 : f32 to vector<1x16xf32>
    %113 = arith.mulf %111, %112 : vector<1x16xf32>
    %114 = vector.broadcast %113 : vector<1x16xf32> to vector<72x16xf32>
    %115 = arith.subf %109, %114 : vector<72x16xf32>
    %116 = tpu.iota {dimensions = array<i32: 0>} : vector<72x16xi32>
    %c72_i32 = arith.constant 72 : i32
    %117 = vector.broadcast %c72_i32 : i32 to vector<72x16xi32>
    %118 = arith.cmpi slt, %116, %117 : vector<72x16xi32>
    %119 = arith.mulf %115, %115 : vector<72x16xf32>
    %cst_64 = arith.constant 0.000000e+00 : f32
    %120 = vector.broadcast %cst_64 : f32 to vector<72x16xf32>
    %121 = arith.select %118, %119, %120 : vector<72x16xi1>, vector<72x16xf32>
    %cst_65 = arith.constant dense<0.000000e+00> : vector<16xf32>
    %122 = vector.multi_reduction <add>, %121, %cst_65 [0] : vector<72x16xf32> to vector<16xf32>
    %123 = vector.shape_cast %122 : vector<16xf32> to vector<1x16xf32>
    %cst_66 = arith.constant 0.013888889 : f32
    %124 = vector.broadcast %cst_66 : f32 to vector<1x16xf32>
    %125 = arith.mulf %123, %124 : vector<1x16xf32>
    %c3_67 = arith.constant 3 : index
    %c0_68 = arith.constant 0 : index
    %c0_69 = arith.constant 0 : index
    %126 = vector.load %arg2[%c3_67, %c0_68, %c0_69] : memref<4x1x16xf32, #tpu.memory_space<vmem>>, vector<1x1x16xf32>
    %127 = vector.shape_cast %126 : vector<1x1x16xf32> to vector<1x16xf32>
    %cst_70 = arith.constant 9.99999974E-6 : f32
    %128 = vector.broadcast %cst_70 : f32 to vector<1x16xf32>
    %129 = arith.addf %125, %128 : vector<1x16xf32>
    %130 = math.rsqrt %129 : vector<1x16xf32>
    %131 = arith.mulf %127, %130 : vector<1x16xf32>
    %132 = vector.broadcast %131 : vector<1x16xf32> to vector<72x16xf32>
    %133 = arith.mulf %115, %132 : vector<72x16xf32>
    %c3_71 = arith.constant 3 : index
    %c0_72 = arith.constant 0 : index
    %c0_73 = arith.constant 0 : index
    %134 = vector.load %arg3[%c3_71, %c0_72, %c0_73] : memref<4x1x16xf32, #tpu.memory_space<vmem>>, vector<1x1x16xf32>
    %135 = vector.shape_cast %134 : vector<1x1x16xf32> to vector<1x16xf32>
    %136 = vector.broadcast %135 : vector<1x16xf32> to vector<72x16xf32>
    %137 = arith.addf %133, %136 : vector<72x16xf32>
    %cst_74 = arith.constant 0.000000e+00 : f32
    %138 = vector.broadcast %cst_74 : f32 to vector<72x16xf32>
    %139 = arith.maximumf %137, %138 : vector<72x16xf32>
    %140 = tpu.concatenate %34, %69, %104, %139 in 1 : vector<72x16xf32>, vector<72x16xf32>, vector<72x16xf32>, vector<72x16xf32> -> vector<72x64xf32>
    %c0_75 = arith.constant 0 : index
    %c0_76 = arith.constant 0 : index
    %141 = vector.load %arg4[%c0_75, %c0_76] : memref<72x64xf32, #tpu.memory_space<vmem>>, vector<72x64xf32>
    tpu.vector_store %arg4[%c0_75, %c0_76], %140 {strides = array<i32>} : memref<72x64xf32, #tpu.memory_space<vmem>>, vector<72x64xf32>,
    return
  }
}

module attributes {stable_mosaic.version = 11 : i64} {
  func.func @_bottleneck_resident_kernel(%arg0: i32, %arg1: memref<512x64xbf16, #tpu.memory_space<vmem>>, %arg2: memref<512x64xbf16, #tpu.memory_space<vmem>>, %arg3: memref<128x32xbf16, #tpu.memory_space<vmem>>, %arg4: memref<1x32xf32, #tpu.memory_space<vmem>>, %arg5: memref<1x32xf32, #tpu.memory_space<vmem>>, %arg6: memref<512x32xf32, #tpu.memory_space<vmem>>, %arg7: memref<1x32xf32, #tpu.memory_space<vmem>>) attributes {dimension_semantics = [#tpu.dimension_semantics<arbitrary>], iteration_bounds = array<i64: 1>, scalar_prefetch = 0 : i64, scratch_operands = 1 : i64, tpu.core_type = #tpu.core_type<tc>, window_params = [{transform_indices = @transform_0, window_bounds = array<i64: 512, 64>}, {transform_indices = @transform_1, window_bounds = array<i64: 512, 64>}, {pipeline_mode = #tpu.pipeline_mode<synchronous>, transform_indices = @transform_2, window_bounds = array<i64: 128, 32>}, {pipeline_mode = #tpu.pipeline_mode<synchronous>, transform_indices = @transform_3, window_bounds = array<i64: 1, 32>}, {pipeline_mode = #tpu.pipeline_mode<synchronous>, transform_indices = @transform_4, window_bounds = array<i64: 1, 32>}, {pipeline_mode = #tpu.pipeline_mode<synchronous>, transform_indices = @transform_5, window_bounds = array<i64: 512, 32>}]} {
    %c0_i32 = arith.constant 0 : i32
    %0 = arith.cmpi eq, %arg0, %c0_i32 : i32
    %1 = arith.extui %0 : i1 to i32
    %c0_i32_0 = arith.constant 0 : i32
    %2 = arith.cmpi ne, %1, %c0_i32_0 : i32
    scf.if %2 {
      %cst_16 = arith.constant 0.000000e+00 : f32
      %22 = vector.broadcast %cst_16 : f32 to vector<1x32xf32>
      %c0_17 = arith.constant 0 : index
      %c0_18 = arith.constant 0 : index
      %23 = vector.load %arg7[%c0_17, %c0_18] : memref<1x32xf32, #tpu.memory_space<vmem>>, vector<1x32xf32>
      tpu.vector_store %arg7[%c0_17, %c0_18], %22 {strides = array<i32>} : memref<1x32xf32, #tpu.memory_space<vmem>>, vector<1x32xf32>,
    } else {
    }
    %c0 = arith.constant 0 : index
    %c0_1 = arith.constant 0 : index
    %3 = vector.load %arg2[%c0, %c0_1] : memref<512x64xbf16, #tpu.memory_space<vmem>>, vector<512x64xbf16>
    %c0_2 = arith.constant 0 : index
    %c0_3 = arith.constant 0 : index
    %4 = vector.load %arg3[%c0_2, %c0_3] : memref<128x32xbf16, #tpu.memory_space<vmem>>, vector<64x32xbf16>
    %cst = arith.constant dense<0.000000e+00> : vector<512x32xf32>
    %5 = tpu.matmul %3, %4, %cst {dimension_numbers = #tpu.dot_dimension_numbers<[1], [0], [0], [1], [0, 0, 1, 1], [], []>} : vector<512x64xbf16>, vector<64x32xbf16>, vector<512x32xf32> -> vector<512x32xf32>
    %c0_4 = arith.constant 0 : index
    %c0_5 = arith.constant 0 : index
    %6 = vector.load %arg1[%c0_4, %c0_5] : memref<512x64xbf16, #tpu.memory_space<vmem>>, vector<512x64xbf16>
    %c64 = arith.constant 64 : index
    %c0_6 = arith.constant 0 : index
    %7 = vector.load %arg3[%c64, %c0_6] : memref<128x32xbf16, #tpu.memory_space<vmem>>, vector<64x32xbf16>
    %cst_7 = arith.constant dense<0.000000e+00> : vector<512x32xf32>
    %8 = tpu.matmul %6, %7, %cst_7 {dimension_numbers = #tpu.dot_dimension_numbers<[1], [0], [0], [1], [0, 0, 1, 1], [], []>} : vector<512x64xbf16>, vector<64x32xbf16>, vector<512x32xf32> -> vector<512x32xf32>
    %9 = arith.addf %5, %8 : vector<512x32xf32>
    %c512_i32 = arith.constant 512 : i32
    %10 = arith.muli %arg0, %c512_i32 : i32
    %11 = tpu.assume_multiple %10, 512 : i32
    %12 = arith.index_cast %11 : i32 to index
    %c0_8 = arith.constant 0 : index
    %13 = vector.load %arg6[%12, %c0_8] : memref<512x32xf32, #tpu.memory_space<vmem>>, vector<512x32xf32>
    tpu.vector_store %arg6[%12, %c0_8], %9 {strides = array<i32>} : memref<512x32xf32, #tpu.memory_space<vmem>>, vector<512x32xf32>,
    %c0_9 = arith.constant 0 : index
    %c0_10 = arith.constant 0 : index
    %14 = vector.load %arg7[%c0_9, %c0_10] : memref<1x32xf32, #tpu.memory_space<vmem>>, vector<1x32xf32>
    %cst_11 = arith.constant dense<0.000000e+00> : vector<32xf32>
    %15 = vector.multi_reduction <add>, %9, %cst_11 [0] : vector<512x32xf32> to vector<32xf32>
    %16 = vector.shape_cast %15 : vector<32xf32> to vector<1x32xf32>
    %17 = arith.addf %14, %16 : vector<1x32xf32>
    %c0_12 = arith.constant 0 : index
    %c0_13 = arith.constant 0 : index
    %18 = vector.load %arg7[%c0_12, %c0_13] : memref<1x32xf32, #tpu.memory_space<vmem>>, vector<1x32xf32>
    tpu.vector_store %arg7[%c0_12, %c0_13], %17 {strides = array<i32>} : memref<1x32xf32, #tpu.memory_space<vmem>>, vector<1x32xf32>,
    %c0_i32_14 = arith.constant 0 : i32
    %19 = arith.cmpi eq, %arg0, %c0_i32_14 : i32
    %20 = arith.extui %19 : i1 to i32
    %c0_i32_15 = arith.constant 0 : i32
    %21 = arith.cmpi ne, %20, %c0_i32_15 : i32
    scf.if %21 {
      %c0_16 = arith.constant 0 : index
      %c0_17 = arith.constant 0 : index
      %22 = vector.load %arg7[%c0_16, %c0_17] : memref<1x32xf32, #tpu.memory_space<vmem>>, vector<1x32xf32>
      %cst_18 = arith.constant 0.001953125 : f32
      %23 = vector.broadcast %cst_18 : f32 to vector<1x32xf32>
      %24 = arith.mulf %22, %23 : vector<1x32xf32>
      %cst_19 = arith.constant 0.000000e+00 : f32
      %25 = vector.broadcast %cst_19 : f32 to vector<1x32xf32>
      %c0_i32_20 = arith.constant 0 : i32
      %c512_i32_21 = arith.constant 512 : i32
      %26 = arith.muli %c0_i32_20, %c512_i32_21 : i32
      %27 = tpu.assume_multiple %26, 512 : i32
      %28 = arith.index_cast %27 : i32 to index
      %c0_22 = arith.constant 0 : index
      %29 = vector.load %arg6[%28, %c0_22] : memref<512x32xf32, #tpu.memory_space<vmem>>, vector<512x32xf32>
      %30 = vector.broadcast %24 : vector<1x32xf32> to vector<512x32xf32>
      %31 = arith.subf %29, %30 : vector<512x32xf32>
      %32 = arith.mulf %31, %31 : vector<512x32xf32>
      %cst_23 = arith.constant dense<0.000000e+00> : vector<32xf32>
      %33 = vector.multi_reduction <add>, %32, %cst_23 [0] : vector<512x32xf32> to vector<32xf32>
      %34 = vector.shape_cast %33 : vector<32xf32> to vector<1x32xf32>
      %35 = arith.addf %25, %34 : vector<1x32xf32>
      %c1_i32 = arith.constant 1 : i32
      %cst_24 = arith.constant 0.001953125 : f32
      %36 = vector.broadcast %cst_24 : f32 to vector<1x32xf32>
      %37 = arith.mulf %35, %36 : vector<1x32xf32>
      %c0_25 = arith.constant 0 : index
      %c0_26 = arith.constant 0 : index
      %38 = vector.load %arg4[%c0_25, %c0_26] : memref<1x32xf32, #tpu.memory_space<vmem>>, vector<1x32xf32>
      %cst_27 = arith.constant 9.99999974E-6 : f32
      %39 = vector.broadcast %cst_27 : f32 to vector<1x32xf32>
      %40 = arith.addf %37, %39 : vector<1x32xf32>
      %41 = math.rsqrt %40 : vector<1x32xf32>
      %42 = arith.mulf %38, %41 : vector<1x32xf32>
      %c0_28 = arith.constant 0 : index
      %c0_29 = arith.constant 0 : index
      %43 = vector.load %arg5[%c0_28, %c0_29] : memref<1x32xf32, #tpu.memory_space<vmem>>, vector<1x32xf32>
      %44 = arith.mulf %24, %42 : vector<1x32xf32>
      %45 = arith.subf %43, %44 : vector<1x32xf32>
      %c0_i32_30 = arith.constant 0 : i32
      %c512_i32_31 = arith.constant 512 : i32
      %46 = arith.muli %c0_i32_30, %c512_i32_31 : i32
      %47 = tpu.assume_multiple %46, 512 : i32
      %48 = arith.index_cast %47 : i32 to index
      %c0_32 = arith.constant 0 : index
      %49 = vector.load %arg6[%48, %c0_32] : memref<512x32xf32, #tpu.memory_space<vmem>>, vector<512x32xf32>
      %50 = vector.broadcast %42 : vector<1x32xf32> to vector<512x32xf32>
      %51 = arith.mulf %49, %50 : vector<512x32xf32>
      %52 = vector.broadcast %45 : vector<1x32xf32> to vector<512x32xf32>
      %53 = arith.addf %51, %52 : vector<512x32xf32>
      %cst_33 = arith.constant 0.000000e+00 : f32
      %54 = vector.broadcast %cst_33 : f32 to vector<512x32xf32>
      %55 = arith.maximumf %53, %54 : vector<512x32xf32>
      %56 = arith.index_cast %47 : i32 to index
      %c0_34 = arith.constant 0 : index
      %57 = vector.load %arg6[%56, %c0_34] : memref<512x32xf32, #tpu.memory_space<vmem>>, vector<512x32xf32>
      tpu.vector_store %arg6[%56, %c0_34], %55 {strides = array<i32>} : memref<512x32xf32, #tpu.memory_space<vmem>>, vector<512x32xf32>,
      %c1_i32_35 = arith.constant 1 : i32
    } else {
    }
    return
  }
  func.func @transform_0(%arg0: i32) -> (i32, i32) {
    %c0_i32 = arith.constant 0 : i32
    %c0_i32_0 = arith.constant 0 : i32
    return %arg0, %c0_i32 : i32, i32
  }
  func.func @transform_1(%arg0: i32) -> (i32, i32) {
    %c0_i32 = arith.constant 0 : i32
    %c0_i32_0 = arith.constant 0 : i32
    return %arg0, %c0_i32 : i32, i32
  }
  func.func @transform_2(%arg0: i32) -> (i32, i32) {
    %c0_i32 = arith.constant 0 : i32
    %c0_i32_0 = arith.constant 0 : i32
    %c0_i32_1 = arith.constant 0 : i32
    return %c0_i32, %c0_i32_0 : i32, i32
  }
  func.func @transform_3(%arg0: i32) -> (i32, i32) {
    %c0_i32 = arith.constant 0 : i32
    %c0_i32_0 = arith.constant 0 : i32
    %c0_i32_1 = arith.constant 0 : i32
    return %c0_i32, %c0_i32_0 : i32, i32
  }
  func.func @transform_4(%arg0: i32) -> (i32, i32) {
    %c0_i32 = arith.constant 0 : i32
    %c0_i32_0 = arith.constant 0 : i32
    %c0_i32_1 = arith.constant 0 : i32
    return %c0_i32, %c0_i32_0 : i32, i32
  }
  func.func @transform_5(%arg0: i32) -> (i32, i32) {
    %c0_i32 = arith.constant 0 : i32
    %c0_i32_0 = arith.constant 0 : i32
    %c0_i32_1 = arith.constant 0 : i32
    return %c0_i32, %c0_i32_0 : i32, i32
  }
}

</mosaic_0001>

<bundles_post_ra>
// kernel: psp_forward.2
= control target key start
LH: loop header
LB: loop body
LE: loop exit
PB: predicated region body
PF: predicated region fallthrough
CT: control target
= control target key end

     0   :  { %v1718_v0 = vmov 0.0|0.0   ;;  %vm1719_vm0 = vmmov 0   ;;  %v1720_v8 = vmov 0.0   ;;  %vm34_vm1 = vcmask 523264   ;;  %s1721_s25 = smov 16   ;;  %s1722_s30 = smov 32   ;;  %s2614_s1 = inlined_call_operand.vmem [shape: f32[4,64,16], index: 1, kind: input, shape index: {}]   ;;  %s2615_s0 = inlined_call_operand.vmem [shape: f32[4,72,64], index: 0, kind: input, shape index: {}]   ;;  %s2616_s2 = inlined_call_operand.vmem [shape: f32[4,1,16], index: 2, kind: input, shape index: {}]   ;;  %s2617_s3 = inlined_call_operand.vmem [shape: f32[4,1,16], index: 3, kind: input, shape index: {}]   ;;  %s2618_s4 = inlined_call_operand.vmem [shape: f32[72,64], index: 4, kind: output, shape index: {}]  }
   0x1   :  { %1656 = vmatprep.subr.bf16.mxu0 %v1718_v0  ;;  %1668 = vmatprep.subr.bf16.mxu1 %v1718_v0  ;;  %v26_v1 = vld [vmem:[%s2614_s1] sm:$0xff]  ;;  %v27_v2 = vld [vmem:[%s2614_s1 + $0x8] sm:$0xff]  ;;  %v28_v6 = vld [vmem:[%s2614_s1 + $0x10] sm:$0xff]  ;;  %vm172_vm2 = vcmask 130048   ;;  %vm1286_vm5 = vcmask 261120   ;;  %vm1296_vm6 = vcmask 392192  }
   0x2   :  { %v1338_v3 = vld [vmem:[%s2614_s1 + $0x40] sm:$0xff]  ;;  %v1657_v4 = vpack.c.bf16 %v27_v2, %v26_v1  ;;  %v1339_v5 = vld [vmem:[%s2614_s1 + $0x48] sm:$0xff]  ;;  %v29_v7 = vld [vmem:[%s2614_s1 + $0x18] sm:$0xff]  ;;  %1500 = vmatprep.mubr.msk.f32.mxu0 %vm1719_vm0, %v1720_v8  ;;  %1543 = vmatprep.mubr.msk.f32.mxu1 %vm1719_vm0, %v1720_v8 }
   0x3   :  { %v1669_v9 = vpack.c.bf16 %v1339_v5, %v1338_v3  ;;  %v1340_v10 = vld [vmem:[%s2614_s1 + $0x50] sm:$0xff]  ;;  %v1341_v11 = vld [vmem:[%s2614_s1 + $0x58] sm:$0xff]  ;;  %v1660_v12 = vpack.c.bf16 %v29_v7, %v28_v6  ;;  %v30_v14 = vld [vmem:[%s2614_s1 + $0x20] sm:$0xff] }
   0x4   :  { %1658 = vmatpush3.bf16.msra.mxu0 %v1657_v4  ;;  %v1672_v13 = vpack.c.bf16 %v1341_v11, %v1340_v10  ;;  %v31_v15 = vld [vmem:[%s2614_s1 + $0x28] sm:$0xff]  ;;  %v1342_v16 = vld [vmem:[%s2614_s1 + $0x60] sm:$0xff]  ;;  %v32_v20 = vld [vmem:[%s2614_s1 + $0x30] sm:$0xff] }
   0x5   :  { %1670 = vmatpush3.bf16.msra.mxu1 %v1669_v9  ;;  %1659 = vmatprep.subr.bf16.mxu0 %v1718_v0  ;;  %v1343_v17 = vld [vmem:[%s2614_s1 + $0x68] sm:$0xff]  ;;  %v1663_v18 = vpack.c.bf16 %v31_v15, %v30_v14  ;;  %v33_v21 = vld [vmem:[%s2614_s1 + $0x38] sm:$0xff]  ;;  %v1344_v22 = vld [vmem:[%s2614_s1 + $0x70] sm:$0xff] }
   0x6   :  { %1671 = vmatprep.subr.bf16.mxu1 %v1718_v0  ;;  %v1675_v19 = vpack.c.bf16 %v1343_v17, %v1342_v16  ;;  %v1345_v23 = vld [vmem:[%s2614_s1 + $0x78] sm:$0xff]  ;;  %v1666_v24 = vpack.c.bf16 %v33_v21, %v32_v20  ;;  %v1367_v26 = vld [vmem:[%s2614_s1 + $0x80] sm:$0xff]  ;;  %v1368_v27 = vld [vmem:[%s2614_s1 + $0x88] sm:$0xff] }
   0x7   :  { %v1678_v25 = vpack.c.bf16 %v1345_v23, %v1344_v22  ;;  %v1396_v28 = vld [vmem:[%s2614_s1 + $0xc0] sm:$0xff]  ;;  %v1397_v29 = vld [vmem:[%s2614_s1 + $0xc8] sm:$0xff]  ;;  %v1681_v31 = vpack.c.bf16 %v1368_v27, %v1367_v26  ;;  %v1369_v34 = vld [vmem:[%s2614_s1 + $0x90] sm:$0xff] }
   0x8   :  { %1661 = vmatpush3.bf16.msra.mxu0 %v1660_v12  ;;  %v17_v30 = vld [vmem:[%s2615_s0] sm:$0xff]  ;;  %v1329_v32 = vld [vmem:[%s2615_s0 + $0x48] sm:$0xff]  ;;  %v1693_v33 = vpack.c.bf16 %v1397_v29, %v1396_v28  ;;  %v1370_v35 = vld [vmem:[%s2614_s1 + $0x98] sm:$0xff] }
   0x9   :  { %1673 = vmatpush3.bf16.msra.mxu1 %v1672_v13  ;;  %1662 = vmatprep.subr.bf16.mxu0 %v1718_v0  ;;  %v1398_v36 = vld [vmem:[%s2614_s1 + $0xd0] sm:$0xff]  ;;  %v1399_v37 = vld [vmem:[%s2614_s1 + $0xd8] sm:$0xff]  ;;  %v18_v38 = vld [vmem:[%s2615_s0 + $0x8] sm:$0xff]  ;;  %v1684_v40 = vpack.c.bf16 %v1370_v35, %v1369_v34 }
   0xa   :  { %1674 = vmatprep.subr.bf16.mxu1 %v1718_v0  ;;  %v1330_v39 = vld [vmem:[%s2615_s0 + $0x50] sm:$0xff]  ;;  %v1696_v41 = vpack.c.bf16 %v1399_v37, %v1398_v36  ;;  %v1371_v42 = vld [vmem:[%s2614_s1 + $0xa0] sm:$0xff]  ;;  %v1372_v43 = vld [vmem:[%s2614_s1 + $0xa8] sm:$0xff] }
   0xb   :  { %v1400_v44 = vld [vmem:[%s2614_s1 + $0xe0] sm:$0xff]  ;;  %v1401_v45 = vld [vmem:[%s2614_s1 + $0xe8] sm:$0xff]  ;;  %v19_v46 = vld [vmem:[%s2615_s0 + $0x10] sm:$0xff]  ;;  %v1687_v48 = vpack.c.bf16 %v1372_v43, %v1371_v42 }
   0xc   :  { %1664 = vmatpush3.bf16.msra.mxu0 %v1663_v18  ;;  %v1331_v47 = vld [vmem:[%s2615_s0 + $0x58] sm:$0xff]  ;;  %v1699_v49 = vpack.c.bf16 %v1401_v45, %v1400_v44  ;;  %v1373_v50 = vld [vmem:[%s2614_s1 + $0xb0] sm:$0xff]  ;;  %v1332_v55 = vld [vmem:[%s2615_s0 + $0x60] sm:$0xff] }
   0xd   :  { %1676 = vmatpush3.bf16.msra.mxu1 %v1675_v19  ;;  %1665 = vmatprep.subr.bf16.mxu0 %v1718_v0  ;;  %v1374_v51 = vld [vmem:[%s2614_s1 + $0xb8] sm:$0xff]  ;;  %v1402_v52 = vld [vmem:[%s2614_s1 + $0xf0] sm:$0xff]  ;;  %v21_v58 = vld [vmem:[%s2615_s0 + $0x20] sm:$0xff] }
   0xe   :  { %1677 = vmatprep.subr.bf16.mxu1 %v1718_v0  ;;  %v1403_v53 = vld [vmem:[%s2614_s1 + $0xf8] sm:$0xff]  ;;  %v1690_v56 = vpack.c.bf16 %v1374_v51, %v1373_v50  ;;  %v1333_v59 = vld [vmem:[%s2615_s0 + $0x68] sm:$0xff]  ;;  %v1334_v61 = vld [vmem:[%s2615_s0 + $0x70] sm:$0xff] }
   0xf   :  { %v20_v54 = vld [vmem:[%s2615_s0 + $0x18] sm:$0xff]  ;;  %v1702_v57 = vpack.c.bf16 %v1403_v53, %v1402_v52  ;;  %v22_v60 = vld [vmem:[%s2615_s0 + $0x28] sm:$0xff]  ;;  %v23_v62 = vld [vmem:[%s2615_s0 + $0x30] sm:$0xff] }
  0x10   :  { %1667 = vmatpush3.bf16.msra.mxu0 %v1666_v24  ;;  %v1335_v63 = vld [vmem:[%s2615_s0 + $0x78] sm:$0xff]  ;;  %v1336_v1 = vld [vmem:[%s2615_s0 + $0x80] sm:$0xff]  ;;  %v1337_v3 = vld [vmem:[%s2615_s0 + $0x88] sm:$0xff] }
  0x11   :  { %1679 = vmatpush3.bf16.msra.mxu1 %v1678_v25  ;;  %1680 = vmatprep.subr.bf16.mxu0 %v1718_v0  ;;  %v25_v2 = vld [vmem:[%s2615_s0 + $0x40] sm:$0xff]  ;;  %v1358_v4 = vld [vmem:[%s2615_s0 + $0x90] sm:$0xff]  ;;  %v1387_v5 = vld [vmem:[%s2615_s0 + $0xd8] sm:$0xff] }
  0x12   :  { %1692 = vmatprep.subr.bf16.mxu1 %v1718_v0  ;;  %v1359_v6 = vld [vmem:[%s2615_s0 + $0x98] sm:$0xff]  ;;  %v1388_v7 = vld [vmem:[%s2615_s0 + $0xe0] sm:$0xff]  ;;  %v1389_v10 = vld [vmem:[%s2615_s0 + $0xe8] sm:$0xff] }
  0x13   :  { %1501 = vmatmul.mubr.msk.f32.vlgmr.msra.gmra.mrb[0].mxu0 %vm34_vm1, %v17_v30  ;;  %v1360_v9 = vld [vmem:[%s2615_s0 + $0xa0] sm:$0xff]  ;;  %v1361_v11 = vld [vmem:[%s2615_s0 + $0xa8] sm:$0xff]  ;;  %v1390_v12 = vld [vmem:[%s2615_s0 + $0xf0] sm:$0xff] }
  0x14   :  { %1544 = vmatmul.mubr.msk.f32.vlgmr.msra.gmra.mrb[0].mxu1 %vm34_vm1, %v1329_v32  ;;  %1682 = vmatpush3.bf16.msra.mxu0 %v1681_v31  ;;  %v1362_v13 = vld [vmem:[%s2615_s0 + $0xb0] sm:$0xff]  ;;  %v1391_v14 = vld [vmem:[%s2615_s0 + $0xf8] sm:$0xff]  ;;  %v1392_v16 = vld [vmem:[%s2615_s0 + $0x100] sm:$0xff] }
  0x15   :  { %1503 = vmatprep.mubr.msk.f32.mxu0 %vm1719_vm0, %v1720_v8  ;;  %1546 = vmatprep.mubr.msk.f32.mxu1 %vm1719_vm0, %v1720_v8  ;;  %v1363_v15 = vld [vmem:[%s2615_s0 + $0xb8] sm:$0xff]  ;;  %v1364_v17 = vld [vmem:[%s2615_s0 + $0xc0] sm:$0xff]  ;;  %v1393_v18 = vld [vmem:[%s2615_s0 + $0x108] sm:$0xff] }
  0x16   :  { %1694 = vmatpush3.bf16.msra.mxu1 %v1693_v33  ;;  %1683 = vmatprep.subr.bf16.mxu0 %v1718_v0  ;;  %v1365_v19 = vld [vmem:[%s2615_s0 + $0xc8] sm:$0xff]  ;;  %v1394_v20 = vld [vmem:[%s2615_s0 + $0x110] sm:$0xff]  ;;  %v1395_v22 = vld [vmem:[%s2615_s0 + $0x118] sm:$0xff] }
  0x17   :  { %1504 = vmatmul.mubr.msk.f32.gmra.mrb[2].mxu0 %vm34_vm1, %v18_v38  ;;  %1695 = vmatprep.subr.bf16.mxu1 %v1718_v0  ;;  %v1366_v21 = vld [vmem:[%s2615_s0 + $0xd0] sm:$0xff] }
  0x18   :  { %1547 = vmatmul.mubr.msk.f32.gmra.mrb[2].mxu1 %vm34_vm1, %v1330_v39  ;;  %1506 = vmatprep.mubr.msk.f32.mxu0 %vm1719_vm0, %v1720_v8 }
  0x19   :  { %1549 = vmatprep.mubr.msk.f32.mxu1 %vm1719_vm0, %v1720_v8  ;;  %1685 = vmatpush3.bf16.msra.mxu0 %v1684_v40 }
  0x1a   :  { %1697 = vmatpush3.bf16.msra.mxu1 %v1696_v41  ;;  %1686 = vmatprep.subr.bf16.mxu0 %v1718_v0 }
  0x1b   :  { %1507 = vmatmul.mubr.msk.f32.gmra.mrb[4].mxu0 %vm34_vm1, %v19_v46  ;;  %1698 = vmatprep.subr.bf16.mxu1 %v1718_v0 }
  0x1c   :  { %1550 = vmatmul.mubr.msk.f32.gmra.mrb[4].mxu1 %vm34_vm1, %v1331_v47  ;;  %1509 = vmatprep.mubr.msk.f32.mxu0 %vm1719_vm0, %v1720_v8 }
  0x1d   :  { %1552 = vmatprep.mubr.msk.f32.mxu1 %vm1719_vm0, %v1720_v8  ;;  %1688 = vmatpush3.bf16.msra.mxu0 %v1687_v48 }
  0x1e   :  { %1700 = vmatpush3.bf16.msra.mxu1 %v1699_v49  ;;  %1689 = vmatprep.subr.bf16.mxu0 %v1718_v0 }
  0x1f   :  { %1510 = vmatmul.mubr.msk.f32.gmra.mrb[6].mxu0 %vm34_vm1, %v20_v54  ;;  %1701 = vmatprep.subr.bf16.mxu1 %v1718_v0  ;;  %v24_v0 = vld [vmem:[%s2615_s0 + $0x38] sm:$0xff] }
  0x20   :  { %1553 = vmatmul.mubr.msk.f32.gmra.mrb[6].mxu1 %vm34_vm1, %v1332_v55  ;;  %1512 = vmatprep.mubr.msk.f32.mxu0 %vm1719_vm0, %v1720_v8 }
  0x21   :  { %1555 = vmatprep.mubr.msk.f32.mxu1 %vm1719_vm0, %v1720_v8  ;;  %1691 = vmatpush3.bf16.msra.mxu0 %v1690_v56 }
  0x22   :  { %1703 = vmatpush3.bf16.msra.mxu1 %v1702_v57 }
  0x23   :  { %1513 = vmatmul.mubr.msk.f32.gmra.mrb[8].mxu0 %vm34_vm1, %v21_v58 }
  0x24   :  { %1556 = vmatmul.mubr.msk.f32.gmra.mrb[8].mxu1 %vm34_vm1, %v1333_v59  ;;  %1515 = vmatprep.mubr.msk.f32.mxu0 %vm1719_vm0, %v1720_v8 }
  0x25   :  { %1558 = vmatprep.mubr.msk.f32.mxu1 %vm1719_vm0, %v1720_v8 }
  0x27   :  { %1516 = vmatmul.mubr.msk.f32.gmra.mrb[10].mxu0 %vm34_vm1, %v22_v60 }
  0x28   :  { %1559 = vmatmul.mubr.msk.f32.gmra.mrb[10].mxu1 %vm34_vm1, %v1334_v61  ;;  %1518 = vmatprep.mubr.msk.f32.mxu0 %vm1719_vm0, %v1720_v8 }
  0x29   :  { %1561 = vmatprep.mubr.msk.f32.mxu1 %vm1719_vm0, %v1720_v8 }
  0x2b   :  { %1519 = vmatmul.mubr.msk.f32.gmra.mrb[12].mxu0 %vm34_vm1, %v23_v62 }
  0x2c   :  { %1562 = vmatmul.mubr.msk.f32.gmra.mrb[12].mxu1 %vm34_vm1, %v1335_v63  ;;  %1521 = vmatprep.mubr.msk.f32.mxu0 %vm1719_vm0, %v1720_v8 }
  0x2d   :  { %1564 = vmatprep.mubr.msk.f32.mxu1 %vm1719_vm0, %v1720_v8 }
  0x2f   :  { %1522 = vmatmul.mubr.msk.f32.gmra.mrb[14].mxu0 %vm34_vm1, %v24_v0 }
  0x30   :  { %1565 = vmatmul.mubr.msk.f32.gmra.mrb[14].mxu1 %vm34_vm1, %v1336_v1  ;;  %1524 = vmatprep.mubr.msk.f32.mxu0 %vm1719_vm0, %v1720_v8 }
  0x31   :  { %1567 = vmatprep.mubr.msk.f32.mxu1 %vm1719_vm0, %v1720_v8 }
  0x33   :  { %1525 = vmatmul.mubr.msk.f32.gmra.mrb[16].mxu0 %vm34_vm1, %v25_v2 }
  0x34   :  { %1568 = vmatmul.mubr.msk.f32.gmra.mrb[16].mxu1 %vm34_vm1, %v1337_v3  ;;  %1586 = vmatprep.mubr.msk.f32.mxu0 %vm1719_vm0, %v1720_v8 }
  0x35   :  { %1629 = vmatprep.mubr.msk.f32.mxu1 %vm1719_vm0, %v1720_v8 }
  0x37   :  { %1587 = vmatmul.mubr.msk.f32.vlgmr.msra.gmra.mrb[18].mxu0 %vm34_vm1, %v1358_v4 }
  0x38   :  { %1630 = vmatmul.mubr.msk.f32.vlgmr.msra.gmra.mrb[18].mxu1 %vm34_vm1, %v1387_v5  ;;  %1589 = vmatprep.mubr.msk.f32.mxu0 %vm1719_vm0, %v1720_v8 }
  0x39   :  { %1632 = vmatprep.mubr.msk.f32.mxu1 %vm1719_vm0, %v1720_v8 }
  0x3b   :  { %1590 = vmatmul.mubr.msk.f32.gmra.mrb[20].mxu0 %vm34_vm1, %v1359_v6 }
  0x3c   :  { %1633 = vmatmul.mubr.msk.f32.gmra.mrb[20].mxu1 %vm34_vm1, %v1388_v7  ;;  %1592 = vmatprep.mubr.msk.f32.mxu0 %vm1719_vm0, %v1720_v8 }
  0x3d   :  { %1635 = vmatprep.mubr.msk.f32.mxu1 %vm1719_vm0, %v1720_v8 }
  0x3f   :  { %1593 = vmatmul.mubr.msk.f32.gmra.mrb[22].mxu0 %vm34_vm1, %v1360_v9 }
  0x40   :  { %1636 = vmatmul.mubr.msk.f32.gmra.mrb[22].mxu1 %vm34_vm1, %v1389_v10  ;;  %1595 = vmatprep.mubr.msk.f32.mxu0 %vm1719_vm0, %v1720_v8 }
  0x41   :  { %1638 = vmatprep.mubr.msk.f32.mxu1 %vm1719_vm0, %v1720_v8 }
  0x43   :  { %1596 = vmatmul.mubr.msk.f32.gmra.mrb[24].mxu0 %vm34_vm1, %v1361_v11 }
  0x44   :  { %1639 = vmatmul.mubr.msk.f32.gmra.mrb[24].mxu1 %vm34_vm1, %v1390_v12  ;;  %1598 = vmatprep.mubr.msk.f32.mxu0 %vm1719_vm0, %v1720_v8 }
  0x45   :  { %1641 = vmatprep.mubr.msk.f32.mxu1 %vm1719_vm0, %v1720_v8 }
  0x47   :  { %1599 = vmatmul.mubr.msk.f32.gmra.mrb[26].mxu0 %vm34_vm1, %v1362_v13 }
  0x48   :  { %1642 = vmatmul.mubr.msk.f32.gmra.mrb[26].mxu1 %vm34_vm1, %v1391_v14  ;;  %1601 = vmatprep.mubr.msk.f32.mxu0 %vm1719_vm0, %v1720_v8 }
  0x49   :  { %1644 = vmatprep.mubr.msk.f32.mxu1 %vm1719_vm0, %v1720_v8 }
  0x4b   :  { %1602 = vmatmul.mubr.msk.f32.gmra.mrb[28].mxu0 %vm34_vm1, %v1363_v15 }
  0x4c   :  { %1645 = vmatmul.mubr.msk.f32.gmra.mrb[28].mxu1 %vm34_vm1, %v1392_v16  ;;  %1604 = vmatprep.mubr.msk.f32.mxu0 %vm1719_vm0, %v1720_v8 }
  0x4d   :  { %1647 = vmatprep.mubr.msk.f32.mxu1 %vm1719_vm0, %v1720_v8 }
  0x4f   :  { %1605 = vmatmul.mubr.msk.f32.gmra.mrb[30].mxu0 %vm34_vm1, %v1364_v17 }
  0x50   :  { %1648 = vmatmul.mubr.msk.f32.gmra.mrb[30].mxu1 %vm34_vm1, %v1393_v18  ;;  %1607 = vmatprep.mubr.msk.f32.mxu0 %vm1719_vm0, %v1720_v8 }
  0x51   :  { %1650 = vmatprep.mubr.msk.f32.mxu1 %vm1719_vm0, %v1720_v8 }
  0x53   :  { %1608 = vmatmul.mubr.msk.f32.gmra.mrb[32].mxu0 %vm34_vm1, %v1365_v19 }
  0x54   :  { %1651 = vmatmul.mubr.msk.f32.gmra.mrb[32].mxu1 %vm34_vm1, %v1394_v20  ;;  %1610 = vmatprep.mubr.msk.f32.mxu0 %vm1719_vm0, %v1720_v8 }
  0x55   :  { %1653 = vmatprep.mubr.msk.f32.mxu1 %vm1719_vm0, %v1720_v8 }
  0x57   :  { %1611 = vmatmul.mubr.msk.f32.gmra.mrb[34].mxu0 %vm34_vm1, %v1366_v21 }
  0x58   :  { %1654 = vmatmul.mubr.msk.f32.gmra.mrb[34].mxu1 %vm34_vm1, %v1395_v22 }
  0xe6   :  { %v2077_v23 = vpop.f32.mrb[0].mxu0 }
  0xe7   :  { %v1502_v24 = vpop.f32.mrb[1].mxu0  ;;  %v2079_v25 = vpop.f32.mrb[0].mxu1  ;;  %v173_v8 = vsel %vm172_vm2, %v2077_v23, 0.0 }
  0xe8   :  { %v1545_v26 = vpop.f32.mrb[1].mxu1  ;;  %v467_v27 = vsel %vm172_vm2, %v2079_v25, 0.0 }
  0xea   :  { %v2083_v28 = vpop.f32.mrb[2].mxu0 }
  0xeb   :  { %v174_v29 = vsel %vm172_vm2, %v2083_v28, 0.0  ;;  %v1505_v30 = vpop.f32.mrb[3].mxu0  ;;  %v2089_v31 = vpop.f32.mrb[2].mxu1 }
  0xec   :  { %v175_v32 = vadd.f32 %v174_v29, %v173_v8  ;;  %v468_v33 = vsel %vm172_vm2, %v2089_v31, 0.0  ;;  %v1548_v34 = vpop.f32.mrb[3].mxu1 }
  0xed   :  { %v469_v35 = vadd.f32 %v468_v33, %v467_v27 }
  0xee   :  { %v2093_v36 = vpop.f32.mrb[4].mxu0 }
  0xef   :  { %v176_v37 = vsel %vm172_vm2, %v2093_v36, 0.0  ;;  %v2097_v38 = vpop.f32.mrb[4].mxu1  ;;  %v1508_v39 = vpop.f32.mrb[5].mxu0 }
  0xf0   :  { %v177_v40 = vadd.f32 %v176_v37, %v175_v32  ;;  %v470_v41 = vsel %vm172_vm2, %v2097_v38, 0.0  ;;  %v1551_v42 = vpop.f32.mrb[5].mxu1 }
  0xf1   :  { %v471_v43 = vadd.f32 %v470_v41, %v469_v35 }
  0xf2   :  { %v2101_v44 = vpop.f32.mrb[6].mxu0 }
  0xf3   :  { %v178_v45 = vsel %vm172_vm2, %v2101_v44, 0.0  ;;  %v2105_v46 = vpop.f32.mrb[6].mxu1  ;;  %v1511_v47 = vpop.f32.mrb[7].mxu0 }
  0xf4   :  { %v179_v48 = vadd.f32 %v178_v45, %v177_v40  ;;  %v472_v49 = vsel %vm172_vm2, %v2105_v46, 0.0  ;;  %v1554_v50 = vpop.f32.mrb[7].mxu1  ;;  %v206_v47 = vlaneseq }
  0xf5   :  { %v473_v51 = vadd.f32 %v472_v49, %v471_v43 }
  0xf6   :  { %v2109_v52 = vpop.f32.mrb[8].mxu0 }
  0xf7   :  { %v180_v53 = vsel %vm172_vm2, %v2109_v52, 0.0  ;;  %v2113_v54 = vpop.f32.mrb[8].mxu1  ;;  %v1514_v55 = vpop.f32.mrb[9].mxu0 }
  0xf8   :  { %v181_v56 = vadd.f32 %v180_v53, %v179_v48  ;;  %v474_v57 = vsel %vm172_vm2, %v2113_v54, 0.0  ;;  %v1557_v58 = vpop.f32.mrb[9].mxu1 }
  0xf9   :  { %v475_v59 = vadd.f32 %v474_v57, %v473_v51 }
  0xfa   :  { %v2117_v60 = vpop.f32.mrb[10].mxu0 }
  0xfb   :  { %v182_v61 = vsel %vm172_vm2, %v2117_v60, 0.0  ;;  %v2121_v62 = vpop.f32.mrb[10].mxu1  ;;  %v1517_v63 = vpop.f32.mrb[11].mxu0 }
  0xfc   :  { %v183_v0 = vadd.f32 %v182_v61, %v181_v56  ;;  %v476_v1 = vsel %vm172_vm2, %v2121_v62, 0.0  ;;  %v1560_v2 = vpop.f32.mrb[11].mxu1 }
  0xfd   :  { %v477_v3 = vadd.f32 %v476_v1, %v475_v59  ;;  %v2167_v1 = vshrl.u32 %v206_v47, 7 }
  0xfe   :  { %v2125_v4 = vpop.f32.mrb[12].mxu0 }
  0xff   :  { %v184_v5 = vsel %vm172_vm2, %v2125_v4, 0.0  ;;  %v2129_v6 = vpop.f32.mrb[12].mxu1  ;;  %v1520_v7 = vpop.f32.mrb[13].mxu0  ;;  %vm216_vm3 = vcmp.lt.s32.totalorder %v2167_v1, 2 }
 0x100   :  { %v185_v9 = vadd.f32 %v184_v5, %v183_v0  ;;  %v478_v10 = vsel %vm172_vm2, %v2129_v6, 0.0  ;;  %v1563_v11 = vpop.f32.mrb[13].mxu1 }
 0x101   :  { %v479_v12 = vadd.f32 %v478_v10, %v477_v3 }
 0x102   :  { %v2133_v13 = vpop.f32.mrb[14].mxu0 }
 0x103   :  { %v186_v14 = vsel %vm172_vm2, %v2133_v13, 0.0  ;;  %v2137_v15 = vpop.f32.mrb[14].mxu1  ;;  %v1523_v16 = vpop.f32.mrb[15].mxu0 }
 0x104   :  { %v187_v17 = vadd.f32 %v186_v14, %v185_v9  ;;  %v480_v18 = vsel %vm172_vm2, %v2137_v15, 0.0  ;;  %v1566_v19 = vpop.f32.mrb[15].mxu1 }
 0x105   :  { %v481_v20 = vadd.f32 %v480_v18, %v479_v12 }
 0x106   :  { %v2141_v21 = vpop.f32.mrb[16].mxu0 }
 0x107   :  { %v188_v22 = vsel %vm172_vm2, %v2141_v21, 0.0  ;;  %v2145_v24 = vpop.f32.mrb[16].mxu1  ;;  %v1526_v26 = vpop.f32.mrb[17].mxu0 }
 0x108   :  { %v189_v27 = vadd.f32 %v188_v22, %v187_v17  ;;  %v482_v8 = vsel %vm172_vm2, %v2145_v24, 0.0  ;;  %v1569_v29 = vpop.f32.mrb[17].mxu1 }
 0x109   :  { %v483_v30 = vadd.f32 %v482_v8, %v481_v20 }
 0x10a   :  { %v190_v32 = vrot.slane %v189_v27, 4  ;;  %v2149_v33 = vpop.f32.mrb[18].mxu0 }
 0x10b   :  { %v484_v34 = vrot.slane %v483_v30, 4  ;;  %v1588_v35 = vpop.f32.mrb[19].mxu0  ;;  %v2151_v37 = vpop.f32.mrb[18].mxu1  ;;  %v753_v49 = vsel %vm172_vm2, %v2149_v33, 0.0 }
 0x10c   :  { %v191_v39 = vadd.f32 %v190_v32, %v189_v27  ;;  %v1631_v40 = vpop.f32.mrb[19].mxu1  ;;  %v1039_v43 = vsel %vm172_vm2, %v2151_v37, 0.0 }
 0x10d   :  { %v485_v41 = vadd.f32 %v484_v34, %v483_v30 }
 0x10e   :  { %v192_v42 = vrot.slane %v191_v39, 2  ;;  %v2155_v45 = vpop.f32.mrb[20].mxu0 }
 0x10f   :  { %v486_v48 = vrot.slane %v485_v41, 2  ;;  %v754_v50 = vsel %vm172_vm2, %v2155_v45, 0.0  ;;  %v1591_v51 = vpop.f32.mrb[21].mxu0  ;;  %v2161_v53 = vpop.f32.mrb[20].mxu1 }
 0x110   :  { %v193_v55 = vadd.f32 %v192_v42, %v191_v39  ;;  %v755_v56 = vadd.f32 %v754_v50, %v753_v49  ;;  %v1040_v57 = vsel %vm172_vm2, %v2161_v53, 0.0  ;;  %v1634_v58 = vpop.f32.mrb[21].mxu1 }
 0x111   :  { %v487_v59 = vadd.f32 %v486_v48, %v485_v41  ;;  %v1041_v61 = vadd.f32 %v1040_v57, %v1039_v43 }
 0x112   :  { %v194_v63 = vrot.slane %v193_v55, 1  ;;  %v2165_v0 = vpop.f32.mrb[22].mxu0 }
 0x113   :  { %v488_v2 = vrot.slane %v487_v59, 1  ;;  %v756_v3 = vsel %vm172_vm2, %v2165_v0, 0.0  ;;  %v2171_v5 = vpop.f32.mrb[22].mxu1  ;;  %v1594_v7 = vpop.f32.mrb[23].mxu0 }
 0x114   :  { %v195_v9 = vadd.f32 %v194_v63, %v193_v55  ;;  %v757_v10 = vadd.f32 %v756_v3, %v755_v56  ;;  %v1042_v11 = vsel %vm172_vm2, %v2171_v5, 0.0  ;;  %v1637_v12 = vpop.f32.mrb[23].mxu1 }
 0x115   :  { %v489_v14 = vadd.f32 %v488_v2, %v487_v59  ;;  %v1043_v16 = vadd.f32 %v1042_v11, %v1041_v61 }
 0x116   :  { %v2175_v17 = vmul.f32 0.5, %v195_v9  ;;  %v2177_v18 = vpop.f32.mrb[24].mxu0 }
 0x117   :  { %v2180_v19 = vmul.f32 0.125, %v489_v14  ;;  %v758_v20 = vsel %vm172_vm2, %v2177_v18, 0.0  ;;  %v2184_v22 = vpop.f32.mrb[24].mxu1  ;;  %v1597_v26 = vpop.f32.mrb[25].mxu0 }
 0x118   :  { %v2188_v27 = vsub.f32 %v2077_v23, %v2175_v17  ;;  %v205_v8 = vsub.f32 %v2141_v21, %v2175_v17  ;;  %v759_v29 = vadd.f32 %v758_v20, %v757_v10  ;;  %v1044_v30 = vsel %vm172_vm2, %v2184_v22, 0.0  ;;  %v1640_v32 = vpop.f32.mrb[25].mxu1 }
 0x119   :  { %v2196_v34 = vsub.f32 %v2079_v25, %v2180_v19  ;;  %v499_v35 = vsub.f32 %v2145_v24, %v2180_v19  ;;  %v1045_v39 = vadd.f32 %v1044_v30, %v1043_v16  ;;  %v493_v23 = vsub.f32 %v2097_v38, %v2180_v19 }
 0x11a   :  { %v225_v40 = vmul.f32 %v2188_v27, %v2188_v27  ;;  %v2204_v41 = vpop.f32.mrb[26].mxu0  ;;  %v494_v42 = vsub.f32 %v2105_v46, %v2180_v19  ;;  %v2623_v38 = vsub.f32 %v2121_v62, %v2180_v19 }
 0x11b   :  { %v509_v47 = vmul.f32 %v2196_v34, %v2196_v34  ;;  %v760_v48 = vsel %vm172_vm2, %v2204_v41, 0.0  ;;  %v2216_v49 = vpop.f32.mrb[26].mxu1  ;;  %v1600_v50 = vpop.f32.mrb[27].mxu0 }
 0x11c   :  { %v234_v56 = vsel %vm216_vm3, %v225_v40, 0.0  ;;  %v761_v57 = vadd.f32 %v760_v48, %v759_v29  ;;  %v1046_v58 = vsel %vm172_vm2, %v2216_v49, 0.0  ;;  %v1643_v59 = vpop.f32.mrb[27].mxu1 }
 0x11d   :  { %v243_v63 = vsel %vm172_vm2, %v234_v56, 0.0  ;;  %v527_v2 = vsel %vm172_vm2, %v509_v47, 0.0  ;;  %v1047_v3 = vadd.f32 %v1046_v58, %v1045_v39 }
 0x11e   :  { %v260_v9 = vrot.slane %v243_v63, 4  ;;  %v544_v10 = vrot.slane %v527_v2, 4  ;;  %v2232_v11 = vpop.f32.mrb[28].mxu0 }
 0x11f   :  { %v762_v16 = vsel %vm172_vm2, %v2232_v11, 0.0  ;;  %v2240_v20 = vpop.f32.mrb[28].mxu1  ;;  %v1603_v26 = vpop.f32.mrb[29].mxu0 }
 0x120   :  { %v261_v39 = vadd.f32 %v260_v9, %v243_v63  ;;  %v545_v40 = vadd.f32 %v544_v10, %v527_v2  ;;  %v763_v47 = vadd.f32 %v762_v16, %v761_v57  ;;  %v1048_v48 = vsel %vm172_vm2, %v2240_v20, 0.0  ;;  %v1646_v50 = vpop.f32.mrb[29].mxu1 }
 0x121   :  { %v1049_v56 = vadd.f32 %v1048_v48, %v1047_v3 }
 0x122   :  { %v262_v59 = vrot.slane %v261_v39, 2  ;;  %v546_v26 = vrot.slane %v545_v40, 2  ;;  %v2252_v29 = vpop.f32.mrb[30].mxu0 }
 0x123   :  { %v764_v30 = vsel %vm172_vm2, %v2252_v29, 0.0  ;;  %v2256_v14 = vpop.f32.mrb[30].mxu1  ;;  %v1606_v63 = vpop.f32.mrb[31].mxu0 }
 0x124   :  { %v263_v2 = vadd.f32 %v262_v59, %v261_v39  ;;  %v547_v57 = vadd.f32 %v546_v26, %v545_v40  ;;  %v765_v9 = vadd.f32 %v764_v30, %v763_v47  ;;  %v1050_v10 = vsel %vm172_vm2, %v2256_v14, 0.0  ;;  %v1649_v3 = vpop.f32.mrb[31].mxu1 }
 0x125   :  { %v1051_v16 = vadd.f32 %v1050_v10, %v1049_v56 }
 0x126   :  { %v264_v48 = vrot.slane %v263_v2, 1  ;;  %v548_v50 = vrot.slane %v547_v57, 1  ;;  %v2260_v58 = vpop.f32.mrb[32].mxu0 }
 0x127   :  { %v766_v32 = vsel %vm172_vm2, %v2260_v58, 0.0  ;;  %v2264_v12 = vpop.f32.mrb[32].mxu1  ;;  %v1609_v7 = vpop.f32.mrb[33].mxu0 }
 0x128   :  { %v265_v61 = vadd.f32 %v264_v48, %v263_v2  ;;  %v549_v63 = vadd.f32 %v548_v50, %v547_v57  ;;  %v767_v39 = vadd.f32 %v766_v32, %v765_v9  ;;  %v1052_v30 = vsel %vm172_vm2, %v2264_v12, 0.0  ;;  %v1652_v40 = vpop.f32.mrb[33].mxu1 }
 0x129   :  { %v1053_v47 = vadd.f32 %v1052_v30, %v1051_v16 }
 0x12a   :  { %v266_v59 = vmul.f32 0.5, %v265_v61  ;;  %v550_v56 = vmul.f32 0.125, %v549_v63  ;;  %v2268_v26 = vpop.f32.mrb[34].mxu0 }
 0x12b   :  { %v768_v10 = vsel %vm172_vm2, %v2268_v26, 0.0  ;;  %v1035_v3 = vpop.f32.mrb[34].mxu1  ;;  %v1612_v55 = vpop.f32.mrb[35].mxu0 }
 0x12c   :  { %v268_v51 = vadd.f32 1e-05, %v266_v59  ;;  %v553_v25 = vadd.f32 1e-05, %v550_v56  ;;  %v769_v7 = vadd.f32 %v768_v10, %v767_v39  ;;  %v1054_v2 = vsel %vm172_vm2, %v1035_v3, 0.0  ;;  %v1655_v32 = vpop.f32.mrb[35].mxu1 }
 0x12d   :  { %v1055_v57 = vadd.f32 %v1054_v2, %v1053_v47  ;;  %v267_v55 = vld [vmem:[%s2616_s2] sm:$0x1]  ;;  %v2277_v39 = vsub.s32 0, %v2167_v1 }
 0x12e   :  { %1710 = vrsqrt.f32 %v268_v51  ;;  %v770_v9 = vrot.slane %v769_v7, 4  ;;  %v1355_v51 = vld [vmem:[%s2616_s2 + $0x1] sm:$0x1] }
 0x12f   :  { %1712 = vrsqrt.f32 %v553_v25  ;;  %v1056_v16 = vrot.slane %v1055_v57, 4  ;;  %v209_v25 = vadd.s32 16, %v2167_v1 }
 0x130   :  { %v771_v61 = vadd.f32 %v770_v9, %v769_v7 }
 0x131   :  { %v1057_v48 = vadd.f32 %v1056_v16, %v1055_v57  ;;  %vm788_vm4 = vcmp.lt.s32.totalorder %v209_v25, 18 }
 0x132   :  { %v772_v50 = vrot.slane %v771_v61, 2 }
 0x133   :  { %v1058_v63 = vrot.slane %v1057_v48, 2 }
 0x134   :  { %v773_v30 = vadd.f32 %v772_v50, %v771_v61 }
 0x135   :  { %v1059_v40 = vadd.f32 %v1058_v63, %v1057_v48  ;;  %v2291_v48 = vld [vmem:[%s2617_s3] ss:$0 sm:$0xff] }
 0x136   :  { %v774_v59 = vrot.slane %v773_v30, 1 }
 0x137   :  { %v1060_v47 = vrot.slane %v1059_v40, 1 }
 0x138   :  { %v1711_v56 = vpop.eup %1710  ;;  %v775_v10 = vadd.f32 %v774_v59, %v773_v30 }
 0x139   :  { %v1713_v7 = vpop.eup %1712  ;;  %v270_v2 = vmul.f32 %v1711_v56, %v267_v55  ;;  %v1061_v32 = vadd.f32 %v1060_v47, %v1059_v40 }
 0x13a   :  { %v555_v57 = vmul.f32 %v1713_v7, %v1355_v51  ;;  %v2283_v9 = vmul.f32 0.055555556, %v775_v10 }
 0x13b   :  { %v2286_v16 = vrot.slane %v270_v2, %v2277_v39  ;;  %v1062_v61 = vmul.f32 0.013888889, %v1061_v32 }
 0x13c   :  { %v2294_v1 = vrot.slane %v555_v57, %v2277_v39  ;;  %v2298_v50 = vsub.f32 %v2149_v33, %v2283_v9  ;;  %v2302_v63 = vsub.f32 %v2155_v45, %v2283_v9  ;;  %v2306_v30 = vsub.f32 %v2165_v0, %v2283_v9 }
 0x13d   :  { %v285_v40 = vmul.f32 %v2286_v16, %v205_v8  ;;  %v2315_v59 = vsub.f32 %v2151_v37, %v1062_v61  ;;  %v2318_v33 = vsub.f32 %v2161_v53, %v1062_v61  ;;  %v2336_v53 = vsub.f32 %v2171_v5, %v1062_v61 }
 0x13e   :  { %v2324_v45 = vmul.f32 %v2294_v1, %v499_v35  ;;  %v795_v21 = vmul.f32 %v2298_v50, %v2298_v50  ;;  %v796_v0 = vmul.f32 %v2302_v63, %v2302_v63  ;;  %v797_v8 = vmul.f32 %v2306_v30, %v2306_v30 }
 0x13f   :  { %v2333_v37 = vadd.f32 %v2291_v48, %v285_v40  ;;  %v2339_v24 = vsub.f32 %v2184_v22, %v1062_v61  ;;  %v2342_v35 = vsub.f32 %v2216_v49, %v1062_v61  ;;  %v2348_v10 = vsub.f32 %v2240_v20, %v1062_v61 }
 0x140   :  { %v806_v51 = vsel %vm788_vm4, %v797_v8, 0.0  ;;  %v813_v47 = vsel %vm172_vm2, %v795_v21, 0.0  ;;  %v814_v56 = vsel %vm172_vm2, %v796_v0, 0.0  ;;  %v2352_v5 = vsub.f32 %v2256_v14, %v1062_v61 }
 0x141   :  { %2620 = vst [vmem:[#allocation2_spill] sm:$0xff] %v2333_v37  ;;  %v815_v7 = vadd.f32 %v814_v56, %v813_v47  ;;  %v816_v2 = vsel %vm172_vm2, %v806_v51, 0.0  ;;  %v2355_v22 = vsub.f32 %v2264_v12, %v1062_v61  ;;  %v2357_v49 = vsub.f32 %v1035_v3, %v1062_v61 }
 0x142   :  { %v1081_v25 = vmul.f32 %v2315_v59, %v2315_v59  ;;  %v1082_v32 = vmul.f32 %v2318_v33, %v2318_v33  ;;  %v1083_v20 = vmul.f32 %v2336_v53, %v2336_v53  ;;  %v1084_v40 = vmul.f32 %v2339_v24, %v2339_v24 }
 0x143   :  { %2621 = vst [vmem:[#allocation3_spill] sm:$0xff] %v2355_v22  ;;  %v817_v57 = vadd.f32 %v816_v2, %v815_v7  ;;  %v1085_v14 = vmul.f32 %v2342_v35, %v2342_v35  ;;  %v1086_v61 = vmul.f32 %v2348_v10, %v2348_v10  ;;  %v1087_v21 = vmul.f32 %v2352_v5, %v2352_v5  ;;  %v2383_v7 = vld [vmem:[%s2617_s3 + $0x1] ss:$0 sm:$0xff] }
 0x144   :  { %v1099_v12 = vsel %vm172_vm2, %v1081_v25, 0.0  ;;  %v1100_v0 = vsel %vm172_vm2, %v1082_v32, 0.0  ;;  %v1088_v8 = vmul.f32 %v2355_v22, %v2355_v22  ;;  %v1089_v51 = vmul.f32 %v2357_v49, %v2357_v49 }
 0x145   :  { %v830_v3 = vrot.slane %v817_v57, 4  ;;  %v1101_v47 = vadd.f32 %v1100_v0, %v1099_v12  ;;  %v1102_v56 = vsel %vm172_vm2, %v1083_v20, 0.0  ;;  %v1104_v25 = vsel %vm172_vm2, %v1084_v40, 0.0 }
 0x146   :  { %v1106_v55 = vsel %vm172_vm2, %v1085_v14, 0.0  ;;  %v564_v32 = vmul.f32 %v2294_v1, %v493_v23  ;;  %v562_v12 = vmul.f32 %v2294_v1, %v2196_v34  ;;  %v565_v20 = vmul.f32 %v2294_v1, %v494_v42 }
 0x147   :  { %v831_v2 = vadd.f32 %v830_v3, %v817_v57  ;;  %v1103_v43 = vadd.f32 %v1102_v56, %v1101_v47  ;;  %v2622_v57 = vsub.f32 %v2089_v31, %v2180_v19  ;;  %v567_v23 = vmul.f32 %v2294_v1, %v2623_v38 }
 0x148   :  { %v581_v3 = vadd.f32 %v2383_v7, %v564_v32  ;;  %v2624_v34 = vsub.f32 %v2113_v54, %v2180_v19  ;;  %v1108_v42 = vsel %vm172_vm2, %v1086_v61, 0.0  ;;  %v579_v31 = vadd.f32 %v2383_v7, %v562_v12 }
 0x149   :  { %v563_v40 = vmul.f32 %v2294_v1, %v2622_v57  ;;  %v832_v14 = vrot.slane %v831_v2, 2  ;;  %v1105_v0 = vadd.f32 %v1104_v25, %v1103_v43  ;;  %v582_v47 = vadd.f32 %v2383_v7, %v565_v20 }
 0x14a   :  { %v566_v46 = vmul.f32 %v2294_v1, %v2624_v34  ;;  %v1110_v32 = vsel %vm172_vm2, %v1087_v21, 0.0  ;;  %v590_v57 = vmax.f32 %v581_v3, 0.0  ;;  %v588_v38 = vmax.f32 %v579_v31, 0.0 }
 0x14b   :  { %v833_v56 = vadd.f32 %v832_v14, %v831_v2  ;;  %v580_v62 = vadd.f32 %v2383_v7, %v563_v40  ;;  %v1107_v37 = vadd.f32 %v1106_v55, %v1105_v0  ;;  %v584_v22 = vadd.f32 %v2383_v7, %v567_v23 }
 0x14c   :  { %v583_v54 = vadd.f32 %v2383_v7, %v566_v46  ;;  %v1112_v43 = vsel %vm172_vm2, %v1088_v8, 0.0  ;;  %v1114_v61 = vsel %vm172_vm2, %v1089_v51, 0.0  ;;  %1182 = vrot.lane.b32.xlu1 %v590_v57, %s1721_s25  ;;  %v2625_v21 = vsub.f32 %v2137_v15, %v2180_v19  ;;  %1178 = vrot.lane.b32.xlu0 %v588_v38, %s1721_s25 }
 0x14d   :  { %v834_v34 = vrot.slane %v833_v56, 1  ;;  %v1109_v25 = vadd.f32 %v1108_v42, %v1107_v37  ;;  %v591_v55 = vmax.f32 %v582_v47, 0.0  ;;  %v2626_v12 = vsub.f32 %v2129_v6, %v2180_v19 }
 0x14e   :  { %v569_v2 = vmul.f32 %v2294_v1, %v2625_v21  ;;  %v780_v8 = vsub.f32 %v2177_v18, %v2283_v9  ;;  %v589_v40 = vmax.f32 %v580_v62, 0.0  ;;  %v782_v14 = vsub.f32 %v2232_v11, %v2283_v9 }
 0x14f   :  { %v568_v20 = vmul.f32 %v2294_v1, %v2626_v12  ;;  %v835_v51 = vadd.f32 %v834_v34, %v833_v56  ;;  %v781_v15 = vsub.f32 %v2204_v41, %v2283_v9  ;;  %v1111_v37 = vadd.f32 %v1110_v32, %v1109_v25 }
 0x150   :  { %v593_v3 = vmax.f32 %v584_v22, 0.0  ;;  %v592_v23 = vmax.f32 %v583_v54, 0.0  ;;  %v784_v46 = vsub.f32 %v2260_v58, %v2283_v9  ;;  %1184 = vrot.lane.b32.xlu1 %v591_v55, %s1721_s25  ;;  %v586_v19 = vadd.f32 %v2383_v7, %v569_v2  ;;  %1180 = vrot.lane.b32.xlu0 %v589_v40, %s1721_s25 }
 0x151   :  { %v836_v6 = vmul.f32 0.055555556, %v835_v51  ;;  %v783_v18 = vsub.f32 %v2252_v29, %v2283_v9  ;;  %v2627_v11 = vsub.f32 %v2093_v36, %v2175_v17  ;;  %v1113_v41 = vadd.f32 %v1112_v43, %v1111_v37 }
 0x152   :  { %v585_v22 = vadd.f32 %v2383_v7, %v568_v20  ;;  %v277_v58 = vmul.f32 %v2286_v16, %v2188_v27  ;;  %v2628_v0 = vsub.f32 %v2101_v44, %v2175_v17  ;;  %v2629_v36 = vsub.f32 %v2083_v28, %v2175_v17 }
 0x153   :  { %v279_v1 = vmul.f32 %v2286_v16, %v2627_v11  ;;  %v839_v31 = vadd.f32 1e-05, %v836_v6  ;;  %v2630_v56 = vsub.f32 %v2117_v60, %v2175_v17  ;;  %v1115_v27 = vadd.f32 %v1114_v61, %v1113_v41 }
 0x154   :  { %v280_v42 = vmul.f32 %v2286_v16, %v2628_v0  ;;  %v278_v47 = vmul.f32 %v2286_v16, %v2629_v36  ;;  %v2465_v57 = vadd.f32 %v2291_v48, %v277_v58  ;;  %v2631_v62 = vsub.f32 %v2109_v52, %v2175_v17  ;;  %1188 = vrot.lane.b32.xlu1 %v593_v3, %s1721_s25 }
 0x155   :  { %v2454_v29 = vadd.f32 %v2291_v48, %v279_v1  ;;  %v282_v32 = vmul.f32 %v2286_v16, %v2630_v56  ;;  %1714 = vrsqrt.f32 %v839_v31  ;;  %v1116_v54 = vrot.slane %v1115_v27, 4  ;;  %1186 = vrot.lane.b32.xlu0 %v592_v23, %s1721_s25 }
 0x156   :  { %v2468_v44 = vadd.f32 %v2291_v48, %v280_v42  ;;  %v281_v38 = vmul.f32 %v2286_v16, %v2631_v62  ;;  %v2476_v28 = vadd.f32 %v2291_v48, %v278_v47  ;;  %v595_v43 = vmax.f32 %v586_v19, 0.0 }
 0x157   :  { %v2479_v60 = vadd.f32 %v2291_v48, %v282_v32  ;;  %v2632_v52 = vsub.f32 %v2133_v13, %v2175_v17  ;;  %v2633_v21 = vsub.f32 %v2125_v4, %v2175_v17  ;;  %v1117_v25 = vadd.f32 %v1116_v54, %v1115_v27  ;;  %v1384_v17 = vld [vmem:[%s2616_s2 + $0x2] sm:$0x1] }
 0x158   :  { %v2483_v34 = vadd.f32 %v2291_v48, %v281_v38  ;;  %v594_v55 = vmax.f32 %v585_v22, 0.0  ;;  %v587_v12 = vadd.f32 %v2383_v7, %v2324_v45  ;;  %1192 = vrot.lane.b32.xlu1 %v595_v43, %s1721_s25  ;;  %v2634_v6 = vsub.f32 %v2268_v26, %v2283_v9 }
 0x159   :  { %v284_v61 = vmul.f32 %v2286_v16, %v2632_v52  ;;  %v283_v2 = vmul.f32 %v2286_v16, %v2633_v21  ;;  %v1118_v13 = vrot.slane %v1117_v25, 2  ;;  %v1415_v21 = vld [vmem:[%s2617_s3 + $0x3] ss:$0 sm:$0xff] }
 0x15a   :  { %1190 = vrot.lane.b32.xlu0 %v594_v55, %s1721_s25  ;;  %v596_v4 = vmax.f32 %v587_v12, 0.0 }
 0x15b   :  { %v2497_v20 = vadd.f32 %v2291_v48, %v284_v61  ;;  %v2500_v51 = vadd.f32 %v2291_v48, %v283_v2  ;;  %v1119_v40 = vadd.f32 %v1118_v13, %v1117_v25  ;;  %v1386_v48 = vld [vmem:[%s2617_s3 + $0x2] ss:$0 sm:$0xff]  ;;  %s1723_s3 = smov 48  }
 0x15d   :  { %v1120_v16 = vrot.slane %v1119_v40, 1 }
 0x15e   :  { %1194 = vrot.lane.b32.xlu0 %v596_v4, %s1721_s25 }
 0x15f   :  { %v1715_v45 = vpop.eup %1714  ;;  %v1121_v37 = vadd.f32 %v1120_v16, %v1119_v40 }
 0x160   :  { %v841_v7 = vmul.f32 %v1715_v45, %v1384_v17 }
 0x161   :  { %v1122_v23 = vmul.f32 0.013888889, %v1121_v37 }
 0x162   :  { %v846_v3 = vrot.slane %v841_v7, %v2277_v39 }
 0x163   :  { %v1125_v11 = vadd.f32 1e-05, %v1122_v23 }
 0x164   :  { %v856_v19 = vmul.f32 %v846_v3, %v2634_v6  ;;  %v849_v1 = vmul.f32 %v846_v3, %v2302_v63  ;;  %v848_v41 = vmul.f32 %v846_v3, %v2298_v50  ;;  %v851_v22 = vmul.f32 %v846_v3, %v780_v8  ;;  %v1413_v8 = vld [vmem:[%s2616_s2 + $0x3] sm:$0x1] }
 0x165   :  { %v850_v58 = vmul.f32 %v846_v3, %v2306_v30  ;;  %v853_v0 = vmul.f32 %v846_v3, %v782_v14  ;;  %v852_v42 = vmul.f32 %v846_v3, %v781_v15  ;;  %1716 = vrsqrt.f32 %v1125_v11 }
 0x166   :  { %v866_v31 = vadd.f32 %v1386_v48, %v849_v1  ;;  %v865_v36 = vadd.f32 %v1386_v48, %v848_v41  ;;  %v855_v47 = vmul.f32 %v846_v3, %v784_v46  ;;  %v868_v56 = vadd.f32 %v1386_v48, %v851_v22 }
 0x167   :  { %v867_v62 = vadd.f32 %v1386_v48, %v850_v58  ;;  %v854_v26 = vmul.f32 %v846_v3, %v783_v18  ;;  %v870_v63 = vadd.f32 %v1386_v48, %v853_v0  ;;  %v869_v30 = vadd.f32 %v1386_v48, %v852_v42 }
 0x168   :  { %v875_v32 = vmax.f32 %v866_v31, 0.0  ;;  %v874_v27 = vmax.f32 %v865_v36, 0.0  ;;  %v877_v9 = vmax.f32 %v868_v56, 0.0  ;;  %v872_v18 = vadd.f32 %v1386_v48, %v855_v47 }
 0x169   :  { %v876_v50 = vmax.f32 %v867_v62, 0.0  ;;  %v879_v15 = vmax.f32 %v870_v63, 0.0  ;;  %v878_v46 = vmax.f32 %v869_v30, 0.0  ;;  %v871_v38 = vadd.f32 %v1386_v48, %v854_v26 }
 0x16a   :  { %1216 = vrot.lane.b32.xlu0 %v875_v32, %s1722_s30  ;;  %1214 = vrot.lane.b32.xlu1 %v874_v27, %s1722_s30  ;;  %v881_v52 = vmax.f32 %v872_v18, 0.0  ;;  %v873_v2 = vadd.f32 %v1386_v48, %v856_v19 }
 0x16b   :  { %v880_v61 = vmax.f32 %v871_v38, 0.0  ;;  %v303_v38 = vmax.f32 %v2476_v28, 0.0  ;;  %v305_v28 = vmax.f32 %v2468_v44, 0.0 }
 0x16e   :  { %1220 = vrot.lane.b32.xlu0 %v877_v9, %s1722_s30  ;;  %1218 = vrot.lane.b32.xlu1 %v876_v50, %s1722_s30 }
 0x16f   :  { %v1717_v14 = vpop.eup %1716 }
 0x170   :  { %v1127_v54 = vmul.f32 %v1717_v14, %v1413_v8 }
 0x172   :  { %1224 = vrot.lane.b32.xlu0 %v879_v15, %s1722_s30  ;;  %1222 = vrot.lane.b32.xlu1 %v878_v46, %s1722_s30  ;;  %v1132_v43 = vrot.slane %v1127_v54, %v2277_v39  ;;  %v302_v15 = vmax.f32 %v2465_v57, 0.0 }
 0x174   :  { %v1142_v25 = vmul.f32 %v1132_v43, %v2357_v49  ;;  %v1134_v55 = vmul.f32 %v1132_v43, %v2315_v59  ;;  %v1136_v12 = vmul.f32 %v1132_v43, %v2336_v53  ;;  %v1135_v13 = vmul.f32 %v1132_v43, %v2318_v33  ;;  %v2635_v33 = vld [vmem:[#allocation3_spill] sm:$0xff] }
 0x175   :  { %v1138_v39 = vmul.f32 %v1132_v43, %v2342_v35  ;;  %v1137_v40 = vmul.f32 %v1132_v43, %v2339_v24  ;;  %v1140_v4 = vmul.f32 %v1132_v43, %v2352_v5  ;;  %v1139_v16 = vmul.f32 %v1132_v43, %v2348_v10 }
 0x176   :  { %1228 = vrot.lane.b32.xlu0 %v881_v52, %s1722_s30  ;;  %1226 = vrot.lane.b32.xlu1 %v880_v61, %s1722_s30  ;;  %v1151_v17 = vadd.f32 %v1415_v21, %v1134_v55  ;;  %v882_v49 = vmax.f32 %v873_v2, 0.0  ;;  %v1152_v45 = vadd.f32 %v1415_v21, %v1135_v13  ;;  %v1153_v7 = vadd.f32 %v1415_v21, %v1136_v12 }
 0x177   :  { %v1141_v53 = vmul.f32 %v1132_v43, %v2635_v33  ;;  %v1154_v3 = vadd.f32 %v1415_v21, %v1137_v40  ;;  %v1155_v23 = vadd.f32 %v1415_v21, %v1138_v39  ;;  %v1156_v5 = vadd.f32 %v1415_v21, %v1139_v16 }
 0x178   :  { %v1160_v59 = vmax.f32 %v1151_v17, 0.0  ;;  %v1161_v37 = vmax.f32 %v1152_v45, 0.0  ;;  %v1162_v35 = vmax.f32 %v1153_v7, 0.0  ;;  %v1157_v10 = vadd.f32 %v1415_v21, %v1140_v4 }
 0x179   :  { %v1163_v24 = vmax.f32 %v1154_v3, 0.0  ;;  %v1164_v48 = vmax.f32 %v1155_v23, 0.0  ;;  %v1165_v6 = vmax.f32 %v1156_v5, 0.0  ;;  %v1158_v19 = vadd.f32 %v1415_v21, %v1141_v53 }
 0x17a   :  { %1230 = vrot.lane.b32.xlu1 %v882_v49, %s1722_s30  ;;  %1250 = vrot.lane.b32.xlu0 %v1160_v59, %s1723_s3  ;;  %v1166_v11 = vmax.f32 %v1157_v10, 0.0  ;;  %v1159_v1 = vadd.f32 %v1415_v21, %v1142_v25  ;;  %v304_v52 = vmax.f32 %v2454_v29, 0.0  ;;  %v306_v13 = vmax.f32 %v2483_v34, 0.0 }
 0x17b   :  { %v1167_v41 = vmax.f32 %v1158_v19, 0.0  ;;  %v307_v34 = vmax.f32 %v2479_v60, 0.0  ;;  %v308_v59 = vmax.f32 %v2500_v51, 0.0  ;;  %v309_v51 = vmax.f32 %v2497_v20, 0.0 }
 0x17c   :  { %v1168_v22 = vmax.f32 %v1159_v1, 0.0 }
 0x17e   :  { %1252 = vrot.lane.b32.xlu1 %v1161_v37, %s1723_s3  ;;  %1254 = vrot.lane.b32.xlu0 %v1162_v35, %s1723_s3 }
 0x182   :  { %1256 = vrot.lane.b32.xlu1 %v1163_v24, %s1723_s3  ;;  %1258 = vrot.lane.b32.xlu0 %v1164_v48, %s1723_s3  ;;  %v2636_v24 = vld [vmem:[#allocation2_spill] sm:$0xff] }
 0x183   :  { %v310_v5 = vmax.f32 %v2636_v24, 0.0 }
 0x186   :  { %1260 = vrot.lane.b32.xlu1 %v1165_v6, %s1723_s3  ;;  %1262 = vrot.lane.b32.xlu0 %v1166_v11, %s1723_s3 }
 0x18a   :  { %1264 = vrot.lane.b32.xlu1 %v1167_v41, %s1723_s3  ;;  %1266 = vrot.lane.b32.xlu0 %v1168_v22, %s1723_s3 }
 0x1be   :  { %v1179_v58 = vpop.permute.xlu0 %1178  ;;  %v1183_v0 = vpop.permute.xlu1 %1182 }
 0x1bf   :  { %v1277_v46 = vsel %vm172_vm2, %v302_v15, %v1179_v58  ;;  %v1279_v57 = vsel %vm172_vm2, %v304_v52, %v1183_v0 }
 0x1c2   :  { %v1181_v42 = vpop.permute.xlu0 %1180  ;;  %v1185_v31 = vpop.permute.xlu1 %1184 }
 0x1c3   :  { %v1278_v21 = vsel %vm172_vm2, %v303_v38, %v1181_v42  ;;  %v1280_v40 = vsel %vm172_vm2, %v305_v28, %v1185_v31 }
 0x1c6   :  { %v1189_v47 = vpop.permute.xlu1 %1188 }
 0x1c7   :  { %v1187_v36 = vpop.permute.xlu0 %1186  ;;  %v1282_v33 = vsel %vm172_vm2, %v307_v34, %v1189_v47 }
 0x1c8   :  { %v1281_v44 = vsel %vm172_vm2, %v306_v13, %v1187_v36 }
 0x1ca   :  { %v1193_v32 = vpop.permute.xlu1 %1192 }
 0x1cb   :  { %v1284_v10 = vsel %vm172_vm2, %v309_v51, %v1193_v32 }
 0x1cc   :  { %v1191_v56 = vpop.permute.xlu0 %1190 }
 0x1cd   :  { %v1283_v60 = vsel %vm172_vm2, %v308_v59, %v1191_v56 }
 0x1d0   :  { %v1195_v27 = vpop.permute.xlu0 %1194 }
 0x1d1   :  { %v1285_v20 = vsel %vm172_vm2, %v310_v5, %v1195_v27 }
 0x1dc   :  { %v1217_v62 = vpop.permute.xlu0 %1216  ;;  %v1215_v26 = vpop.permute.xlu1 %1214 }
 0x1dd   :  { %v1287_v54 = vsel %vm1286_vm5, %v1277_v46, %v1215_v26  ;;  %v1288_v2 = vsel %vm1286_vm5, %v1278_v21, %v1217_v62 }
 0x1e0   :  { %v1221_v9 = vpop.permute.xlu0 %1220  ;;  %v1219_v50 = vpop.permute.xlu1 %1218 }
 0x1e1   :  { %v1289_v55 = vsel %vm1286_vm5, %v1279_v57, %v1219_v50  ;;  %v1290_v4 = vsel %vm1286_vm5, %v1280_v40, %v1221_v9 }
 0x1e4   :  { %v1225_v63 = vpop.permute.xlu0 %1224  ;;  %v1223_v30 = vpop.permute.xlu1 %1222 }
 0x1e5   :  { %v1291_v16 = vsel %vm1286_vm5, %v1281_v44, %v1223_v30  ;;  %v1292_v53 = vsel %vm1286_vm5, %v1282_v33, %v1225_v63 }
 0x1e8   :  { %v1229_v8 = vpop.permute.xlu0 %1228  ;;  %v1227_v14 = vpop.permute.xlu1 %1226 }
 0x1e9   :  { %v1293_v3 = vsel %vm1286_vm5, %v1283_v60, %v1227_v14  ;;  %v1294_v6 = vsel %vm1286_vm5, %v1284_v10, %v1229_v8 }
 0x1ec   :  { %v1231_v18 = vpop.permute.xlu1 %1230  ;;  %v1251_v43 = vpop.permute.xlu0 %1250 }
 0x1ed   :  { %v1297_v61 = vsel %vm1296_vm6, %v1287_v54, %v1251_v43  ;;  %v1295_v11 = vsel %vm1286_vm5, %v1285_v20, %v1231_v18 }
 0x1ee   :  { %1306 = vst.msk [vmem:[%s2618_s4] sm:$0xff] %vm34_vm1, %v1297_v61 }
 0x1f0   :  { %v1253_v25 = vpop.permute.xlu1 %1252  ;;  %v1255_v12 = vpop.permute.xlu0 %1254 }
 0x1f1   :  { %v1298_v29 = vsel %vm1296_vm6, %v1288_v2, %v1253_v25  ;;  %v1299_v39 = vsel %vm1296_vm6, %v1289_v55, %v1255_v12 }
 0x1f2   :  { %1307 = vst.msk [vmem:[%s2618_s4 + $0x8] sm:$0xff] %vm34_vm1, %v1298_v29  ;;  %1308 = vst.msk [vmem:[%s2618_s4 + $0x10] sm:$0xff] %vm34_vm1, %v1299_v39 }
 0x1f4   :  { %v1257_v17 = vpop.permute.xlu1 %1256  ;;  %v1259_v49 = vpop.permute.xlu0 %1258 }
 0x1f5   :  { %v1300_v45 = vsel %vm1296_vm6, %v1290_v4, %v1257_v17  ;;  %v1301_v7 = vsel %vm1296_vm6, %v1291_v16, %v1259_v49 }
 0x1f6   :  { %1309 = vst.msk [vmem:[%s2618_s4 + $0x18] sm:$0xff] %vm34_vm1, %v1300_v45  ;;  %1310 = vst.msk [vmem:[%s2618_s4 + $0x20] sm:$0xff] %vm34_vm1, %v1301_v7 }
 0x1f8   :  { %v1261_v37 = vpop.permute.xlu1 %1260  ;;  %v1263_v35 = vpop.permute.xlu0 %1262 }
 0x1f9   :  { %v1302_v23 = vsel %vm1296_vm6, %v1292_v53, %v1261_v37  ;;  %v1303_v48 = vsel %vm1296_vm6, %v1293_v3, %v1263_v35 }
 0x1fa   :  { %1311 = vst.msk [vmem:[%s2618_s4 + $0x28] sm:$0xff] %vm34_vm1, %v1302_v23  ;;  %1312 = vst.msk [vmem:[%s2618_s4 + $0x30] sm:$0xff] %vm34_vm1, %v1303_v48 }
 0x1fc   :  { %v1265_v19 = vpop.permute.xlu1 %1264  ;;  %v1267_v1 = vpop.permute.xlu0 %1266 }
 0x1fd   :  { %v1304_v41 = vsel %vm1296_vm6, %v1294_v6, %v1265_v19  ;;  %v1305_v22 = vsel %vm1296_vm6, %v1295_v11, %v1267_v1 }
 0x1fe   :  { %1313 = vst.msk [vmem:[%s2618_s4 + $0x38] sm:$0xff] %vm34_vm1, %v1304_v41  ;;  %1314 = vst.msk [vmem:[%s2618_s4 + $0x40] sm:$0xff] %vm34_vm1, %v1305_v22 }

// kernel: psp_forward.3
= control target key start
LH: loop header
LB: loop body
LE: loop exit
PB: predicated region body
PF: predicated region fallthrough
CT: control target
= control target key end

     0   :  { %vm356_vm0 = vcmask 523264   ;;  %s4096_s0 = inlined_call_operand.vmem [shape: bf16[512,64], index: 0, kind: input, shape index: {}]   ;;  %s4097_s1 = inlined_call_operand.vmem [shape: bf16[512,64], index: 1, kind: input, shape index: {}]   ;;  %s4098_s2 = inlined_call_operand.vmem [shape: bf16[128,32], index: 2, kind: input, shape index: {}]   ;;  %s4099_s3 = inlined_call_operand.vmem [shape: f32[1,32], index: 3, kind: input, shape index: {}]   ;;  %s4100_s4 = inlined_call_operand.vmem [shape: f32[1,32], index: 4, kind: input, shape index: {}]   ;;  %s4101_s5 = inlined_call_operand.hbm [shape: f32[512,32], index: 5, kind: output, shape index: {}]  }
   0x1   :  { %v2564_v0 = vld [vmem:[%s4098_s2 + $0x20] sm:$0xff]   ;;  %v2566_v2 = vld [vmem:[%s4098_s2 + $0x28] sm:$0xff]   ;;  %v2568_v4 = vld [vmem:[%s4098_s2 + $0x30] sm:$0xff]  }
   0x2   :  { %v2565_v1 = vld [vmem:[%s4098_s2] sm:$0xff]   ;;  %2352 = vmatprep.subr.bf16.mxu1 %v2564_v0  ;;  %v2567_v3 = vld [vmem:[%s4098_s2 + $0x8] sm:$0xff]   ;;  %v2569_v5 = vld [vmem:[%s4098_s2 + $0x10] sm:$0xff]  }
   0x3   :  { %2424 = vmatprep.subr.bf16.mxu0 %v2565_v1  ;;  %2353 = vmatpush3.bf16.msra.mxu1 %v2564_v0  ;;  %v2570_v6 = vld [vmem:[%s4098_s2 + $0x38] sm:$0xff]   ;;  %v2572_v8 = vld [vmem:[%s4096_s0] sm:$0xff]   ;;  %v2574_v10 = vld [vmem:[%s4096_s0 + $0x8] sm:$0xff]  }
   0x4   :  { %2425 = vmatpush3.bf16.msra.mxu0 %v2565_v1  ;;  %2354 = vmatprep.subr.bf16.mxu1 %v2566_v2  ;;  %v2571_v7 = vld [vmem:[%s4098_s2 + $0x18] sm:$0xff]   ;;  %v2573_v9 = vld [vmem:[%s4097_s1] sm:$0xff]   ;;  %v2575_v11 = vld [vmem:[%s4097_s1 + $0x8] sm:$0xff]  }
   0x5   :  { %2426 = vmatprep.subr.bf16.mxu0 %v2567_v3  ;;  %2360 = vmatprep.mubr.msk.bf16.mxu1 %vm356_vm0, %v2572_v8  ;;  %v2576_v12 = vld [vmem:[%s4096_s0 + $0x10] sm:$0xff]   ;;  %v2578_v14 = vld [vmem:[%s4096_s0 + $0x18] sm:$0xff]   ;;  %v2580_v16 = vld [vmem:[%s4096_s0 + $0x20] sm:$0xff]  }
   0x6   :  { %2432 = vmatprep.mubr.msk.bf16.mxu0 %vm356_vm0, %v2573_v9  ;;  %v2577_v13 = vld [vmem:[%s4097_s1 + $0x10] sm:$0xff]   ;;  %v2579_v15 = vld [vmem:[%s4097_s1 + $0x18] sm:$0xff]   ;;  %v2581_v17 = vld [vmem:[%s4097_s1 + $0x20] sm:$0xff]  }
   0x7   :  { %2355 = vmatpush3.bf16.msra.mxu1 %v2566_v2  ;;  %v2582_v18 = vld [vmem:[%s4096_s0 + $0x28] sm:$0xff]   ;;  %v2584_v20 = vld [vmem:[%s4096_s0 + $0x30] sm:$0xff]   ;;  %v2586_v22 = vld [vmem:[%s4096_s0 + $0x38] sm:$0xff]  }
   0x8   :  { %2427 = vmatpush3.bf16.msra.mxu0 %v2567_v3  ;;  %2356 = vmatprep.subr.bf16.mxu1 %v2568_v4  ;;  %v2583_v19 = vld [vmem:[%s4097_s1 + $0x28] sm:$0xff]   ;;  %v2585_v21 = vld [vmem:[%s4097_s1 + $0x30] sm:$0xff]   ;;  %v2587_v23 = vld [vmem:[%s4097_s1 + $0x38] sm:$0xff]  }
   0x9   :  { %2428 = vmatprep.subr.bf16.mxu0 %v2569_v5  ;;  %v2588_v24 = vld [vmem:[%s4096_s0 + $0x40] sm:$0xff]   ;;  %v2590_v26 = vld [vmem:[%s4096_s0 + $0x48] sm:$0xff]   ;;  %v2592_v28 = vld [vmem:[%s4096_s0 + $0x50] sm:$0xff]  }
   0xa   :  { %v2589_v25 = vld [vmem:[%s4097_s1 + $0x40] sm:$0xff]   ;;  %v2591_v27 = vld [vmem:[%s4097_s1 + $0x48] sm:$0xff]   ;;  %v2593_v29 = vld [vmem:[%s4097_s1 + $0x50] sm:$0xff]  }
   0xb   :  { %2357 = vmatpush3.bf16.msra.mxu1 %v2568_v4  ;;  %v2594_v30 = vld [vmem:[%s4096_s0 + $0x58] sm:$0xff]   ;;  %v2596_v32 = vld [vmem:[%s4096_s0 + $0x60] sm:$0xff]   ;;  %v2598_v34 = vld [vmem:[%s4096_s0 + $0x68] sm:$0xff]  }
   0xc   :  { %2429 = vmatpush3.bf16.msra.mxu0 %v2569_v5  ;;  %2358 = vmatprep.subr.bf16.mxu1 %v2570_v6  ;;  %v2595_v31 = vld [vmem:[%s4097_s1 + $0x58] sm:$0xff]   ;;  %v2597_v33 = vld [vmem:[%s4097_s1 + $0x60] sm:$0xff]   ;;  %v2599_v35 = vld [vmem:[%s4097_s1 + $0x68] sm:$0xff]  }
   0xd   :  { %2430 = vmatprep.subr.bf16.mxu0 %v2571_v7  ;;  %v2600_v36 = vld [vmem:[%s4096_s0 + $0x70] sm:$0xff]   ;;  %v2602_v38 = vld [vmem:[%s4096_s0 + $0x78] sm:$0xff]   ;;  %v2604_v40 = vld [vmem:[%s4096_s0 + $0x80] sm:$0xff]  }
   0xe   :  { %v2601_v37 = vld [vmem:[%s4097_s1 + $0x70] sm:$0xff]   ;;  %v2603_v39 = vld [vmem:[%s4097_s1 + $0x78] sm:$0xff]   ;;  %v2605_v41 = vld [vmem:[%s4097_s1 + $0x80] sm:$0xff]  }
   0xf   :  { %2359 = vmatpush3.bf16.msra.mxu1 %v2570_v6 }
  0x10   :  { %2431 = vmatpush3.bf16.msra.mxu0 %v2571_v7 }
  0x12   :  { %2361 = vmatmul.mubr.msk.bf16.vlgmr.msra.gmra.mrb[0].mxu1 %vm356_vm0, %v2574_v10 }
  0x13   :  { %2433 = vmatmul.mubr.msk.bf16.vlgmr.msra.gmra.mrb[0].mxu0 %vm356_vm0, %v2575_v11  ;;  %2364 = vmatprep.mubr.msk.bf16.mxu1 %vm356_vm0, %v2576_v12 }
  0x14   :  { %2436 = vmatprep.mubr.msk.bf16.mxu0 %vm356_vm0, %v2577_v13 }
  0x1a   :  { %2365 = vmatmul.mubr.msk.bf16.gmra.mrb[4].mxu1 %vm356_vm0, %v2578_v14 }
  0x1b   :  { %2437 = vmatmul.mubr.msk.bf16.gmra.mrb[4].mxu0 %vm356_vm0, %v2579_v15  ;;  %2368 = vmatprep.mubr.msk.bf16.mxu1 %vm356_vm0, %v2580_v16 }
  0x1c   :  { %2440 = vmatprep.mubr.msk.bf16.mxu0 %vm356_vm0, %v2581_v17 }
  0x22   :  { %2369 = vmatmul.mubr.msk.bf16.gmra.mrb[8].mxu1 %vm356_vm0, %v2582_v18 }
  0x23   :  { %2441 = vmatmul.mubr.msk.bf16.gmra.mrb[8].mxu0 %vm356_vm0, %v2583_v19  ;;  %2372 = vmatprep.mubr.msk.bf16.mxu1 %vm356_vm0, %v2584_v20 }
  0x24   :  { %2444 = vmatprep.mubr.msk.bf16.mxu0 %vm356_vm0, %v2585_v21 }
  0x2a   :  { %2373 = vmatmul.mubr.msk.bf16.gmra.mrb[12].mxu1 %vm356_vm0, %v2586_v22 }
  0x2b   :  { %2445 = vmatmul.mubr.msk.bf16.gmra.mrb[12].mxu0 %vm356_vm0, %v2587_v23  ;;  %2376 = vmatprep.mubr.msk.bf16.mxu1 %vm356_vm0, %v2588_v24 }
  0x2c   :  { %2448 = vmatprep.mubr.msk.bf16.mxu0 %vm356_vm0, %v2589_v25 }
  0x32   :  { %2377 = vmatmul.mubr.msk.bf16.gmra.mrb[16].mxu1 %vm356_vm0, %v2590_v26 }
  0x33   :  { %2449 = vmatmul.mubr.msk.bf16.gmra.mrb[16].mxu0 %vm356_vm0, %v2591_v27  ;;  %2380 = vmatprep.mubr.msk.bf16.mxu1 %vm356_vm0, %v2592_v28 }
  0x34   :  { %2452 = vmatprep.mubr.msk.bf16.mxu0 %vm356_vm0, %v2593_v29 }
  0x3a   :  { %2381 = vmatmul.mubr.msk.bf16.gmra.mrb[20].mxu1 %vm356_vm0, %v2594_v30 }
  0x3b   :  { %2453 = vmatmul.mubr.msk.bf16.gmra.mrb[20].mxu0 %vm356_vm0, %v2595_v31  ;;  %2384 = vmatprep.mubr.msk.bf16.mxu1 %vm356_vm0, %v2596_v32 }
  0x3c   :  { %2456 = vmatprep.mubr.msk.bf16.mxu0 %vm356_vm0, %v2597_v33 }
  0x42   :  { %2385 = vmatmul.mubr.msk.bf16.gmra.mrb[24].mxu1 %vm356_vm0, %v2598_v34 }
  0x43   :  { %2457 = vmatmul.mubr.msk.bf16.gmra.mrb[24].mxu0 %vm356_vm0, %v2599_v35  ;;  %2388 = vmatprep.mubr.msk.bf16.mxu1 %vm356_vm0, %v2600_v36 }
  0x44   :  { %2460 = vmatprep.mubr.msk.bf16.mxu0 %vm356_vm0, %v2601_v37 }
  0x45   :  { %10 = vsyncpa [#allocation4], 0  ;;  %v2606_v42 = vld [vmem:[%s4096_s0 + $0x88] sm:$0xff]   ;;  %v2608_v44 = vld [vmem:[%s4096_s0 + $0x90] sm:$0xff]   ;;  %vm1313_vm1 = vcmask 261120   ;;  %vm26_vm2 = vcmask 253952  }
  0x46   :  { %v2607_v43 = vld [vmem:[%s4097_s1 + $0x88] sm:$0xff]   ;;  %v2609_v45 = vld [vmem:[%s4097_s1 + $0x90] sm:$0xff]   ;;  %v2610_v46 = vld [vmem:[%s4096_s0 + $0x98] sm:$0xff]   ;;  %v2662_v20 = vmov 0.0  }
  0x47   :  { %v2611_v47 = vld [vmem:[%s4097_s1 + $0x98] sm:$0xff]   ;;  %v2612_v48 = vld [vmem:[%s4096_s0 + $0xa0] sm:$0xff]   ;;  %v2614_v50 = vld [vmem:[%s4096_s0 + $0xa8] sm:$0xff]   ;;  %27 = vst.msk [vmem:[#allocation2] sm:$0x1] %vm26_vm2, %v2662_v20 }
  0x48   :  { %v2613_v49 = vld [vmem:[%s4097_s1 + $0xa0] sm:$0xff]   ;;  %v2615_v51 = vld [vmem:[%s4097_s1 + $0xa8] sm:$0xff]   ;;  %v2616_v52 = vld [vmem:[%s4096_s0 + $0xb0] sm:$0xff]  }
  0x49   :  { %v2617_v53 = vld [vmem:[%s4097_s1 + $0xb0] sm:$0xff]   ;;  %v2618_v54 = vld [vmem:[%s4096_s0 + $0xb8] sm:$0xff]   ;;  %v2620_v56 = vld [vmem:[%s4096_s0 + $0xc0] sm:$0xff]  }
  0x4a   :  { %2389 = vmatmul.mubr.msk.bf16.gmra.mrb[28].mxu1 %vm356_vm0, %v2602_v38  ;;  %v2619_v55 = vld [vmem:[%s4097_s1 + $0xb8] sm:$0xff]   ;;  %v2621_v57 = vld [vmem:[%s4097_s1 + $0xc0] sm:$0xff]   ;;  %v2622_v58 = vld [vmem:[%s4096_s0 + $0xc8] sm:$0xff]  }
  0x4b   :  { %2461 = vmatmul.mubr.msk.bf16.gmra.mrb[28].mxu0 %vm356_vm0, %v2603_v39  ;;  %2392 = vmatprep.mubr.msk.bf16.mxu1 %vm356_vm0, %v2604_v40  ;;  %v2623_v59 = vld [vmem:[%s4097_s1 + $0xc8] sm:$0xff]   ;;  %v2624_v60 = vld [vmem:[%s4096_s0 + $0xd0] sm:$0xff]   ;;  %v2626_v62 = vld [vmem:[%s4096_s0 + $0xd8] sm:$0xff]  }
  0x4c   :  { %2464 = vmatprep.mubr.msk.bf16.mxu0 %vm356_vm0, %v2605_v41  ;;  %v2625_v61 = vld [vmem:[%s4097_s1 + $0xd0] sm:$0xff]   ;;  %v2627_v63 = vld [vmem:[%s4097_s1 + $0xd8] sm:$0xff]   ;;  %v2628_v0 = vld [vmem:[%s4096_s0 + $0xe0] sm:$0xff]  }
  0x4d   :  { %v2629_v1 = vld [vmem:[%s4097_s1 + $0xe0] sm:$0xff]   ;;  %v2630_v2 = vld [vmem:[%s4096_s0 + $0xe8] sm:$0xff]   ;;  %v2632_v4 = vld [vmem:[%s4096_s0 + $0xf0] sm:$0xff]  }
  0x4e   :  { %v2631_v3 = vld [vmem:[%s4097_s1 + $0xe8] sm:$0xff]   ;;  %v2633_v5 = vld [vmem:[%s4097_s1 + $0xf0] sm:$0xff]   ;;  %v2634_v6 = vld [vmem:[%s4096_s0 + $0xf8] sm:$0xff]  }
  0x4f   :  { %v2635_v7 = vld [vmem:[%s4097_s1 + $0xf8] sm:$0xff]  }
  0x52   :  { %2393 = vmatmul.mubr.msk.bf16.gmra.mrb[32].mxu1 %vm356_vm0, %v2606_v42 }
  0x53   :  { %2465 = vmatmul.mubr.msk.bf16.gmra.mrb[32].mxu0 %vm356_vm0, %v2607_v43  ;;  %2396 = vmatprep.mubr.msk.bf16.mxu1 %vm356_vm0, %v2608_v44 }
  0x54   :  { %2468 = vmatprep.mubr.msk.bf16.mxu0 %vm356_vm0, %v2609_v45 }
  0x5a   :  { %2397 = vmatmul.mubr.msk.bf16.gmra.mrb[36].mxu1 %vm356_vm0, %v2610_v46 }
  0x5b   :  { %2469 = vmatmul.mubr.msk.bf16.gmra.mrb[36].mxu0 %vm356_vm0, %v2611_v47  ;;  %2400 = vmatprep.mubr.msk.bf16.mxu1 %vm356_vm0, %v2612_v48 }
  0x5c   :  { %2472 = vmatprep.mubr.msk.bf16.mxu0 %vm356_vm0, %v2613_v49 }
  0x62   :  { %2401 = vmatmul.mubr.msk.bf16.gmra.mrb[40].mxu1 %vm356_vm0, %v2614_v50 }
  0x63   :  { %2473 = vmatmul.mubr.msk.bf16.gmra.mrb[40].mxu0 %vm356_vm0, %v2615_v51  ;;  %2404 = vmatprep.mubr.msk.bf16.mxu1 %vm356_vm0, %v2616_v52 }
  0x64   :  { %2476 = vmatprep.mubr.msk.bf16.mxu0 %vm356_vm0, %v2617_v53 }
  0x6a   :  { %2405 = vmatmul.mubr.msk.bf16.gmra.mrb[44].mxu1 %vm356_vm0, %v2618_v54 }
  0x6b   :  { %2477 = vmatmul.mubr.msk.bf16.gmra.mrb[44].mxu0 %vm356_vm0, %v2619_v55  ;;  %2408 = vmatprep.mubr.msk.bf16.mxu1 %vm356_vm0, %v2620_v56 }
  0x6c   :  { %2480 = vmatprep.mubr.msk.bf16.mxu0 %vm356_vm0, %v2621_v57 }
  0x72   :  { %2409 = vmatmul.mubr.msk.bf16.gmra.mrb[48].mxu1 %vm356_vm0, %v2622_v58 }
  0x73   :  { %2481 = vmatmul.mubr.msk.bf16.gmra.mrb[48].mxu0 %vm356_vm0, %v2623_v59  ;;  %2412 = vmatprep.mubr.msk.bf16.mxu1 %vm356_vm0, %v2624_v60 }
  0x74   :  { %2484 = vmatprep.mubr.msk.bf16.mxu0 %vm356_vm0, %v2625_v61 }
  0x7a   :  { %2413 = vmatmul.mubr.msk.bf16.gmra.mrb[52].mxu1 %vm356_vm0, %v2626_v62 }
  0x7b   :  { %2485 = vmatmul.mubr.msk.bf16.gmra.mrb[52].mxu0 %vm356_vm0, %v2627_v63  ;;  %2416 = vmatprep.mubr.msk.bf16.mxu1 %vm356_vm0, %v2628_v0 }
  0x7c   :  { %2488 = vmatprep.mubr.msk.bf16.mxu0 %vm356_vm0, %v2629_v1 }
  0x82   :  { %2417 = vmatmul.mubr.msk.bf16.gmra.mrb[56].mxu1 %vm356_vm0, %v2630_v2 }
  0x83   :  { %2489 = vmatmul.mubr.msk.bf16.gmra.mrb[56].mxu0 %vm356_vm0, %v2631_v3  ;;  %2420 = vmatprep.mubr.msk.bf16.mxu1 %vm356_vm0, %v2632_v4 }
  0x84   :  { %2492 = vmatprep.mubr.msk.bf16.mxu0 %vm356_vm0, %v2633_v5 }
  0x8a   :  { %2421 = vmatmul.mubr.msk.bf16.gmra.mrb[60].mxu1 %vm356_vm0, %v2634_v6 }
  0x8b   :  { %2493 = vmatmul.mubr.msk.bf16.gmra.mrb[60].mxu0 %vm356_vm0, %v2635_v7 }
  0xe5   :  { %v2362_v8 = vpop.f32.mrb[0].mxu1 }
  0xe6   :  { %v2434_v9 = vpop.f32.mrb[0].mxu0  ;;  %v487_v10 = vpop.f32.mrb[1].mxu1 }
  0xe7   :  { %v1065_v11 = vadd.f32 %v2434_v9, %v2362_v8  ;;  %v1056_v12 = vpop.f32.mrb[1].mxu0  ;;  %v2363_v13 = vpop.f32.mrb[2].mxu1 }
  0xe8   :  { %v1057_v14 = vadd.f32 %v1056_v12, %v487_v10  ;;  %v2435_v15 = vpop.f32.mrb[2].mxu0  ;;  %v490_v16 = vpop.f32.mrb[3].mxu1 }
  0xe9   :  { %1316 = vst.msk [vmem:[#allocation3 + $0x10] sm:$0xff] %vm1313_vm1, %v1065_v11  ;;  %v1068_v17 = vadd.f32 %v2435_v15, %v2363_v13  ;;  %v1059_v18 = vpop.f32.mrb[3].mxu0  ;;  %v1382_v25 = vsel %vm1313_vm1, %v1065_v11, 0.0 }
  0xea   :  { %1314 = vst.msk [vmem:[#allocation3] sm:$0xff] %vm1313_vm1, %v1057_v14  ;;  %v1060_v19 = vadd.f32 %v1059_v18, %v490_v16  ;;  %v1379_v21 = vsel %vm1313_vm1, %v1057_v14, 0.0 }
  0xeb   :  { %1317 = vst.msk [vmem:[#allocation3 + $0x18] sm:$0xff] %vm1313_vm1, %v1068_v17  ;;  %v1384_v32 = vsel %vm1313_vm1, %v1068_v17, 0.0 }
  0xec   :  { %1315 = vst.msk [vmem:[#allocation3 + $0x8] sm:$0xff] %vm1313_vm1, %v1060_v19  ;;  %v1380_v22 = vsel %vm1313_vm1, %v1060_v19, 0.0 }
  0xed   :  { %v1381_v23 = vadd.f32 %v1380_v22, %v1379_v21  ;;  %v2366_v24 = vpop.f32.mrb[4].mxu1 }
  0xee   :  { %v2438_v26 = vpop.f32.mrb[4].mxu0  ;;  %v503_v27 = vpop.f32.mrb[5].mxu1 }
  0xef   :  { %v1383_v28 = vadd.f32 %v1382_v25, %v1381_v23  ;;  %v1081_v29 = vadd.f32 %v2438_v26, %v2366_v24  ;;  %v1072_v30 = vpop.f32.mrb[5].mxu0  ;;  %v2367_v31 = vpop.f32.mrb[6].mxu1 }
  0xf0   :  { %v1073_v33 = vadd.f32 %v1072_v30, %v503_v27  ;;  %v2439_v34 = vpop.f32.mrb[6].mxu0  ;;  %v506_v35 = vpop.f32.mrb[7].mxu1 }
  0xf1   :  { %1320 = vst.msk [vmem:[#allocation3 + $0x30] sm:$0xff] %vm1313_vm1, %v1081_v29  ;;  %v1385_v36 = vadd.f32 %v1384_v32, %v1383_v28  ;;  %v1084_v37 = vadd.f32 %v2439_v34, %v2367_v31  ;;  %v1075_v38 = vpop.f32.mrb[7].mxu0  ;;  %v1390_v45 = vsel %vm1313_vm1, %v1081_v29, 0.0 }
  0xf2   :  { %1318 = vst.msk [vmem:[#allocation3 + $0x20] sm:$0xff] %vm1313_vm1, %v1073_v33  ;;  %v1386_v39 = vsel %vm1313_vm1, %v1073_v33, 0.0  ;;  %v1076_v40 = vadd.f32 %v1075_v38, %v506_v35 }
  0xf3   :  { %v1387_v41 = vadd.f32 %v1386_v39, %v1385_v36  ;;  %1321 = vst.msk [vmem:[#allocation3 + $0x38] sm:$0xff] %vm1313_vm1, %v1084_v37  ;;  %v1392_v52 = vsel %vm1313_vm1, %v1084_v37, 0.0 }
  0xf4   :  { %1319 = vst.msk [vmem:[#allocation3 + $0x28] sm:$0xff] %vm1313_vm1, %v1076_v40  ;;  %v1388_v42 = vsel %vm1313_vm1, %v1076_v40, 0.0 }
  0xf5   :  { %v1389_v43 = vadd.f32 %v1388_v42, %v1387_v41  ;;  %v2370_v44 = vpop.f32.mrb[8].mxu1 }
  0xf6   :  { %v2442_v46 = vpop.f32.mrb[8].mxu0  ;;  %v519_v47 = vpop.f32.mrb[9].mxu1 }
  0xf7   :  { %v1391_v48 = vadd.f32 %v1390_v45, %v1389_v43  ;;  %v1097_v49 = vadd.f32 %v2442_v46, %v2370_v44  ;;  %v1088_v50 = vpop.f32.mrb[9].mxu0  ;;  %v2371_v51 = vpop.f32.mrb[10].mxu1 }
  0xf8   :  { %v1089_v53 = vadd.f32 %v1088_v50, %v519_v47  ;;  %v2443_v54 = vpop.f32.mrb[10].mxu0  ;;  %v522_v55 = vpop.f32.mrb[11].mxu1 }
  0xf9   :  { %1324 = vst.msk [vmem:[#allocation3 + $0x50] sm:$0xff] %vm1313_vm1, %v1097_v49  ;;  %v1393_v56 = vadd.f32 %v1392_v52, %v1391_v48  ;;  %v1100_v57 = vadd.f32 %v2443_v54, %v2371_v51  ;;  %v1091_v58 = vpop.f32.mrb[11].mxu0  ;;  %v1398_v1 = vsel %vm1313_vm1, %v1097_v49, 0.0 }
  0xfa   :  { %1322 = vst.msk [vmem:[#allocation3 + $0x40] sm:$0xff] %vm1313_vm1, %v1089_v53  ;;  %v1394_v59 = vsel %vm1313_vm1, %v1089_v53, 0.0  ;;  %v1092_v60 = vadd.f32 %v1091_v58, %v522_v55 }
  0xfb   :  { %v1395_v61 = vadd.f32 %v1394_v59, %v1393_v56  ;;  %1325 = vst.msk [vmem:[#allocation3 + $0x58] sm:$0xff] %vm1313_vm1, %v1100_v57  ;;  %v1400_v8 = vsel %vm1313_vm1, %v1100_v57, 0.0 }
  0xfc   :  { %1323 = vst.msk [vmem:[#allocation3 + $0x48] sm:$0xff] %vm1313_vm1, %v1092_v60  ;;  %v1396_v62 = vsel %vm1313_vm1, %v1092_v60, 0.0 }
  0xfd   :  { %v1397_v63 = vadd.f32 %v1396_v62, %v1395_v61  ;;  %v2374_v0 = vpop.f32.mrb[12].mxu1 }
  0xfe   :  { %v2446_v2 = vpop.f32.mrb[12].mxu0  ;;  %v535_v3 = vpop.f32.mrb[13].mxu1 }
  0xff   :  { %v1399_v4 = vadd.f32 %v1398_v1, %v1397_v63  ;;  %v1113_v5 = vadd.f32 %v2446_v2, %v2374_v0  ;;  %v1104_v6 = vpop.f32.mrb[13].mxu0  ;;  %v2375_v7 = vpop.f32.mrb[14].mxu1 }
 0x100   :  { %v1105_v9 = vadd.f32 %v1104_v6, %v535_v3  ;;  %v2447_v10 = vpop.f32.mrb[14].mxu0  ;;  %v538_v11 = vpop.f32.mrb[15].mxu1 }
 0x101   :  { %1328 = vst.msk [vmem:[#allocation3 + $0x70] sm:$0xff] %vm1313_vm1, %v1113_v5  ;;  %v1401_v12 = vadd.f32 %v1400_v8, %v1399_v4  ;;  %v1116_v13 = vadd.f32 %v2447_v10, %v2375_v7  ;;  %v1107_v14 = vpop.f32.mrb[15].mxu0  ;;  %v1406_v21 = vsel %vm1313_vm1, %v1113_v5, 0.0 }
 0x102   :  { %1326 = vst.msk [vmem:[#allocation3 + $0x60] sm:$0xff] %vm1313_vm1, %v1105_v9  ;;  %v1402_v15 = vsel %vm1313_vm1, %v1105_v9, 0.0  ;;  %v1108_v16 = vadd.f32 %v1107_v14, %v538_v11 }
 0x103   :  { %v1403_v17 = vadd.f32 %v1402_v15, %v1401_v12  ;;  %1329 = vst.msk [vmem:[#allocation3 + $0x78] sm:$0xff] %vm1313_vm1, %v1116_v13  ;;  %v1408_v28 = vsel %vm1313_vm1, %v1116_v13, 0.0 }
 0x104   :  { %1327 = vst.msk [vmem:[#allocation3 + $0x68] sm:$0xff] %vm1313_vm1, %v1108_v16  ;;  %v1404_v18 = vsel %vm1313_vm1, %v1108_v16, 0.0 }
 0x105   :  { %v1405_v19 = vadd.f32 %v1404_v18, %v1403_v17  ;;  %v2378_v20 = vpop.f32.mrb[16].mxu1 }
 0x106   :  { %v2450_v22 = vpop.f32.mrb[16].mxu0  ;;  %v551_v23 = vpop.f32.mrb[17].mxu1 }
 0x107   :  { %v1407_v24 = vadd.f32 %v1406_v21, %v1405_v19  ;;  %v1129_v25 = vadd.f32 %v2450_v22, %v2378_v20  ;;  %v1120_v26 = vpop.f32.mrb[17].mxu0  ;;  %v2379_v27 = vpop.f32.mrb[18].mxu1 }
 0x108   :  { %v1121_v29 = vadd.f32 %v1120_v26, %v551_v23  ;;  %v2451_v30 = vpop.f32.mrb[18].mxu0  ;;  %v554_v31 = vpop.f32.mrb[19].mxu1 }
 0x109   :  { %1332 = vst.msk [vmem:[#allocation3 + $0x90] sm:$0xff] %vm1313_vm1, %v1129_v25  ;;  %v1409_v32 = vadd.f32 %v1408_v28, %v1407_v24  ;;  %v1132_v33 = vadd.f32 %v2451_v30, %v2379_v27  ;;  %v1123_v34 = vpop.f32.mrb[19].mxu0  ;;  %v1414_v41 = vsel %vm1313_vm1, %v1129_v25, 0.0 }
 0x10a   :  { %1330 = vst.msk [vmem:[#allocation3 + $0x80] sm:$0xff] %vm1313_vm1, %v1121_v29  ;;  %v1410_v35 = vsel %vm1313_vm1, %v1121_v29, 0.0  ;;  %v1124_v36 = vadd.f32 %v1123_v34, %v554_v31 }
 0x10b   :  { %v1411_v37 = vadd.f32 %v1410_v35, %v1409_v32  ;;  %1333 = vst.msk [vmem:[#allocation3 + $0x98] sm:$0xff] %vm1313_vm1, %v1132_v33  ;;  %v1416_v48 = vsel %vm1313_vm1, %v1132_v33, 0.0 }
 0x10c   :  { %1331 = vst.msk [vmem:[#allocation3 + $0x88] sm:$0xff] %vm1313_vm1, %v1124_v36  ;;  %v1412_v38 = vsel %vm1313_vm1, %v1124_v36, 0.0 }
 0x10d   :  { %v1413_v39 = vadd.f32 %v1412_v38, %v1411_v37  ;;  %v2382_v40 = vpop.f32.mrb[20].mxu1 }
 0x10e   :  { %v2454_v42 = vpop.f32.mrb[20].mxu0  ;;  %v567_v43 = vpop.f32.mrb[21].mxu1 }
 0x10f   :  { %v1415_v44 = vadd.f32 %v1414_v41, %v1413_v39  ;;  %v1145_v45 = vadd.f32 %v2454_v42, %v2382_v40  ;;  %v1136_v46 = vpop.f32.mrb[21].mxu0  ;;  %v2383_v47 = vpop.f32.mrb[22].mxu1 }
 0x110   :  { %v1137_v49 = vadd.f32 %v1136_v46, %v567_v43  ;;  %v2455_v50 = vpop.f32.mrb[22].mxu0  ;;  %v570_v51 = vpop.f32.mrb[23].mxu1 }
 0x111   :  { %1336 = vst.msk [vmem:[#allocation3 + $0xb0] sm:$0xff] %vm1313_vm1, %v1145_v45  ;;  %v1417_v52 = vadd.f32 %v1416_v48, %v1415_v44  ;;  %v1148_v53 = vadd.f32 %v2455_v50, %v2383_v47  ;;  %v1139_v54 = vpop.f32.mrb[23].mxu0  ;;  %v1422_v61 = vsel %vm1313_vm1, %v1145_v45, 0.0 }
 0x112   :  { %1334 = vst.msk [vmem:[#allocation3 + $0xa0] sm:$0xff] %vm1313_vm1, %v1137_v49  ;;  %v1418_v55 = vsel %vm1313_vm1, %v1137_v49, 0.0  ;;  %v1140_v56 = vadd.f32 %v1139_v54, %v570_v51 }
 0x113   :  { %v1419_v57 = vadd.f32 %v1418_v55, %v1417_v52  ;;  %1337 = vst.msk [vmem:[#allocation3 + $0xb8] sm:$0xff] %vm1313_vm1, %v1148_v53  ;;  %v1424_v4 = vsel %vm1313_vm1, %v1148_v53, 0.0 }
 0x114   :  { %1335 = vst.msk [vmem:[#allocation3 + $0xa8] sm:$0xff] %vm1313_vm1, %v1140_v56  ;;  %v1420_v58 = vsel %vm1313_vm1, %v1140_v56, 0.0 }
 0x115   :  { %v1421_v59 = vadd.f32 %v1420_v58, %v1419_v57  ;;  %v2386_v60 = vpop.f32.mrb[24].mxu1 }
 0x116   :  { %v2458_v62 = vpop.f32.mrb[24].mxu0  ;;  %v583_v63 = vpop.f32.mrb[25].mxu1 }
 0x117   :  { %v1423_v0 = vadd.f32 %v1422_v61, %v1421_v59  ;;  %v1161_v1 = vadd.f32 %v2458_v62, %v2386_v60  ;;  %v1152_v2 = vpop.f32.mrb[25].mxu0  ;;  %v2387_v3 = vpop.f32.mrb[26].mxu1 }
 0x118   :  { %v1153_v5 = vadd.f32 %v1152_v2, %v583_v63  ;;  %v2459_v6 = vpop.f32.mrb[26].mxu0  ;;  %v586_v7 = vpop.f32.mrb[27].mxu1 }
 0x119   :  { %1340 = vst.msk [vmem:[#allocation3 + $0xd0] sm:$0xff] %vm1313_vm1, %v1161_v1  ;;  %v1425_v8 = vadd.f32 %v1424_v4, %v1423_v0  ;;  %v1164_v9 = vadd.f32 %v2459_v6, %v2387_v3  ;;  %v1155_v10 = vpop.f32.mrb[27].mxu0  ;;  %v1430_v17 = vsel %vm1313_vm1, %v1161_v1, 0.0 }
 0x11a   :  { %1338 = vst.msk [vmem:[#allocation3 + $0xc0] sm:$0xff] %vm1313_vm1, %v1153_v5  ;;  %v1426_v11 = vsel %vm1313_vm1, %v1153_v5, 0.0  ;;  %v1156_v12 = vadd.f32 %v1155_v10, %v586_v7 }
 0x11b   :  { %v1427_v13 = vadd.f32 %v1426_v11, %v1425_v8  ;;  %1341 = vst.msk [vmem:[#allocation3 + $0xd8] sm:$0xff] %vm1313_vm1, %v1164_v9  ;;  %v1432_v24 = vsel %vm1313_vm1, %v1164_v9, 0.0 }
 0x11c   :  { %1339 = vst.msk [vmem:[#allocation3 + $0xc8] sm:$0xff] %vm1313_vm1, %v1156_v12  ;;  %v1428_v14 = vsel %vm1313_vm1, %v1156_v12, 0.0 }
 0x11d   :  { %v1429_v15 = vadd.f32 %v1428_v14, %v1427_v13  ;;  %v2390_v16 = vpop.f32.mrb[28].mxu1 }
 0x11e   :  { %v2462_v18 = vpop.f32.mrb[28].mxu0  ;;  %v599_v19 = vpop.f32.mrb[29].mxu1 }
 0x11f   :  { %v1431_v20 = vadd.f32 %v1430_v17, %v1429_v15  ;;  %v1177_v21 = vadd.f32 %v2462_v18, %v2390_v16  ;;  %v1168_v22 = vpop.f32.mrb[29].mxu0  ;;  %v2391_v23 = vpop.f32.mrb[30].mxu1 }
 0x120   :  { %v1169_v25 = vadd.f32 %v1168_v22, %v599_v19  ;;  %v2463_v26 = vpop.f32.mrb[30].mxu0  ;;  %v602_v27 = vpop.f32.mrb[31].mxu1 }
 0x121   :  { %1344 = vst.msk [vmem:[#allocation3 + $0xf0] sm:$0xff] %vm1313_vm1, %v1177_v21  ;;  %v1433_v28 = vadd.f32 %v1432_v24, %v1431_v20  ;;  %v1180_v29 = vadd.f32 %v2463_v26, %v2391_v23  ;;  %v1171_v30 = vpop.f32.mrb[31].mxu0  ;;  %v1438_v37 = vsel %vm1313_vm1, %v1177_v21, 0.0 }
 0x122   :  { %1342 = vst.msk [vmem:[#allocation3 + $0xe0] sm:$0xff] %vm1313_vm1, %v1169_v25  ;;  %v1434_v31 = vsel %vm1313_vm1, %v1169_v25, 0.0  ;;  %v1172_v32 = vadd.f32 %v1171_v30, %v602_v27 }
 0x123   :  { %v1435_v33 = vadd.f32 %v1434_v31, %v1433_v28  ;;  %1345 = vst.msk [vmem:[#allocation3 + $0xf8] sm:$0xff] %vm1313_vm1, %v1180_v29  ;;  %v1440_v44 = vsel %vm1313_vm1, %v1180_v29, 0.0 }
 0x124   :  { %1343 = vst.msk [vmem:[#allocation3 + $0xe8] sm:$0xff] %vm1313_vm1, %v1172_v32  ;;  %v1436_v34 = vsel %vm1313_vm1, %v1172_v32, 0.0 }
 0x125   :  { %v1437_v35 = vadd.f32 %v1436_v34, %v1435_v33  ;;  %v2394_v36 = vpop.f32.mrb[32].mxu1 }
 0x126   :  { %v2466_v38 = vpop.f32.mrb[32].mxu0  ;;  %v615_v39 = vpop.f32.mrb[33].mxu1 }
 0x127   :  { %v1439_v40 = vadd.f32 %v1438_v37, %v1437_v35  ;;  %v1193_v41 = vadd.f32 %v2466_v38, %v2394_v36  ;;  %v1184_v42 = vpop.f32.mrb[33].mxu0  ;;  %v2395_v43 = vpop.f32.mrb[34].mxu1 }
 0x128   :  { %v1185_v45 = vadd.f32 %v1184_v42, %v615_v39  ;;  %v2467_v46 = vpop.f32.mrb[34].mxu0  ;;  %v618_v47 = vpop.f32.mrb[35].mxu1 }
 0x129   :  { %1348 = vst.msk [vmem:[#allocation3 + $0x110] sm:$0xff] %vm1313_vm1, %v1193_v41  ;;  %v1441_v48 = vadd.f32 %v1440_v44, %v1439_v40  ;;  %v1196_v49 = vadd.f32 %v2467_v46, %v2395_v43  ;;  %v1187_v50 = vpop.f32.mrb[35].mxu0  ;;  %v1446_v57 = vsel %vm1313_vm1, %v1193_v41, 0.0 }
 0x12a   :  { %1346 = vst.msk [vmem:[#allocation3 + $0x100] sm:$0xff] %vm1313_vm1, %v1185_v45  ;;  %v1442_v51 = vsel %vm1313_vm1, %v1185_v45, 0.0  ;;  %v1188_v52 = vadd.f32 %v1187_v50, %v618_v47 }
 0x12b   :  { %v1443_v53 = vadd.f32 %v1442_v51, %v1441_v48  ;;  %1349 = vst.msk [vmem:[#allocation3 + $0x118] sm:$0xff] %vm1313_vm1, %v1196_v49  ;;  %v1448_v0 = vsel %vm1313_vm1, %v1196_v49, 0.0 }
 0x12c   :  { %1347 = vst.msk [vmem:[#allocation3 + $0x108] sm:$0xff] %vm1313_vm1, %v1188_v52  ;;  %v1444_v54 = vsel %vm1313_vm1, %v1188_v52, 0.0 }
 0x12d   :  { %v1445_v55 = vadd.f32 %v1444_v54, %v1443_v53  ;;  %v2398_v56 = vpop.f32.mrb[36].mxu1 }
 0x12e   :  { %v2470_v58 = vpop.f32.mrb[36].mxu0  ;;  %v631_v59 = vpop.f32.mrb[37].mxu1 }
 0x12f   :  { %v1447_v60 = vadd.f32 %v1446_v57, %v1445_v55  ;;  %v1209_v61 = vadd.f32 %v2470_v58, %v2398_v56  ;;  %v1200_v62 = vpop.f32.mrb[37].mxu0  ;;  %v2399_v63 = vpop.f32.mrb[38].mxu1 }
 0x130   :  { %v1201_v1 = vadd.f32 %v1200_v62, %v631_v59  ;;  %v2471_v2 = vpop.f32.mrb[38].mxu0  ;;  %v634_v3 = vpop.f32.mrb[39].mxu1 }
 0x131   :  { %1352 = vst.msk [vmem:[#allocation3 + $0x130] sm:$0xff] %vm1313_vm1, %v1209_v61  ;;  %v1449_v4 = vadd.f32 %v1448_v0, %v1447_v60  ;;  %v1212_v5 = vadd.f32 %v2471_v2, %v2399_v63  ;;  %v1203_v6 = vpop.f32.mrb[39].mxu0  ;;  %v1454_v13 = vsel %vm1313_vm1, %v1209_v61, 0.0 }
 0x132   :  { %1350 = vst.msk [vmem:[#allocation3 + $0x120] sm:$0xff] %vm1313_vm1, %v1201_v1  ;;  %v1450_v7 = vsel %vm1313_vm1, %v1201_v1, 0.0  ;;  %v1204_v8 = vadd.f32 %v1203_v6, %v634_v3 }
 0x133   :  { %v1451_v9 = vadd.f32 %v1450_v7, %v1449_v4  ;;  %1353 = vst.msk [vmem:[#allocation3 + $0x138] sm:$0xff] %vm1313_vm1, %v1212_v5  ;;  %v1456_v20 = vsel %vm1313_vm1, %v1212_v5, 0.0 }
 0x134   :  { %1351 = vst.msk [vmem:[#allocation3 + $0x128] sm:$0xff] %vm1313_vm1, %v1204_v8  ;;  %v1452_v10 = vsel %vm1313_vm1, %v1204_v8, 0.0 }
 0x135   :  { %v1453_v11 = vadd.f32 %v1452_v10, %v1451_v9  ;;  %v2402_v12 = vpop.f32.mrb[40].mxu1 }
 0x136   :  { %v2474_v14 = vpop.f32.mrb[40].mxu0  ;;  %v647_v15 = vpop.f32.mrb[41].mxu1 }
 0x137   :  { %v1455_v16 = vadd.f32 %v1454_v13, %v1453_v11  ;;  %v1225_v17 = vadd.f32 %v2474_v14, %v2402_v12  ;;  %v1216_v18 = vpop.f32.mrb[41].mxu0  ;;  %v2403_v19 = vpop.f32.mrb[42].mxu1 }
 0x138   :  { %v1217_v21 = vadd.f32 %v1216_v18, %v647_v15  ;;  %v2475_v22 = vpop.f32.mrb[42].mxu0  ;;  %v650_v23 = vpop.f32.mrb[43].mxu1 }
 0x139   :  { %1356 = vst.msk [vmem:[#allocation3 + $0x150] sm:$0xff] %vm1313_vm1, %v1225_v17  ;;  %v1457_v24 = vadd.f32 %v1456_v20, %v1455_v16  ;;  %v1228_v25 = vadd.f32 %v2475_v22, %v2403_v19  ;;  %v1219_v26 = vpop.f32.mrb[43].mxu0  ;;  %v1462_v33 = vsel %vm1313_vm1, %v1225_v17, 0.0 }
 0x13a   :  { %1354 = vst.msk [vmem:[#allocation3 + $0x140] sm:$0xff] %vm1313_vm1, %v1217_v21  ;;  %v1458_v27 = vsel %vm1313_vm1, %v1217_v21, 0.0  ;;  %v1220_v28 = vadd.f32 %v1219_v26, %v650_v23 }
 0x13b   :  { %v1459_v29 = vadd.f32 %v1458_v27, %v1457_v24  ;;  %1357 = vst.msk [vmem:[#allocation3 + $0x158] sm:$0xff] %vm1313_vm1, %v1228_v25  ;;  %v1464_v40 = vsel %vm1313_vm1, %v1228_v25, 0.0 }
 0x13c   :  { %1355 = vst.msk [vmem:[#allocation3 + $0x148] sm:$0xff] %vm1313_vm1, %v1220_v28  ;;  %v1460_v30 = vsel %vm1313_vm1, %v1220_v28, 0.0 }
 0x13d   :  { %v1461_v31 = vadd.f32 %v1460_v30, %v1459_v29  ;;  %v2406_v32 = vpop.f32.mrb[44].mxu1 }
 0x13e   :  { %v2478_v34 = vpop.f32.mrb[44].mxu0  ;;  %v663_v35 = vpop.f32.mrb[45].mxu1 }
 0x13f   :  { %v1463_v36 = vadd.f32 %v1462_v33, %v1461_v31  ;;  %v1241_v37 = vadd.f32 %v2478_v34, %v2406_v32  ;;  %v1232_v38 = vpop.f32.mrb[45].mxu0  ;;  %v2407_v39 = vpop.f32.mrb[46].mxu1 }
 0x140   :  { %v1233_v41 = vadd.f32 %v1232_v38, %v663_v35  ;;  %v2479_v42 = vpop.f32.mrb[46].mxu0  ;;  %v666_v43 = vpop.f32.mrb[47].mxu1 }
 0x141   :  { %1360 = vst.msk [vmem:[#allocation3 + $0x170] sm:$0xff] %vm1313_vm1, %v1241_v37  ;;  %v1465_v44 = vadd.f32 %v1464_v40, %v1463_v36  ;;  %v1244_v45 = vadd.f32 %v2479_v42, %v2407_v39  ;;  %v1235_v46 = vpop.f32.mrb[47].mxu0  ;;  %v1470_v53 = vsel %vm1313_vm1, %v1241_v37, 0.0 }
 0x142   :  { %1358 = vst.msk [vmem:[#allocation3 + $0x160] sm:$0xff] %vm1313_vm1, %v1233_v41  ;;  %v1466_v47 = vsel %vm1313_vm1, %v1233_v41, 0.0  ;;  %v1236_v48 = vadd.f32 %v1235_v46, %v666_v43 }
 0x143   :  { %v1467_v49 = vadd.f32 %v1466_v47, %v1465_v44  ;;  %1361 = vst.msk [vmem:[#allocation3 + $0x178] sm:$0xff] %vm1313_vm1, %v1244_v45  ;;  %v1472_v60 = vsel %vm1313_vm1, %v1244_v45, 0.0 }
 0x144   :  { %1359 = vst.msk [vmem:[#allocation3 + $0x168] sm:$0xff] %vm1313_vm1, %v1236_v48  ;;  %v1468_v50 = vsel %vm1313_vm1, %v1236_v48, 0.0 }
 0x145   :  { %v1469_v51 = vadd.f32 %v1468_v50, %v1467_v49  ;;  %v2410_v52 = vpop.f32.mrb[48].mxu1 }
 0x146   :  { %v2482_v54 = vpop.f32.mrb[48].mxu0  ;;  %v679_v55 = vpop.f32.mrb[49].mxu1 }
 0x147   :  { %v1471_v56 = vadd.f32 %v1470_v53, %v1469_v51  ;;  %v1257_v57 = vadd.f32 %v2482_v54, %v2410_v52  ;;  %v1248_v58 = vpop.f32.mrb[49].mxu0  ;;  %v2411_v59 = vpop.f32.mrb[50].mxu1 }
 0x148   :  { %v1249_v61 = vadd.f32 %v1248_v58, %v679_v55  ;;  %v2483_v62 = vpop.f32.mrb[50].mxu0  ;;  %v682_v63 = vpop.f32.mrb[51].mxu1 }
 0x149   :  { %1364 = vst.msk [vmem:[#allocation3 + $0x190] sm:$0xff] %vm1313_vm1, %v1257_v57  ;;  %v1473_v0 = vadd.f32 %v1472_v60, %v1471_v56  ;;  %v1260_v1 = vadd.f32 %v2483_v62, %v2411_v59  ;;  %v1251_v2 = vpop.f32.mrb[51].mxu0  ;;  %v1478_v9 = vsel %vm1313_vm1, %v1257_v57, 0.0 }
 0x14a   :  { %1362 = vst.msk [vmem:[#allocation3 + $0x180] sm:$0xff] %vm1313_vm1, %v1249_v61  ;;  %v1474_v3 = vsel %vm1313_vm1, %v1249_v61, 0.0  ;;  %v1252_v4 = vadd.f32 %v1251_v2, %v682_v63 }
 0x14b   :  { %v1475_v5 = vadd.f32 %v1474_v3, %v1473_v0  ;;  %1365 = vst.msk [vmem:[#allocation3 + $0x198] sm:$0xff] %vm1313_vm1, %v1260_v1  ;;  %v1480_v16 = vsel %vm1313_vm1, %v1260_v1, 0.0 }
 0x14c   :  { %1363 = vst.msk [vmem:[#allocation3 + $0x188] sm:$0xff] %vm1313_vm1, %v1252_v4  ;;  %v1476_v6 = vsel %vm1313_vm1, %v1252_v4, 0.0 }
 0x14d   :  { %v1477_v7 = vadd.f32 %v1476_v6, %v1475_v5  ;;  %v2414_v8 = vpop.f32.mrb[52].mxu1 }
 0x14e   :  { %v2486_v10 = vpop.f32.mrb[52].mxu0  ;;  %v695_v11 = vpop.f32.mrb[53].mxu1 }
 0x14f   :  { %v1479_v12 = vadd.f32 %v1478_v9, %v1477_v7  ;;  %v1273_v13 = vadd.f32 %v2486_v10, %v2414_v8  ;;  %v1264_v14 = vpop.f32.mrb[53].mxu0  ;;  %v2415_v15 = vpop.f32.mrb[54].mxu1 }
 0x150   :  { %v1265_v17 = vadd.f32 %v1264_v14, %v695_v11  ;;  %v2487_v18 = vpop.f32.mrb[54].mxu0  ;;  %v698_v19 = vpop.f32.mrb[55].mxu1 }
 0x151   :  { %1368 = vst.msk [vmem:[#allocation3 + $0x1b0] sm:$0xff] %vm1313_vm1, %v1273_v13  ;;  %v1481_v20 = vadd.f32 %v1480_v16, %v1479_v12  ;;  %v1276_v21 = vadd.f32 %v2487_v18, %v2415_v15  ;;  %v1267_v22 = vpop.f32.mrb[55].mxu0  ;;  %v1486_v29 = vsel %vm1313_vm1, %v1273_v13, 0.0  ;;  %v1378_v13 = vld [vmem:[#allocation2] sm:$0x1]  ;;  %v1585_v16 = vlaneseq }
 0x152   :  { %1366 = vst.msk [vmem:[#allocation3 + $0x1a0] sm:$0xff] %vm1313_vm1, %v1265_v17  ;;  %v1482_v23 = vsel %vm1313_vm1, %v1265_v17, 0.0  ;;  %v1268_v24 = vadd.f32 %v1267_v22, %v698_v19  ;;  %v3114_v22 = vld [vmem:[#allocation3] sm:$0xff] }
 0x153   :  { %v1483_v25 = vadd.f32 %v1482_v23, %v1481_v20  ;;  %1369 = vst.msk [vmem:[#allocation3 + $0x1b8] sm:$0xff] %vm1313_vm1, %v1276_v21  ;;  %v1488_v36 = vsel %vm1313_vm1, %v1276_v21, 0.0  ;;  %v1586_v17 = vshrl.u32 %v1585_v16, 7  ;;  %v3116_v23 = vld [vmem:[#allocation3 + $0x8] sm:$0xff]  ;;  %v3180_v16 = vld [vmem:[#allocation3 + $0x70] sm:$0xff] }
 0x154   :  { %1367 = vst.msk [vmem:[#allocation3 + $0x1a8] sm:$0xff] %vm1313_vm1, %v1268_v24  ;;  %v1484_v26 = vsel %vm1313_vm1, %v1268_v24, 0.0 }
 0x155   :  { %v1485_v27 = vadd.f32 %v1484_v26, %v1483_v25  ;;  %v2418_v28 = vpop.f32.mrb[56].mxu1  ;;  %v3108_v20 = vsub.s32 0, %v1586_v17  ;;  %v3122_v26 = vld [vmem:[#allocation3 + $0x10] sm:$0xff] }
 0x156   :  { %v2490_v30 = vpop.f32.mrb[56].mxu0  ;;  %v711_v31 = vpop.f32.mrb[57].mxu1 }
 0x157   :  { %v1487_v32 = vadd.f32 %v1486_v29, %v1485_v27  ;;  %v1289_v33 = vadd.f32 %v2490_v30, %v2418_v28  ;;  %v1280_v34 = vpop.f32.mrb[57].mxu0  ;;  %v2419_v35 = vpop.f32.mrb[58].mxu1  ;;  %v3126_v28 = vld [vmem:[#allocation3 + $0x18] sm:$0xff] }
 0x158   :  { %v1281_v37 = vadd.f32 %v1280_v34, %v711_v31  ;;  %v2491_v38 = vpop.f32.mrb[58].mxu0  ;;  %v714_v39 = vpop.f32.mrb[59].mxu1 }
 0x159   :  { %1372 = vst.msk [vmem:[#allocation3 + $0x1d0] sm:$0xff] %vm1313_vm1, %v1289_v33  ;;  %v1489_v40 = vadd.f32 %v1488_v36, %v1487_v32  ;;  %v1292_v41 = vadd.f32 %v2491_v38, %v2419_v35  ;;  %v1283_v42 = vpop.f32.mrb[59].mxu0  ;;  %v1494_v49 = vsel %vm1313_vm1, %v1289_v33, 0.0  ;;  %v3130_v32 = vld [vmem:[#allocation3 + $0x20] sm:$0xff]  ;;  %v3134_v35 = vld [vmem:[#allocation3 + $0x28] sm:$0xff] }
 0x15a   :  { %1370 = vst.msk [vmem:[#allocation3 + $0x1c0] sm:$0xff] %vm1313_vm1, %v1281_v37  ;;  %v1490_v43 = vsel %vm1313_vm1, %v1281_v37, 0.0  ;;  %v1284_v44 = vadd.f32 %v1283_v42, %v714_v39 }
 0x15b   :  { %v1491_v45 = vadd.f32 %v1490_v43, %v1489_v40  ;;  %1373 = vst.msk [vmem:[#allocation3 + $0x1d8] sm:$0xff] %vm1313_vm1, %v1292_v41  ;;  %v1496_v56 = vsel %vm1313_vm1, %v1292_v41, 0.0  ;;  %v3140_v40 = vld [vmem:[#allocation3 + $0x30] sm:$0xff] }
 0x15c   :  { %1371 = vst.msk [vmem:[#allocation3 + $0x1c8] sm:$0xff] %vm1313_vm1, %v1284_v44  ;;  %v1492_v46 = vsel %vm1313_vm1, %v1284_v44, 0.0 }
 0x15d   :  { %v1493_v47 = vadd.f32 %v1492_v46, %v1491_v45  ;;  %v2422_v48 = vpop.f32.mrb[60].mxu1  ;;  %v3145_v45 = vld [vmem:[#allocation3 + $0x38] sm:$0xff] }
 0x15e   :  { %v2494_v50 = vpop.f32.mrb[60].mxu0  ;;  %v727_v51 = vpop.f32.mrb[61].mxu1 }
 0x15f   :  { %v1495_v52 = vadd.f32 %v1494_v49, %v1493_v47  ;;  %v1305_v53 = vadd.f32 %v2494_v50, %v2422_v48  ;;  %v1296_v54 = vpop.f32.mrb[61].mxu0  ;;  %v2423_v55 = vpop.f32.mrb[62].mxu1  ;;  %v3150_v50 = vld [vmem:[#allocation3 + $0x40] sm:$0xff] }
 0x160   :  { %v1297_v57 = vadd.f32 %v1296_v54, %v727_v51  ;;  %v2495_v58 = vpop.f32.mrb[62].mxu0  ;;  %v730_v59 = vpop.f32.mrb[63].mxu1 }
 0x161   :  { %1376 = vst.msk [vmem:[#allocation3 + $0x1f0] sm:$0xff] %vm1313_vm1, %v1305_v53  ;;  %v1497_v60 = vadd.f32 %v1496_v56, %v1495_v52  ;;  %v1308_v61 = vadd.f32 %v2495_v58, %v2423_v55  ;;  %v1299_v62 = vpop.f32.mrb[63].mxu0  ;;  %v1502_v4 = vsel %vm1313_vm1, %v1305_v53, 0.0  ;;  %v3155_v55 = vld [vmem:[#allocation3 + $0x48] sm:$0xff] }
 0x162   :  { %1374 = vst.msk [vmem:[#allocation3 + $0x1e0] sm:$0xff] %vm1313_vm1, %v1297_v57  ;;  %v1498_v63 = vsel %vm1313_vm1, %v1297_v57, 0.0  ;;  %v1300_v0 = vadd.f32 %v1299_v62, %v730_v59 }
 0x163   :  { %v1499_v1 = vadd.f32 %v1498_v63, %v1497_v60  ;;  %1377 = vst.msk [vmem:[#allocation3 + $0x1f8] sm:$0xff] %vm1313_vm1, %v1308_v61  ;;  %v1504_v6 = vsel %vm1313_vm1, %v1308_v61, 0.0  ;;  %v3160_v60 = vld [vmem:[#allocation3 + $0x50] sm:$0xff] }
 0x164   :  { %1375 = vst.msk [vmem:[#allocation3 + $0x1e8] sm:$0xff] %vm1313_vm1, %v1300_v0  ;;  %v1500_v2 = vsel %vm1313_vm1, %v1300_v0, 0.0 }
 0x165   :  { %v1501_v3 = vadd.f32 %v1500_v2, %v1499_v1  ;;  %v3165_v1 = vld [vmem:[#allocation3 + $0x58] sm:$0xff] }
 0x167   :  { %v1503_v5 = vadd.f32 %v1502_v4, %v1501_v3 }
 0x169   :  { %v1505_v7 = vadd.f32 %v1504_v6, %v1503_v5  ;;  %v3170_v6 = vld [vmem:[#allocation3 + $0x60] sm:$0xff] }
 0x16b   :  { %v1506_v8 = vrot.slane %v1505_v7, 4 }
 0x16d   :  { %v1507_v9 = vadd.f32 %v1506_v8, %v1505_v7 }
 0x16f   :  { %v1508_v10 = vrot.slane %v1507_v9, 2 }
 0x171   :  { %v1509_v11 = vadd.f32 %v1508_v10, %v1507_v9 }
 0x173   :  { %v1510_v12 = vrot.slane %v1509_v11, 1 }
 0x175   :  { %v1511_v14 = vadd.f32 %v1510_v12, %v1509_v11  ;;  %v3175_v11 = vld [vmem:[#allocation3 + $0x68] sm:$0xff] }
 0x177   :  { %v1512_v15 = vadd.f32 %v1511_v14, %v1378_v13 }
 0x179   :  { %1514 = vst.msk [vmem:[#allocation2] sm:$0x1] %vm26_vm2, %v1512_v15 }
 0x180   :  { %v1518_v18 = vld [vmem:[#allocation2] sm:$0x1] }
 0x181   :  { %v3106_v19 = vmul.f32 0.001953125, %v1518_v18 }
 0x183   :  { %v3112_v21 = vrot.slane %v3106_v19, %v3108_v20 }
 0x185   :  { %v1590_v24 = vsub.f32 %v3114_v22, %v3112_v21  ;;  %v1591_v25 = vsub.f32 %v3116_v23, %v3112_v21  ;;  %v1592_v27 = vsub.f32 %v3122_v26, %v3112_v21  ;;  %v1593_v29 = vsub.f32 %v3126_v28, %v3112_v21 }
 0x186   :  { %v1594_v33 = vsub.f32 %v3130_v32, %v3112_v21  ;;  %v1595_v36 = vsub.f32 %v3134_v35, %v3112_v21  ;;  %v1596_v42 = vsub.f32 %v3140_v40, %v3112_v21  ;;  %v1597_v47 = vsub.f32 %v3145_v45, %v3112_v21 }
 0x187   :  { %v1654_v30 = vmul.f32 %v1590_v24, %v1590_v24  ;;  %v1655_v31 = vmul.f32 %v1591_v25, %v1591_v25  ;;  %v1656_v34 = vmul.f32 %v1592_v27, %v1592_v27  ;;  %v1657_v37 = vmul.f32 %v1593_v29, %v1593_v29  ;;  %v3185_v27 = vld [vmem:[#allocation3 + $0x78] sm:$0xff] }
 0x188   :  { %v1658_v43 = vmul.f32 %v1594_v33, %v1594_v33  ;;  %v1659_v48 = vmul.f32 %v1595_v36, %v1595_v36  ;;  %v1598_v52 = vsub.f32 %v3150_v50, %v3112_v21  ;;  %v1660_v53 = vmul.f32 %v1596_v42, %v1596_v42 }
 0x189   :  { %v1718_v38 = vsel %vm1313_vm1, %v1654_v30, 0.0  ;;  %v1719_v39 = vsel %vm1313_vm1, %v1655_v31, 0.0  ;;  %v1721_v44 = vsel %vm1313_vm1, %v1656_v34, 0.0  ;;  %v1723_v49 = vsel %vm1313_vm1, %v1657_v37, 0.0  ;;  %v3190_v34 = vld [vmem:[#allocation3 + $0x80] sm:$0xff] }
 0x18a   :  { %v1720_v41 = vadd.f32 %v1719_v39, %v1718_v38  ;;  %v1725_v54 = vsel %vm1313_vm1, %v1658_v43, 0.0  ;;  %v1599_v57 = vsub.f32 %v3155_v55, %v3112_v21  ;;  %v1661_v58 = vmul.f32 %v1597_v47, %v1597_v47  ;;  %v3200_v47 = vld [vmem:[#allocation3 + $0x90] sm:$0xff] }
 0x18b   :  { %v1727_v59 = vsel %vm1313_vm1, %v1659_v48, 0.0  ;;  %v1600_v62 = vsub.f32 %v3160_v60, %v3112_v21  ;;  %v1662_v63 = vmul.f32 %v1598_v52, %v1598_v52  ;;  %v1729_v0 = vsel %vm1313_vm1, %v1660_v53, 0.0  ;;  %v3205_v53 = vld [vmem:[#allocation3 + $0x98] sm:$0xff] }
 0x18c   :  { %v1722_v46 = vadd.f32 %v1721_v44, %v1720_v41  ;;  %v1601_v3 = vsub.f32 %v3165_v1, %v3112_v21  ;;  %v1663_v4 = vmul.f32 %v1599_v57, %v1599_v57  ;;  %v1731_v5 = vsel %vm1313_vm1, %v1661_v58, 0.0  ;;  %v3195_v41 = vld [vmem:[#allocation3 + $0x88] sm:$0xff] }
 0x18d   :  { %v1602_v8 = vsub.f32 %v3170_v6, %v3112_v21  ;;  %v1664_v9 = vmul.f32 %v1600_v62, %v1600_v62  ;;  %v1733_v10 = vsel %vm1313_vm1, %v1662_v63, 0.0  ;;  %v1603_v13 = vsub.f32 %v3175_v11, %v3112_v21 }
 0x18e   :  { %v1724_v51 = vadd.f32 %v1723_v49, %v1722_v46  ;;  %v1665_v14 = vmul.f32 %v1601_v3, %v1601_v3  ;;  %v1735_v15 = vsel %vm1313_vm1, %v1663_v4, 0.0  ;;  %v1604_v18 = vsub.f32 %v3180_v16, %v3112_v21 }
 0x18f   :  { %v1666_v24 = vmul.f32 %v1602_v8, %v1602_v8  ;;  %v1737_v25 = vsel %vm1313_vm1, %v1664_v9, 0.0  ;;  %v1605_v30 = vsub.f32 %v3185_v27, %v3112_v21  ;;  %v1667_v31 = vmul.f32 %v1603_v13, %v1603_v13  ;;  %v3220_v8 = vld [vmem:[#allocation3 + $0xb0] sm:$0xff] }
 0x190   :  { %v1726_v56 = vadd.f32 %v1725_v54, %v1724_v51  ;;  %v1739_v33 = vsel %vm1313_vm1, %v1665_v14, 0.0  ;;  %v1606_v37 = vsub.f32 %v3190_v34, %v3112_v21  ;;  %v1668_v38 = vmul.f32 %v1604_v18, %v1604_v18  ;;  %v3225_v14 = vld [vmem:[#allocation3 + $0xb8] sm:$0xff] }
 0x191   :  { %v1741_v39 = vsel %vm1313_vm1, %v1666_v24, 0.0  ;;  %v1607_v43 = vsub.f32 %v3195_v41, %v3112_v21  ;;  %v1669_v44 = vmul.f32 %v1605_v30, %v1605_v30  ;;  %v1743_v46 = vsel %vm1313_vm1, %v1667_v31, 0.0 }
 0x192   :  { %v1728_v61 = vadd.f32 %v1727_v59, %v1726_v56  ;;  %v1608_v49 = vsub.f32 %v3200_v47, %v3112_v21  ;;  %v1670_v51 = vmul.f32 %v1606_v37, %v1606_v37  ;;  %v1745_v52 = vsel %vm1313_vm1, %v1668_v38, 0.0  ;;  %v3210_v59 = vld [vmem:[#allocation3 + $0xa0] sm:$0xff] }
 0x193   :  { %v1609_v56 = vsub.f32 %v3205_v53, %v3112_v21  ;;  %v1671_v57 = vmul.f32 %v1607_v43, %v1607_v43  ;;  %v1747_v58 = vsel %vm1313_vm1, %v1669_v44, 0.0  ;;  %v1610_v62 = vsub.f32 %v3210_v59, %v3112_v21  ;;  %v3240_v43 = vld [vmem:[#allocation3 + $0xd0] sm:$0xff] }
 0x194   :  { %v1730_v2 = vadd.f32 %v1729_v0, %v1728_v61  ;;  %v1672_v63 = vmul.f32 %v1608_v49, %v1608_v49  ;;  %v1749_v0 = vsel %vm1313_vm1, %v1670_v51, 0.0  ;;  %v3245_v51 = vld [vmem:[#allocation3 + $0xd8] sm:$0xff] }
 0x196   :  { %v1732_v7 = vadd.f32 %v1731_v5, %v1730_v2  ;;  %v3215_v2 = vld [vmem:[#allocation3 + $0xa8] sm:$0xff]  ;;  %v1673_v5 = vmul.f32 %v1609_v56, %v1609_v56  ;;  %v1753_v13 = vsel %vm1313_vm1, %v1672_v63, 0.0 }
 0x197   :  { %v1611_v4 = vsub.f32 %v3215_v2, %v3112_v21 }
 0x198   :  { %v1734_v12 = vadd.f32 %v1733_v10, %v1732_v7  ;;  %v1751_v7 = vsel %vm1313_vm1, %v1671_v57, 0.0  ;;  %v1612_v10 = vsub.f32 %v3220_v8, %v3112_v21  ;;  %v1755_v24 = vsel %vm1313_vm1, %v1673_v5, 0.0 }
 0x199   :  { %v1675_v18 = vmul.f32 %v1611_v4, %v1611_v4 }
 0x19a   :  { %v1736_v17 = vadd.f32 %v1735_v15, %v1734_v12  ;;  %v1674_v12 = vmul.f32 %v1610_v62, %v1610_v62  ;;  %v1676_v31 = vmul.f32 %v1612_v10, %v1612_v10  ;;  %v3260_v10 = vld [vmem:[#allocation3 + $0xf0] sm:$0xff] }
 0x19c   :  { %v1738_v29 = vadd.f32 %v1737_v25, %v1736_v17  ;;  %v1613_v17 = vsub.f32 %v3225_v14, %v3112_v21  ;;  %v3230_v25 = vld [vmem:[#allocation3 + $0xc0] sm:$0xff]  ;;  %v1761_v49 = vsel %vm1313_vm1, %v1676_v31, 0.0 }
 0x19d   :  { %v1614_v30 = vsub.f32 %v3230_v25, %v3112_v21 }
 0x19e   :  { %v1740_v36 = vadd.f32 %v1739_v33, %v1738_v29  ;;  %v1757_v33 = vsel %vm1313_vm1, %v1674_v12, 0.0 }
 0x1a0   :  { %v1742_v42 = vadd.f32 %v1741_v39, %v1740_v36  ;;  %v3235_v36 = vld [vmem:[#allocation3 + $0xc8] sm:$0xff]  ;;  %v1677_v39 = vmul.f32 %v1613_v17, %v1613_v17 }
 0x1a1   :  { %v1615_v38 = vsub.f32 %v3235_v36, %v3112_v21 }
 0x1a2   :  { %v1744_v48 = vadd.f32 %v1743_v46, %v1742_v42  ;;  %v1759_v42 = vsel %vm1313_vm1, %v1675_v18, 0.0  ;;  %v1616_v46 = vsub.f32 %v3240_v43, %v3112_v21  ;;  %v1763_v57 = vsel %vm1313_vm1, %v1677_v39, 0.0  ;;  %v3265_v18 = vld [vmem:[#allocation3 + $0xf8] sm:$0xff] }
 0x1a3   :  { %v1679_v56 = vmul.f32 %v1615_v38, %v1615_v38 }
 0x1a4   :  { %v1746_v54 = vadd.f32 %v1745_v52, %v1744_v48  ;;  %v1678_v48 = vmul.f32 %v1614_v30, %v1614_v30  ;;  %v1680_v63 = vmul.f32 %v1616_v46, %v1616_v46 }
 0x1a6   :  { %v1748_v61 = vadd.f32 %v1747_v58, %v1746_v54  ;;  %v1617_v54 = vsub.f32 %v3245_v51, %v3112_v21  ;;  %v3250_v58 = vld [vmem:[#allocation3 + $0xe0] sm:$0xff]  ;;  %v1769_v17 = vsel %vm1313_vm1, %v1680_v63, 0.0  ;;  %v3285_v63 = vld [vmem:[#allocation3 + $0x118] sm:$0xff] }
 0x1a7   :  { %v1618_v62 = vsub.f32 %v3250_v58, %v3112_v21 }
 0x1a8   :  { %v1750_v3 = vadd.f32 %v1749_v0, %v1748_v61  ;;  %v1765_v0 = vsel %vm1313_vm1, %v1678_v48, 0.0 }
 0x1aa   :  { %v1752_v9 = vadd.f32 %v1751_v7, %v1750_v3  ;;  %v3255_v3 = vld [vmem:[#allocation3 + $0xe8] sm:$0xff]  ;;  %v1681_v7 = vmul.f32 %v1617_v54, %v1617_v54  ;;  %v3280_v54 = vld [vmem:[#allocation3 + $0x110] sm:$0xff] }
 0x1ab   :  { %v1619_v5 = vsub.f32 %v3255_v3, %v3112_v21 }
 0x1ac   :  { %v1754_v15 = vadd.f32 %v1753_v13, %v1752_v9  ;;  %v1767_v9 = vsel %vm1313_vm1, %v1679_v56, 0.0  ;;  %v1620_v13 = vsub.f32 %v3260_v10, %v3112_v21  ;;  %v1771_v31 = vsel %vm1313_vm1, %v1681_v7, 0.0 }
 0x1ad   :  { %v1683_v30 = vmul.f32 %v1619_v5, %v1619_v5 }
 0x1ae   :  { %v1756_v29 = vadd.f32 %v1755_v24, %v1754_v15  ;;  %v1682_v15 = vmul.f32 %v1618_v62, %v1618_v62  ;;  %v1684_v39 = vmul.f32 %v1620_v13, %v1620_v13 }
 0x1b0   :  { %v1758_v37 = vadd.f32 %v1757_v33, %v1756_v29  ;;  %v1621_v29 = vsub.f32 %v3265_v18, %v3112_v21  ;;  %v3270_v33 = vld [vmem:[#allocation3 + $0x100] sm:$0xff]  ;;  %v1777_v62 = vsel %vm1313_vm1, %v1684_v39, 0.0 }
 0x1b1   :  { %v1622_v38 = vsub.f32 %v3270_v33, %v3112_v21 }
 0x1b2   :  { %v1760_v44 = vadd.f32 %v1759_v42, %v1758_v37  ;;  %v1773_v42 = vsel %vm1313_vm1, %v1682_v15, 0.0 }
 0x1b4   :  { %v1762_v52 = vadd.f32 %v1761_v49, %v1760_v44  ;;  %v3275_v44 = vld [vmem:[#allocation3 + $0x108] sm:$0xff]  ;;  %v1685_v49 = vmul.f32 %v1621_v29, %v1621_v29 }
 0x1b5   :  { %v1623_v48 = vsub.f32 %v3275_v44, %v3112_v21 }
 0x1b6   :  { %v1764_v61 = vadd.f32 %v1763_v57, %v1762_v52  ;;  %v1775_v52 = vsel %vm1313_vm1, %v1683_v30, 0.0  ;;  %v1624_v57 = vsub.f32 %v3280_v54, %v3112_v21  ;;  %v1779_v7 = vsel %vm1313_vm1, %v1685_v49, 0.0  ;;  %v3305_v49 = vld [vmem:[#allocation3 + $0x138] sm:$0xff] }
 0x1b7   :  { %v1687_v5 = vmul.f32 %v1623_v48, %v1623_v48  ;;  %4126 = vst [vmem:[#allocation6_spill] sm:$0xff] %v3305_v49 }
 0x1b8   :  { %v1766_v4 = vadd.f32 %v1765_v0, %v1764_v61  ;;  %v1686_v61 = vmul.f32 %v1622_v38, %v1622_v38  ;;  %v1688_v15 = vmul.f32 %v1624_v57, %v1624_v57  ;;  %v3300_v38 = vld [vmem:[#allocation3 + $0x130] sm:$0xff] }
 0x1ba   :  { %v1768_v12 = vadd.f32 %v1767_v9, %v1766_v4  ;;  %v1625_v4 = vsub.f32 %v3285_v63, %v3112_v21  ;;  %v3290_v9 = vld [vmem:[#allocation3 + $0x120] sm:$0xff]  ;;  %v1785_v48 = vsel %vm1313_vm1, %v1688_v15, 0.0 }
 0x1bb   :  { %v1626_v13 = vsub.f32 %v3290_v9, %v3112_v21 }
 0x1bc   :  { %v1770_v24 = vadd.f32 %v1769_v17, %v1768_v12  ;;  %v1781_v17 = vsel %vm1313_vm1, %v1686_v61, 0.0 }
 0x1be   :  { %v1772_v37 = vadd.f32 %v1771_v31, %v1770_v24  ;;  %v3295_v24 = vld [vmem:[#allocation3 + $0x128] sm:$0xff]  ;;  %v1689_v31 = vmul.f32 %v1625_v4, %v1625_v4 }
 0x1bf   :  { %v1627_v30 = vsub.f32 %v3295_v24, %v3112_v21 }
 0x1c0   :  { %v1774_v46 = vadd.f32 %v1773_v42, %v1772_v37  ;;  %v1783_v37 = vsel %vm1313_vm1, %v1687_v5, 0.0  ;;  %v1628_v42 = vsub.f32 %v3300_v38, %v3112_v21  ;;  %v1787_v61 = vsel %vm1313_vm1, %v1689_v31, 0.0 }
 0x1c1   :  { %v1691_v57 = vmul.f32 %v1627_v30, %v1627_v30  ;;  %v3320_v30 = vld [vmem:[#allocation3 + $0x150] sm:$0xff] }
 0x1c2   :  { %v1776_v56 = vadd.f32 %v1775_v52, %v1774_v46  ;;  %v1690_v46 = vmul.f32 %v1626_v13, %v1626_v13  ;;  %v1692_v5 = vmul.f32 %v1628_v42, %v1628_v42  ;;  %4129 = vst [vmem:[#allocation9_spill] sm:$0xff] %v3320_v30 }
 0x1c4   :  { %v1778_v0 = vadd.f32 %v1777_v62, %v1776_v56  ;;  %v1629_v56 = vsub.f32 %v3305_v49, %v3112_v21  ;;  %v3310_v62 = vld [vmem:[#allocation3 + $0x140] sm:$0xff]  ;;  %v1793_v42 = vsel %vm1313_vm1, %v1692_v5, 0.0 }
 0x1c5   :  { %4127 = vst [vmem:[#allocation7_spill] sm:$0xff] %v3310_v62  ;;  %v1630_v4 = vsub.f32 %v3310_v62, %v3112_v21 }
 0x1c6   :  { %v1780_v12 = vadd.f32 %v1779_v7, %v1778_v0  ;;  %v1789_v7 = vsel %vm1313_vm1, %v1690_v46, 0.0 }
 0x1c8   :  { %v1782_v29 = vadd.f32 %v1781_v17, %v1780_v12  ;;  %v3315_v12 = vld [vmem:[#allocation3 + $0x148] sm:$0xff]  ;;  %v1693_v17 = vmul.f32 %v1629_v56, %v1629_v56 }
 0x1c9   :  { %4128 = vst [vmem:[#allocation8_spill] sm:$0xff] %v3315_v12  ;;  %v1631_v15 = vsub.f32 %v3315_v12, %v3112_v21 }
 0x1ca   :  { %v1784_v39 = vadd.f32 %v1783_v37, %v1782_v29  ;;  %v1791_v29 = vsel %vm1313_vm1, %v1691_v57, 0.0  ;;  %v1632_v37 = vsub.f32 %v3320_v30, %v3112_v21  ;;  %v1795_v56 = vsel %vm1313_vm1, %v1693_v17, 0.0 }
 0x1cc   :  { %v1786_v52 = vadd.f32 %v1785_v48, %v1784_v39  ;;  %v1694_v39 = vmul.f32 %v1630_v4, %v1630_v4  ;;  %v3325_v48 = vld [vmem:[#allocation3 + $0x158] sm:$0xff] }
 0x1cd   :  { %4130 = vst [vmem:[#allocation10_spill] sm:$0xff] %v3325_v48 }
 0x1ce   :  { %v1788_v0 = vadd.f32 %v1787_v61, %v1786_v52  ;;  %v1633_v52 = vsub.f32 %v3325_v48, %v3112_v21  ;;  %v1695_v61 = vmul.f32 %v1631_v15, %v1631_v15  ;;  %v1797_v4 = vsel %vm1313_vm1, %v1694_v39, 0.0  ;;  %v3340_v48 = vld [vmem:[#allocation3 + $0x170] sm:$0xff] }
 0x1cf   :  { %4133 = vst [vmem:[#allocation13_spill] sm:$0xff] %v3340_v48 }
 0x1d0   :  { %v1790_v13 = vadd.f32 %v1789_v7, %v1788_v0  ;;  %v3330_v0 = vld [vmem:[#allocation3 + $0x160] sm:$0xff]  ;;  %v1799_v15 = vsel %vm1313_vm1, %v1695_v61, 0.0 }
 0x1d1   :  { %4131 = vst [vmem:[#allocation11_spill] sm:$0xff] %v3330_v0  ;;  %v1634_v7 = vsub.f32 %v3330_v0, %v3112_v21  ;;  %v3345_v0 = vld [vmem:[#allocation3 + $0x178] sm:$0xff] }
 0x1d2   :  { %v1792_v31 = vadd.f32 %v1791_v29, %v1790_v13  ;;  %v1696_v13 = vmul.f32 %v1632_v37, %v1632_v37  ;;  %v3335_v29 = vld [vmem:[#allocation3 + $0x168] sm:$0xff]  ;;  %4134 = vst [vmem:[#allocation14_spill] sm:$0xff] %v3345_v0 }
 0x1d3   :  { %4132 = vst [vmem:[#allocation12_spill] sm:$0xff] %v3335_v29 }
 0x1d4   :  { %v1794_v46 = vadd.f32 %v1793_v42, %v1792_v31  ;;  %v1635_v31 = vsub.f32 %v3335_v29, %v3112_v21  ;;  %v1697_v42 = vmul.f32 %v1633_v52, %v1633_v52  ;;  %v1801_v37 = vsel %vm1313_vm1, %v1696_v13, 0.0  ;;  %v3350_v29 = vld [vmem:[#allocation3 + $0x180] sm:$0xff] }
 0x1d5   :  { %4135 = vst [vmem:[#allocation15_spill] sm:$0xff] %v3350_v29 }
 0x1d6   :  { %v1796_v57 = vadd.f32 %v1795_v56, %v1794_v46  ;;  %v1636_v46 = vsub.f32 %v3340_v48, %v3112_v21  ;;  %v1698_v56 = vmul.f32 %v1634_v7, %v1634_v7  ;;  %v1803_v52 = vsel %vm1313_vm1, %v1697_v42, 0.0  ;;  %v3355_v48 = vld [vmem:[#allocation3 + $0x188] sm:$0xff] }
 0x1d7   :  { %4136 = vst [vmem:[#allocation16_spill] sm:$0xff] %v3355_v48 }
 0x1d8   :  { %v1798_v5 = vadd.f32 %v1797_v4, %v1796_v57  ;;  %v1637_v57 = vsub.f32 %v3345_v0, %v3112_v21  ;;  %v1699_v4 = vmul.f32 %v1635_v31, %v1635_v31  ;;  %v1805_v7 = vsel %vm1313_vm1, %v1698_v56, 0.0  ;;  %v3360_v0 = vld [vmem:[#allocation3 + $0x190] sm:$0xff] }
 0x1d9   :  { %4137 = vst [vmem:[#allocation17_spill] sm:$0xff] %v3360_v0 }
 0x1da   :  { %v1800_v17 = vadd.f32 %v1799_v15, %v1798_v5  ;;  %v1638_v5 = vsub.f32 %v3350_v29, %v3112_v21  ;;  %v1700_v15 = vmul.f32 %v1636_v46, %v1636_v46  ;;  %v1807_v31 = vsel %vm1313_vm1, %v1699_v4, 0.0  ;;  %v3365_v29 = vld [vmem:[#allocation3 + $0x198] sm:$0xff] }
 0x1db   :  { %4138 = vst [vmem:[#allocation18_spill] sm:$0xff] %v3365_v29 }
 0x1dc   :  { %v1802_v39 = vadd.f32 %v1801_v37, %v1800_v17  ;;  %v1639_v17 = vsub.f32 %v3355_v48, %v3112_v21  ;;  %v1701_v37 = vmul.f32 %v1637_v57, %v1637_v57  ;;  %v1809_v46 = vsel %vm1313_vm1, %v1700_v15, 0.0  ;;  %v3370_v48 = vld [vmem:[#allocation3 + $0x1a0] sm:$0xff] }
 0x1dd   :  { %4139 = vst [vmem:[#allocation19_spill] sm:$0xff] %v3370_v48 }
 0x1de   :  { %v1804_v61 = vadd.f32 %v1803_v52, %v1802_v39  ;;  %v1640_v39 = vsub.f32 %v3360_v0, %v3112_v21  ;;  %v1702_v52 = vmul.f32 %v1638_v5, %v1638_v5  ;;  %v1811_v57 = vsel %vm1313_vm1, %v1701_v37, 0.0  ;;  %v3375_v0 = vld [vmem:[#allocation3 + $0x1a8] sm:$0xff] }
 0x1df   :  { %4140 = vst [vmem:[#allocation20_spill] sm:$0xff] %v3375_v0 }
 0x1e0   :  { %v1806_v13 = vadd.f32 %v1805_v7, %v1804_v61  ;;  %v1641_v61 = vsub.f32 %v3365_v29, %v3112_v21  ;;  %v1703_v7 = vmul.f32 %v1639_v17, %v1639_v17  ;;  %v1813_v5 = vsel %vm1313_vm1, %v1702_v52, 0.0  ;;  %v3380_v29 = vld [vmem:[#allocation3 + $0x1b0] sm:$0xff] }
 0x1e1   :  { %4141 = vst [vmem:[#allocation21_spill] sm:$0xff] %v3380_v29 }
 0x1e2   :  { %v1808_v42 = vadd.f32 %v1807_v31, %v1806_v13  ;;  %v1642_v13 = vsub.f32 %v3370_v48, %v3112_v21  ;;  %v1704_v31 = vmul.f32 %v1640_v39, %v1640_v39  ;;  %v1815_v17 = vsel %vm1313_vm1, %v1703_v7, 0.0  ;;  %v3385_v48 = vld [vmem:[#allocation3 + $0x1b8] sm:$0xff] }
 0x1e3   :  { %4142 = vst [vmem:[#allocation22_spill] sm:$0xff] %v3385_v48 }
 0x1e4   :  { %v1810_v56 = vadd.f32 %v1809_v46, %v1808_v42  ;;  %v1643_v42 = vsub.f32 %v3375_v0, %v3112_v21  ;;  %v1705_v46 = vmul.f32 %v1641_v61, %v1641_v61  ;;  %v1817_v39 = vsel %vm1313_vm1, %v1704_v31, 0.0  ;;  %v3390_v0 = vld [vmem:[#allocation3 + $0x1c0] sm:$0xff] }
 0x1e5   :  { %4143 = vst [vmem:[#allocation23_spill] sm:$0xff] %v3390_v0 }
 0x1e6   :  { %v1812_v4 = vadd.f32 %v1811_v57, %v1810_v56  ;;  %v1644_v56 = vsub.f32 %v3380_v29, %v3112_v21  ;;  %v1706_v57 = vmul.f32 %v1642_v13, %v1642_v13  ;;  %v1819_v61 = vsel %vm1313_vm1, %v1705_v46, 0.0  ;;  %v3395_v29 = vld [vmem:[#allocation3 + $0x1c8] sm:$0xff] }
 0x1e7   :  { %4144 = vst [vmem:[#allocation24_spill] sm:$0xff] %v3395_v29 }
 0x1e8   :  { %v1814_v15 = vadd.f32 %v1813_v5, %v1812_v4  ;;  %v1645_v4 = vsub.f32 %v3385_v48, %v3112_v21  ;;  %v1707_v5 = vmul.f32 %v1643_v42, %v1643_v42  ;;  %v1821_v13 = vsel %vm1313_vm1, %v1706_v57, 0.0  ;;  %v3400_v48 = vld [vmem:[#allocation3 + $0x1d0] sm:$0xff] }
 0x1e9   :  { %4145 = vst [vmem:[#allocation25_spill] sm:$0xff] %v3400_v48 }
 0x1ea   :  { %v1816_v37 = vadd.f32 %v1815_v17, %v1814_v15  ;;  %v1646_v15 = vsub.f32 %v3390_v0, %v3112_v21  ;;  %v1708_v17 = vmul.f32 %v1644_v56, %v1644_v56  ;;  %v1823_v42 = vsel %vm1313_vm1, %v1707_v5, 0.0  ;;  %v3405_v0 = vld [vmem:[#allocation3 + $0x1d8] sm:$0xff] }
 0x1eb   :  { %4146 = vst [vmem:[#allocation26_spill] sm:$0xff] %v3405_v0 }
 0x1ec   :  { %v1818_v52 = vadd.f32 %v1817_v39, %v1816_v37  ;;  %v1647_v37 = vsub.f32 %v3395_v29, %v3112_v21  ;;  %v1709_v39 = vmul.f32 %v1645_v4, %v1645_v4  ;;  %v1825_v56 = vsel %vm1313_vm1, %v1708_v17, 0.0  ;;  %v3410_v29 = vld [vmem:[#allocation3 + $0x1e0] sm:$0xff] }
 0x1ed   :  { %4147 = vst [vmem:[#allocation27_spill] sm:$0xff] %v3410_v29 }
 0x1ee   :  { %v1820_v7 = vadd.f32 %v1819_v61, %v1818_v52  ;;  %v1648_v52 = vsub.f32 %v3400_v48, %v3112_v21  ;;  %v1710_v61 = vmul.f32 %v1646_v15, %v1646_v15  ;;  %v1827_v4 = vsel %vm1313_vm1, %v1709_v39, 0.0  ;;  %v1581_v48 = vld [vmem:[#allocation3 + $0x1e8] sm:$0xff] }
 0x1ef   :  { %v1651_v30 = vsub.f32 %v1581_v48, %v3112_v21 }
 0x1f0   :  { %v1822_v31 = vadd.f32 %v1821_v13, %v1820_v7  ;;  %v1649_v7 = vsub.f32 %v3405_v0, %v3112_v21  ;;  %v1711_v13 = vmul.f32 %v1647_v37, %v1647_v37  ;;  %v1829_v15 = vsel %vm1313_vm1, %v1710_v61, 0.0  ;;  %v3417_v0 = vld [vmem:[#allocation3 + $0x1f0] sm:$0xff] }
 0x1f1   :  { %4148 = vst [vmem:[#allocation28_spill] sm:$0xff] %v3417_v0  ;;  %v1652_v39 = vsub.f32 %v3417_v0, %v3112_v21 }
 0x1f2   :  { %v1824_v46 = vadd.f32 %v1823_v42, %v1822_v31  ;;  %v1650_v31 = vsub.f32 %v3410_v29, %v3112_v21  ;;  %v1712_v42 = vmul.f32 %v1648_v52, %v1648_v52  ;;  %v3422_v29 = vld [vmem:[#allocation3 + $0x1f8] sm:$0xff] }
 0x1f3   :  { %4149 = vst [vmem:[#allocation29_spill] sm:$0xff] %v3422_v29  ;;  %v1653_v61 = vsub.f32 %v3422_v29, %v3112_v21 }
 0x1f4   :  { %v1826_v57 = vadd.f32 %v1825_v56, %v1824_v46  ;;  %v1713_v46 = vmul.f32 %v1649_v7, %v1649_v7  ;;  %v1831_v56 = vsel %vm1313_vm1, %v1711_v13, 0.0  ;;  %v1716_v13 = vmul.f32 %v1652_v39, %v1652_v39 }
 0x1f6   :  { %v1828_v5 = vadd.f32 %v1827_v4, %v1826_v57  ;;  %v1714_v57 = vmul.f32 %v1650_v31, %v1650_v31  ;;  %v1833_v4 = vsel %vm1313_vm1, %v1712_v42, 0.0  ;;  %v1835_v7 = vsel %vm1313_vm1, %v1713_v46, 0.0 }
 0x1f7   :  { %v1841_v42 = vsel %vm1313_vm1, %v1716_v13, 0.0 }
 0x1f8   :  { %v1830_v17 = vadd.f32 %v1829_v15, %v1828_v5  ;;  %v1715_v5 = vmul.f32 %v1651_v30, %v1651_v30  ;;  %v1837_v12 = vsel %vm1313_vm1, %v1714_v57, 0.0 }
 0x1fa   :  { %v1832_v37 = vadd.f32 %v1831_v56, %v1830_v17  ;;  %v1717_v56 = vmul.f32 %v1653_v61, %v1653_v61  ;;  %v1839_v0 = vsel %vm1313_vm1, %v1715_v5, 0.0  ;;  %v1857_v61 = vld [vmem:[%s4100_s4] sm:$0x1] }
 0x1fc   :  { %v1834_v52 = vadd.f32 %v1833_v4, %v1832_v37  ;;  %v1843_v37 = vsel %vm1313_vm1, %v1717_v56, 0.0 }
 0x1fe   :  { %v1836_v15 = vadd.f32 %v1835_v7, %v1834_v52 }
 0x200   :  { %v1838_v17 = vadd.f32 %v1837_v12, %v1836_v15  ;;  %v1853_v12 = vld [vmem:[%s4099_s3] sm:$0x1]  ;;  %s2663_s3 = smov [#allocation3]  }
 0x201   :  { %s2133_s4 = sshll.u32 %s2663_s3, 4  ;;  %s4065_s4 = int_to_ptr.vmem [resolvable:$true] %s2133_s4 }
 0x202   :  { %v1840_v31 = vadd.f32 %v1839_v0, %v1838_v17  ;;  %s2638_s9 = scalar_lea.vmem %s4065_s4, 8192  ;;  %p2643_p1 = scmp.lt.s32.totalorder %s4065_s4, %s4065_s4 }
 0x203   :  { %p2639_p0 = scmp.ne.s32.totalorder %s4065_s4, %s2638_s9  ;;  %p2644_p2 = scmp.lt.s32.totalorder %s2638_s9, %s2638_s9 }
 0x204   :  { %v1842_v62 = vadd.f32 %v1841_v42, %v1840_v31  ;;  %v4150_v42 = vld [vmem:[#allocation6_spill] sm:$0xff] }
 0x205   :  { %p2645_p3 = por %p2644_p2, %p2643_p1 }
 0x206   :  { %v1844_v4 = vadd.f32 %v1843_v37, %v1842_v62  ;;  %v4151_v37 = vld [vmem:[#allocation7_spill] sm:$0xff] }
 0x207   :  { %p2646_p4 = pnand %p2645_p3, %p2639_p0 }
 0x208   :  { %v1845_v49 = vrot.slane %v1844_v4, 4 }
 0x20a   :  { %v1846_v21 = vadd.f32 %v1845_v49, %v1844_v4  ;;  %v4152_v4 = vld [vmem:[#allocation8_spill] sm:$0xff] }
 0x20c   :  { %v1847_v30 = vrot.slane %v1846_v21, 2 }
 0x20e   :  { %v1848_v29 = vadd.f32 %v1847_v30, %v1846_v21  ;;  %v4153_v21 = vld [vmem:[#allocation9_spill] sm:$0xff]  ;;  %v4154_v30 = vld [vmem:[#allocation10_spill] sm:$0xff] }
 0x210   :  { %v1849_v46 = vrot.slane %v1848_v29, 1 }
 0x212   :  { %v1850_v52 = vadd.f32 %v1849_v46, %v1848_v29  ;;  %v4155_v46 = vld [vmem:[#allocation11_spill] sm:$0xff] }
 0x214   :  { %v1852_v39 = vmul.f32 0.001953125, %v1850_v52 }
 0x216   :  { %v1854_v7 = vadd.f32 1e-05, %v1852_v39  ;;  %v4156_v39 = vld [vmem:[#allocation12_spill] sm:$0xff] }
 0x218   :  { %2636 = vrsqrt.f32 %v1854_v7 }
 0x222   :  { %v2637_v0 = vpop.eup %2636 }
 0x223   :  { %v1856_v57 = vmul.f32 %v2637_v0, %v1853_v12  ;;  %v4157_v12 = vld [vmem:[#allocation13_spill] sm:$0xff] }
 0x225   :  { %v1858_v62 = vmul.f32 %v1856_v57, %v3106_v19  ;;  %v3439_v49 = vrot.slane %v1856_v57, %v3108_v20  ;;  %v4158_v57 = vld [vmem:[#allocation14_spill] sm:$0xff] }
 0x227   :  { %v1859_v5 = vsub.f32 %v1857_v61, %v1858_v62  ;;  %v1927_v29 = vmul.f32 %v3439_v49, %v1581_v48  ;;  %v3444_v15 = vmul.f32 %v3439_v49, %v3114_v22  ;;  %v3448_v13 = vmul.f32 %v3439_v49, %v3116_v23  ;;  %v4159_v62 = vld [vmem:[#allocation15_spill] sm:$0xff] }
 0x228   :  { %v3452_v17 = vmul.f32 %v3439_v49, %v3122_v26  ;;  %v3456_v19 = vmul.f32 %v3439_v49, %v3126_v28  ;;  %v3460_v56 = vmul.f32 %v3439_v49, %v3130_v32  ;;  %v3464_v22 = vmul.f32 %v3439_v49, %v3134_v35 }
 0x229   :  { %v3467_v48 = vrot.slane %v1859_v5, %v3108_v20  ;;  %v3471_v23 = vmul.f32 %v3439_v49, %v3140_v40  ;;  %v3475_v26 = vmul.f32 %v3439_v49, %v3145_v45  ;;  %v3479_v28 = vmul.f32 %v3439_v49, %v3150_v50 }
 0x22a   :  { %v3483_v32 = vmul.f32 %v3439_v49, %v3155_v55  ;;  %v3487_v20 = vmul.f32 %v3439_v49, %v3160_v60  ;;  %v3491_v35 = vmul.f32 %v3439_v49, %v3165_v1  ;;  %v3495_v40 = vmul.f32 %v3439_v49, %v3170_v6 }
 0x22b   :  { %v1997_v45 = vadd.f32 %v3467_v48, %v1927_v29  ;;  %v3500_v50 = vmul.f32 %v3439_v49, %v3175_v11  ;;  %v3504_v55 = vmul.f32 %v3439_v49, %v3180_v16  ;;  %v3508_v60 = vmul.f32 %v3439_v49, %v3185_v27  ;;  %v4160_v29 = vld [vmem:[#allocation16_spill] sm:$0xff] }
 0x22c   :  { %v3512_v1 = vmul.f32 %v3439_v49, %v3190_v34  ;;  %v3516_v6 = vmul.f32 %v3439_v49, %v3195_v41  ;;  %v3520_v11 = vmul.f32 %v3439_v49, %v3200_v47  ;;  %v3524_v16 = vmul.f32 %v3439_v49, %v3205_v53 }
 0x22d   :  { %v2061_v31 = vmax.f32 %v1997_v45, 0.0  ;;  %v3528_v27 = vmul.f32 %v3439_v49, %v3210_v59  ;;  %v3532_v34 = vmul.f32 %v3439_v49, %v3215_v2  ;;  %v3536_v41 = vmul.f32 %v3439_v49, %v3220_v8 }
 0x22e   :  { %v3540_v47 = vmul.f32 %v3439_v49, %v3225_v14  ;;  %v3544_v53 = vmul.f32 %v3439_v49, %v3230_v25  ;;  %v3548_v59 = vmul.f32 %v3439_v49, %v3235_v36  ;;  %v3552_v2 = vmul.f32 %v3439_v49, %v3240_v43 }
 0x22f   :  { %2125 = vst.msk [vmem:[#allocation3 + $0x1e8] sm:$0xff] %vm1313_vm1, %v2061_v31  ;;  %v3557_v8 = vmul.f32 %v3439_v49, %v3245_v51  ;;  %v3561_v14 = vmul.f32 %v3439_v49, %v3250_v58  ;;  %v3565_v25 = vmul.f32 %v3439_v49, %v3255_v3  ;;  %v3569_v36 = vmul.f32 %v3439_v49, %v3260_v10  ;;  %v4161_v31 = vld [vmem:[#allocation17_spill] sm:$0xff] }
 0x230   :  { %v3573_v43 = vmul.f32 %v3439_v49, %v3265_v18  ;;  %v3577_v51 = vmul.f32 %v3439_v49, %v3270_v33  ;;  %v3581_v58 = vmul.f32 %v3439_v49, %v3275_v44  ;;  %v3585_v3 = vmul.f32 %v3439_v49, %v3280_v54 }
 0x231   :  { %v3589_v10 = vmul.f32 %v3439_v49, %v3285_v63  ;;  %v3593_v18 = vmul.f32 %v3439_v49, %v3290_v9  ;;  %v3597_v33 = vmul.f32 %v3439_v49, %v3295_v24  ;;  %v3601_v44 = vmul.f32 %v3439_v49, %v3300_v38 }
 0x232   :  { %v3605_v54 = vmul.f32 %v3439_v49, %v4150_v42  ;;  %v3609_v63 = vmul.f32 %v3439_v49, %v4151_v37  ;;  %v3613_v9 = vmul.f32 %v3439_v49, %v4152_v4  ;;  %v3617_v24 = vmul.f32 %v3439_v49, %v4153_v21  ;;  %v4162_v37 = vld [vmem:[#allocation18_spill] sm:$0xff]  ;;  %v4164_v21 = vld [vmem:[#allocation19_spill] sm:$0xff] }
 0x233   :  { %v3621_v38 = vmul.f32 %v3439_v49, %v4154_v30  ;;  %v3625_v52 = vmul.f32 %v3439_v49, %v4155_v46  ;;  %v3629_v7 = vmul.f32 %v3439_v49, %v4156_v39  ;;  %v3633_v0 = vmul.f32 %v3439_v49, %v4157_v12  ;;  %v4166_v46 = vld [vmem:[#allocation20_spill] sm:$0xff]  ;;  %v4168_v12 = vld [vmem:[#allocation21_spill] sm:$0xff] }
 0x234   :  { %v3637_v61 = vmul.f32 %v3439_v49, %v4158_v57  ;;  %v3641_v5 = vmul.f32 %v3439_v49, %v4159_v62  ;;  %v3645_v45 = vmul.f32 %v3439_v49, %v4160_v29  ;;  %v3649_v42 = vmul.f32 %v3439_v49, %v4161_v31  ;;  %v4170_v62 = vld [vmem:[#allocation22_spill] sm:$0xff]  ;;  %v4172_v31 = vld [vmem:[#allocation23_spill] sm:$0xff] }
 0x235   :  { %v3653_v4 = vmul.f32 %v3439_v49, %v4162_v37  ;;  %v3657_v30 = vmul.f32 %v3439_v49, %v4164_v21  ;;  %v3661_v39 = vmul.f32 %v3439_v49, %v4166_v46  ;;  %v3665_v57 = vmul.f32 %v3439_v49, %v4168_v12 }
 0x236   :  { %v3669_v29 = vmul.f32 %v3439_v49, %v4170_v62  ;;  %v3673_v37 = vmul.f32 %v3439_v49, %v4172_v31 }
 0x237   :  { %4163 = vst [vmem:[#allocation6_spill] sm:$0xff] %v3653_v4  ;;  %4165 = vst [vmem:[#allocation7_spill] sm:$0xff] %v3657_v30  ;;  %v4174_v4 = vld [vmem:[#allocation24_spill] sm:$0xff]  ;;  %v4175_v30 = vld [vmem:[#allocation25_spill] sm:$0xff] }
 0x238   :  { %4167 = vst [vmem:[#allocation8_spill] sm:$0xff] %v3661_v39  ;;  %4169 = vst [vmem:[#allocation9_spill] sm:$0xff] %v3665_v57  ;;  %v3677_v21 = vmul.f32 %v3439_v49, %v4174_v4  ;;  %v3681_v46 = vmul.f32 %v3439_v49, %v4175_v30  ;;  %v4176_v39 = vld [vmem:[#allocation26_spill] sm:$0xff]  ;;  %v4177_v57 = vld [vmem:[#allocation27_spill] sm:$0xff]  ;;  %v3701_v30 = vadd.f32 %v3467_v48, %v3444_v15 }
 0x239   :  { %4171 = vst [vmem:[#allocation10_spill] sm:$0xff] %v3669_v29  ;;  %4173 = vst [vmem:[#allocation11_spill] sm:$0xff] %v3673_v37  ;;  %v3685_v12 = vmul.f32 %v3439_v49, %v4176_v39  ;;  %v3689_v62 = vmul.f32 %v3439_v49, %v4177_v57  ;;  %v4178_v29 = vld [vmem:[#allocation28_spill] sm:$0xff]  ;;  %v4179_v37 = vld [vmem:[#allocation29_spill] sm:$0xff]  ;;  %v3705_v39 = vadd.f32 %v3467_v48, %v3448_v13 }
 0x23a   :  { %v3693_v31 = vmul.f32 %v3439_v49, %v4178_v29  ;;  %v3697_v4 = vmul.f32 %v3439_v49, %v4179_v37  ;;  %v3709_v57 = vadd.f32 %v3467_v48, %v3452_v17  ;;  %v3713_v29 = vadd.f32 %v3467_v48, %v3456_v19 }
 0x23b   :  { %v3717_v49 = vadd.f32 %v3467_v48, %v3460_v56  ;;  %v3721_v15 = vadd.f32 %v3467_v48, %v3464_v22  ;;  %v3725_v13 = vadd.f32 %v3467_v48, %v3471_v23  ;;  %v3729_v17 = vadd.f32 %v3467_v48, %v3475_v26 }
 0x23c   :  { %v3733_v19 = vadd.f32 %v3467_v48, %v3479_v28  ;;  %v3737_v56 = vadd.f32 %v3467_v48, %v3483_v32  ;;  %v3741_v22 = vadd.f32 %v3467_v48, %v3487_v20  ;;  %v3745_v23 = vadd.f32 %v3467_v48, %v3491_v35 }
 0x23d   :  { %v3749_v26 = vadd.f32 %v3467_v48, %v3495_v40  ;;  %v3753_v28 = vadd.f32 %v3467_v48, %v3500_v50  ;;  %v3757_v32 = vadd.f32 %v3467_v48, %v3504_v55  ;;  %v3761_v20 = vadd.f32 %v3467_v48, %v3508_v60 }
 0x23e   :  { %v3765_v35 = vadd.f32 %v3467_v48, %v3512_v1  ;;  %v3769_v40 = vadd.f32 %v3467_v48, %v3516_v6  ;;  %v3773_v50 = vadd.f32 %v3467_v48, %v3520_v11  ;;  %v3777_v55 = vadd.f32 %v3467_v48, %v3524_v16  ;;  %v4185_v37 = vld [vmem:[#allocation6_spill] sm:$0xff] }
 0x23f   :  { %v3781_v60 = vadd.f32 %v3467_v48, %v3528_v27  ;;  %v3785_v1 = vadd.f32 %v3467_v48, %v3532_v34  ;;  %v3789_v6 = vadd.f32 %v3467_v48, %v3536_v41  ;;  %v3793_v11 = vadd.f32 %v3467_v48, %v3540_v47 }
 0x240   :  { %v3797_v16 = vadd.f32 %v3467_v48, %v3544_v53  ;;  %v3801_v27 = vadd.f32 %v3467_v48, %v3548_v59  ;;  %v3805_v34 = vadd.f32 %v3467_v48, %v3552_v2  ;;  %v3809_v41 = vadd.f32 %v3467_v48, %v3557_v8 }
 0x241   :  { %v3813_v47 = vadd.f32 %v3467_v48, %v3561_v14  ;;  %v3817_v53 = vadd.f32 %v3467_v48, %v3565_v25  ;;  %v3821_v59 = vadd.f32 %v3467_v48, %v3569_v36  ;;  %v3825_v2 = vadd.f32 %v3467_v48, %v3573_v43 }
 0x242   :  { %v3829_v8 = vadd.f32 %v3467_v48, %v3577_v51  ;;  %v3833_v14 = vadd.f32 %v3467_v48, %v3581_v58  ;;  %v3837_v25 = vadd.f32 %v3467_v48, %v3585_v3  ;;  %v3841_v36 = vadd.f32 %v3467_v48, %v3589_v10 }
 0x243   :  { %v3845_v43 = vadd.f32 %v3467_v48, %v3593_v18  ;;  %v3849_v51 = vadd.f32 %v3467_v48, %v3597_v33  ;;  %v3853_v58 = vadd.f32 %v3467_v48, %v3601_v44  ;;  %v3857_v3 = vadd.f32 %v3467_v48, %v3605_v54 }
 0x244   :  { %v3861_v10 = vadd.f32 %v3467_v48, %v3609_v63  ;;  %v3865_v18 = vadd.f32 %v3467_v48, %v3613_v9  ;;  %v3869_v33 = vadd.f32 %v3467_v48, %v3617_v24  ;;  %v3873_v44 = vadd.f32 %v3467_v48, %v3621_v38 }
 0x245   :  { %v3877_v54 = vadd.f32 %v3467_v48, %v3625_v52  ;;  %v3881_v63 = vadd.f32 %v3467_v48, %v3629_v7  ;;  %v3885_v9 = vadd.f32 %v3467_v48, %v3633_v0  ;;  %v3889_v24 = vadd.f32 %v3467_v48, %v3637_v61 }
 0x246   :  { %v3893_v38 = vadd.f32 %v3467_v48, %v3641_v5  ;;  %v3897_v52 = vadd.f32 %v3467_v48, %v3645_v45  ;;  %v3901_v7 = vadd.f32 %v3467_v48, %v3649_v42  ;;  %v3905_v0 = vadd.f32 %v3467_v48, %v4185_v37 }
 0x247   :  { %4180 = vst [vmem:[#allocation12_spill] sm:$0xff] %v3885_v9  ;;  %4181 = vst [vmem:[#allocation13_spill] sm:$0xff] %v3889_v24  ;;  %v4186_v9 = vld [vmem:[#allocation7_spill] sm:$0xff]  ;;  %v4187_v24 = vld [vmem:[#allocation8_spill] sm:$0xff] }
 0x248   :  { %4182 = vst [vmem:[#allocation14_spill] sm:$0xff] %v3893_v38  ;;  %4183 = vst [vmem:[#allocation15_spill] sm:$0xff] %v3897_v52  ;;  %v3909_v61 = vadd.f32 %v3467_v48, %v4186_v9  ;;  %v3913_v5 = vadd.f32 %v3467_v48, %v4187_v24  ;;  %v4188_v38 = vld [vmem:[#allocation9_spill] sm:$0xff]  ;;  %v4189_v52 = vld [vmem:[#allocation10_spill] sm:$0xff]  ;;  %v3929_v9 = vadd.f32 %v3467_v48, %v3677_v21 }
 0x249   :  { %4184 = vst [vmem:[#allocation16_spill] sm:$0xff] %v3901_v7  ;;  %v3917_v45 = vadd.f32 %v3467_v48, %v4188_v38  ;;  %v3921_v42 = vadd.f32 %v3467_v48, %v4189_v52  ;;  %v4190_v7 = vld [vmem:[#allocation11_spill] sm:$0xff]  ;;  %v3933_v24 = vadd.f32 %v3467_v48, %v3681_v46  ;;  %v3937_v38 = vadd.f32 %v3467_v48, %v3685_v12 }
 0x24a   :  { %v3925_v37 = vadd.f32 %v3467_v48, %v4190_v7  ;;  %4191 = vst [vmem:[#allocation17_spill] sm:$0xff] %v3929_v9  ;;  %v3941_v52 = vadd.f32 %v3467_v48, %v3689_v62  ;;  %v3945_v7 = vadd.f32 %v3467_v48, %v3693_v31  ;;  %v3949_v21 = vadd.f32 %v3467_v48, %v3697_v4 }
 0x24b   :  { %4192 = vst [vmem:[#allocation18_spill] sm:$0xff] %v3933_v24  ;;  %4193 = vst [vmem:[#allocation19_spill] sm:$0xff] %v3937_v38  ;;  %v2000_v9 = vmax.f32 %v3701_v30, 0.0  ;;  %v2001_v46 = vmax.f32 %v3705_v39, 0.0  ;;  %v2002_v24 = vmax.f32 %v3709_v57, 0.0  ;;  %v2003_v12 = vmax.f32 %v3713_v29, 0.0 }
 0x24c   :  { %4194 = vst [vmem:[#allocation20_spill] sm:$0xff] %v3941_v52  ;;  %4195 = vst [vmem:[#allocation21_spill] sm:$0xff] %v3945_v7  ;;  %v2004_v38 = vmax.f32 %v3717_v49, 0.0  ;;  %v2005_v62 = vmax.f32 %v3721_v15, 0.0  ;;  %v2006_v52 = vmax.f32 %v3725_v13, 0.0  ;;  %v2007_v31 = vmax.f32 %v3729_v17, 0.0 }
 0x24d   :  { %v2008_v7 = vmax.f32 %v3733_v19, 0.0  ;;  %2064 = vst.msk [vmem:[#allocation3] sm:$0xff] %vm1313_vm1, %v2000_v9  ;;  %v2009_v48 = vmax.f32 %v3737_v56, 0.0  ;;  %v2010_v4 = vmax.f32 %v3741_v22, 0.0  ;;  %v2011_v30 = vmax.f32 %v3745_v23, 0.0  ;;  %2065 = vst.msk [vmem:[#allocation3 + $0x8] sm:$0xff] %vm1313_vm1, %v2001_v46 }
 0x24e   :  { %v2012_v39 = vmax.f32 %v3749_v26, 0.0  ;;  %2066 = vst.msk [vmem:[#allocation3 + $0x10] sm:$0xff] %vm1313_vm1, %v2002_v24  ;;  %2067 = vst.msk [vmem:[#allocation3 + $0x18] sm:$0xff] %vm1313_vm1, %v2003_v12  ;;  %v2013_v57 = vmax.f32 %v3753_v28, 0.0  ;;  %v2014_v29 = vmax.f32 %v3757_v32, 0.0  ;;  %v2015_v49 = vmax.f32 %v3761_v20, 0.0 }
 0x24f   :  { %2068 = vst.msk [vmem:[#allocation3 + $0x20] sm:$0xff] %vm1313_vm1, %v2004_v38  ;;  %v2016_v15 = vmax.f32 %v3765_v35, 0.0  ;;  %2069 = vst.msk [vmem:[#allocation3 + $0x28] sm:$0xff] %vm1313_vm1, %v2005_v62  ;;  %v2017_v13 = vmax.f32 %v3769_v40, 0.0  ;;  %v2018_v17 = vmax.f32 %v3773_v50, 0.0  ;;  %v2019_v19 = vmax.f32 %v3777_v55, 0.0 }
 0x250   :  { %2070 = vst.msk [vmem:[#allocation3 + $0x30] sm:$0xff] %vm1313_vm1, %v2006_v52  ;;  %2071 = vst.msk [vmem:[#allocation3 + $0x38] sm:$0xff] %vm1313_vm1, %v2007_v31  ;;  %v2020_v56 = vmax.f32 %v3781_v60, 0.0  ;;  %v2021_v22 = vmax.f32 %v3785_v1, 0.0  ;;  %v2022_v23 = vmax.f32 %v3789_v6, 0.0  ;;  %v2023_v26 = vmax.f32 %v3793_v11, 0.0 }
 0x251   :  { %2072 = vst.msk [vmem:[#allocation3 + $0x40] sm:$0xff] %vm1313_vm1, %v2008_v7  ;;  %2073 = vst.msk [vmem:[#allocation3 + $0x48] sm:$0xff] %vm1313_vm1, %v2009_v48  ;;  %v2024_v28 = vmax.f32 %v3797_v16, 0.0  ;;  %v2025_v32 = vmax.f32 %v3801_v27, 0.0  ;;  %v2026_v20 = vmax.f32 %v3805_v34, 0.0  ;;  %v2027_v35 = vmax.f32 %v3809_v41, 0.0 }
 0x252   :  { %2074 = vst.msk [vmem:[#allocation3 + $0x50] sm:$0xff] %vm1313_vm1, %v2010_v4  ;;  %2075 = vst.msk [vmem:[#allocation3 + $0x58] sm:$0xff] %vm1313_vm1, %v2011_v30  ;;  %v2028_v40 = vmax.f32 %v3813_v47, 0.0  ;;  %v2029_v50 = vmax.f32 %v3817_v53, 0.0  ;;  %v2030_v55 = vmax.f32 %v3821_v59, 0.0  ;;  %v2031_v60 = vmax.f32 %v3825_v2, 0.0 }
 0x253   :  { %2076 = vst.msk [vmem:[#allocation3 + $0x60] sm:$0xff] %vm1313_vm1, %v2012_v39  ;;  %2077 = vst.msk [vmem:[#allocation3 + $0x68] sm:$0xff] %vm1313_vm1, %v2013_v57  ;;  %v2032_v1 = vmax.f32 %v3829_v8, 0.0  ;;  %v2033_v6 = vmax.f32 %v3833_v14, 0.0  ;;  %v2034_v11 = vmax.f32 %v3837_v25, 0.0  ;;  %v2035_v16 = vmax.f32 %v3841_v36, 0.0 }
 0x254   :  { %2078 = vst.msk [vmem:[#allocation3 + $0x70] sm:$0xff] %vm1313_vm1, %v2014_v29  ;;  %2079 = vst.msk [vmem:[#allocation3 + $0x78] sm:$0xff] %vm1313_vm1, %v2015_v49  ;;  %v2036_v27 = vmax.f32 %v3845_v43, 0.0  ;;  %v2037_v34 = vmax.f32 %v3849_v51, 0.0  ;;  %v2038_v41 = vmax.f32 %v3853_v58, 0.0  ;;  %v2039_v47 = vmax.f32 %v3857_v3, 0.0 }
 0x255   :  { %2080 = vst.msk [vmem:[#allocation3 + $0x80] sm:$0xff] %vm1313_vm1, %v2016_v15  ;;  %2081 = vst.msk [vmem:[#allocation3 + $0x88] sm:$0xff] %vm1313_vm1, %v2017_v13  ;;  %v2040_v53 = vmax.f32 %v3861_v10, 0.0  ;;  %v2041_v59 = vmax.f32 %v3865_v18, 0.0  ;;  %v2042_v2 = vmax.f32 %v3869_v33, 0.0  ;;  %v2043_v8 = vmax.f32 %v3873_v44, 0.0 }
 0x256   :  { %2082 = vst.msk [vmem:[#allocation3 + $0x90] sm:$0xff] %vm1313_vm1, %v2018_v17  ;;  %2083 = vst.msk [vmem:[#allocation3 + $0x98] sm:$0xff] %vm1313_vm1, %v2019_v19  ;;  %v2044_v14 = vmax.f32 %v3877_v54, 0.0  ;;  %v2045_v25 = vmax.f32 %v3881_v63, 0.0  ;;  %v4196_v36 = vld [vmem:[#allocation12_spill] sm:$0xff]  ;;  %v4197_v51 = vld [vmem:[#allocation13_spill] sm:$0xff] }
 0x257   :  { %2084 = vst.msk [vmem:[#allocation3 + $0xa0] sm:$0xff] %vm1313_vm1, %v2020_v56  ;;  %2085 = vst.msk [vmem:[#allocation3 + $0xa8] sm:$0xff] %vm1313_vm1, %v2021_v22  ;;  %v2046_v43 = vmax.f32 %v4196_v36, 0.0  ;;  %v2047_v58 = vmax.f32 %v4197_v51, 0.0  ;;  %v4198_v3 = vld [vmem:[#allocation14_spill] sm:$0xff]  ;;  %v4199_v18 = vld [vmem:[#allocation15_spill] sm:$0xff] }
 0x258   :  { %2086 = vst.msk [vmem:[#allocation3 + $0xb0] sm:$0xff] %vm1313_vm1, %v2022_v23  ;;  %2087 = vst.msk [vmem:[#allocation3 + $0xb8] sm:$0xff] %vm1313_vm1, %v2023_v26  ;;  %v2048_v10 = vmax.f32 %v4198_v3, 0.0  ;;  %v2049_v33 = vmax.f32 %v4199_v18, 0.0  ;;  %v4200_v44 = vld [vmem:[#allocation16_spill] sm:$0xff]  ;;  %v2051_v63 = vmax.f32 %v3905_v0, 0.0 }
 0x259   :  { %2088 = vst.msk [vmem:[#allocation3 + $0xc0] sm:$0xff] %vm1313_vm1, %v2024_v28  ;;  %2089 = vst.msk [vmem:[#allocation3 + $0xc8] sm:$0xff] %vm1313_vm1, %v2025_v32  ;;  %v2050_v54 = vmax.f32 %v4200_v44, 0.0  ;;  %v2052_v9 = vmax.f32 %v3909_v61, 0.0  ;;  %v2053_v24 = vmax.f32 %v3913_v5, 0.0  ;;  %v2054_v38 = vmax.f32 %v3917_v45, 0.0 }
 0x25a   :  { %2090 = vst.msk [vmem:[#allocation3 + $0xd0] sm:$0xff] %vm1313_vm1, %v2026_v20  ;;  %2091 = vst.msk [vmem:[#allocation3 + $0xd8] sm:$0xff] %vm1313_vm1, %v2027_v35  ;;  %v2055_v52 = vmax.f32 %v3921_v42, 0.0  ;;  %v2056_v7 = vmax.f32 %v3925_v37, 0.0  ;;  %v4201_v0 = vld [vmem:[#allocation17_spill] sm:$0xff]  ;;  %v4202_v46 = vld [vmem:[#allocation18_spill] sm:$0xff] }
 0x25b   :  { %2092 = vst.msk [vmem:[#allocation3 + $0xe0] sm:$0xff] %vm1313_vm1, %v2028_v40  ;;  %2093 = vst.msk [vmem:[#allocation3 + $0xe8] sm:$0xff] %vm1313_vm1, %v2029_v50  ;;  %v2057_v61 = vmax.f32 %v4201_v0, 0.0  ;;  %v2058_v12 = vmax.f32 %v4202_v46, 0.0  ;;  %v4203_v62 = vld [vmem:[#allocation19_spill] sm:$0xff]  ;;  %v4204_v31 = vld [vmem:[#allocation20_spill] sm:$0xff] }
 0x25c   :  { %2094 = vst.msk [vmem:[#allocation3 + $0xf0] sm:$0xff] %vm1313_vm1, %v2030_v55  ;;  %2095 = vst.msk [vmem:[#allocation3 + $0xf8] sm:$0xff] %vm1313_vm1, %v2031_v60  ;;  %v2059_v5 = vmax.f32 %v4203_v62, 0.0  ;;  %v2060_v45 = vmax.f32 %v4204_v31, 0.0  ;;  %v4205_v42 = vld [vmem:[#allocation21_spill] sm:$0xff]  ;;  %v2063_v48 = vmax.f32 %v3949_v21, 0.0 }
 0x25d   :  { %2096 = vst.msk [vmem:[#allocation3 + $0x100] sm:$0xff] %vm1313_vm1, %v2032_v1  ;;  %2097 = vst.msk [vmem:[#allocation3 + $0x108] sm:$0xff] %vm1313_vm1, %v2033_v6  ;;  %v2062_v37 = vmax.f32 %v4205_v42, 0.0 }
 0x25e   :  { %2098 = vst.msk [vmem:[#allocation3 + $0x110] sm:$0xff] %vm1313_vm1, %v2034_v11  ;;  %2099 = vst.msk [vmem:[#allocation3 + $0x118] sm:$0xff] %vm1313_vm1, %v2035_v16 }
 0x25f   :  { %2100 = vst.msk [vmem:[#allocation3 + $0x120] sm:$0xff] %vm1313_vm1, %v2036_v27  ;;  %2101 = vst.msk [vmem:[#allocation3 + $0x128] sm:$0xff] %vm1313_vm1, %v2037_v34 }
 0x260   :  { %2102 = vst.msk [vmem:[#allocation3 + $0x130] sm:$0xff] %vm1313_vm1, %v2038_v41  ;;  %2103 = vst.msk [vmem:[#allocation3 + $0x138] sm:$0xff] %vm1313_vm1, %v2039_v47 }
 0x261   :  { %2104 = vst.msk [vmem:[#allocation3 + $0x140] sm:$0xff] %vm1313_vm1, %v2040_v53  ;;  %2105 = vst.msk [vmem:[#allocation3 + $0x148] sm:$0xff] %vm1313_vm1, %v2041_v59 }
 0x262   :  { %2106 = vst.msk [vmem:[#allocation3 + $0x150] sm:$0xff] %vm1313_vm1, %v2042_v2  ;;  %2107 = vst.msk [vmem:[#allocation3 + $0x158] sm:$0xff] %vm1313_vm1, %v2043_v8 }
 0x263   :  { %2108 = vst.msk [vmem:[#allocation3 + $0x160] sm:$0xff] %vm1313_vm1, %v2044_v14  ;;  %2109 = vst.msk [vmem:[#allocation3 + $0x168] sm:$0xff] %vm1313_vm1, %v2045_v25 }
 0x264   :  { %2110 = vst.msk [vmem:[#allocation3 + $0x170] sm:$0xff] %vm1313_vm1, %v2046_v43  ;;  %2111 = vst.msk [vmem:[#allocation3 + $0x178] sm:$0xff] %vm1313_vm1, %v2047_v58 }
 0x265   :  { %2112 = vst.msk [vmem:[#allocation3 + $0x180] sm:$0xff] %vm1313_vm1, %v2048_v10  ;;  %2113 = vst.msk [vmem:[#allocation3 + $0x188] sm:$0xff] %vm1313_vm1, %v2049_v33 }
 0x266   :  { %2114 = vst.msk [vmem:[#allocation3 + $0x190] sm:$0xff] %vm1313_vm1, %v2050_v54  ;;  %2115 = vst.msk [vmem:[#allocation3 + $0x198] sm:$0xff] %vm1313_vm1, %v2051_v63 }
 0x267   :  { %2116 = vst.msk [vmem:[#allocation3 + $0x1a0] sm:$0xff] %vm1313_vm1, %v2052_v9  ;;  %2117 = vst.msk [vmem:[#allocation3 + $0x1a8] sm:$0xff] %vm1313_vm1, %v2053_v24 }
 0x268   :  { %2118 = vst.msk [vmem:[#allocation3 + $0x1b0] sm:$0xff] %vm1313_vm1, %v2054_v38  ;;  %2119 = vst.msk [vmem:[#allocation3 + $0x1b8] sm:$0xff] %vm1313_vm1, %v2055_v52 }
 0x269   :  { %2120 = vst.msk [vmem:[#allocation3 + $0x1c0] sm:$0xff] %vm1313_vm1, %v2056_v7  ;;  %2121 = vst.msk [vmem:[#allocation3 + $0x1c8] sm:$0xff] %vm1313_vm1, %v2057_v61 }
 0x26a   :  { %2122 = vst.msk [vmem:[#allocation3 + $0x1d0] sm:$0xff] %vm1313_vm1, %v2058_v12  ;;  %2123 = vst.msk [vmem:[#allocation3 + $0x1d8] sm:$0xff] %vm1313_vm1, %v2059_v5 }
 0x26b   :  { %2124 = vst.msk [vmem:[#allocation3 + $0x1e0] sm:$0xff] %vm1313_vm1, %v2060_v45  ;;  %2126 = vst.msk [vmem:[#allocation3 + $0x1f0] sm:$0xff] %vm1313_vm1, %v2062_v37 }
 0x26c   :  { %2127 = vst.msk [vmem:[#allocation3 + $0x1f8] sm:$0xff] %vm1313_vm1, %v2063_v48 }
 0x26d   :  { %2649 = shalt.err (!%p2646_p4)
}
 0x26e   :  { %s2650_s12 = scalar_lea.hbm %s4101_s5, 8192 }
 0x26f   :  { %p2651_p5 = scmp.ne.s32.totalorder %s4101_s5, %s2650_s12  ;;  %p2654_p6 = scmp.lt.u32.totalorder %s2650_s12, %s4101_s5 }
 0x271   :  { %p2656_p7 = pnand %p2654_p6, %p2651_p5 }
 0x273   :  { %2659 = shalt.err (!%p2656_p7)
}
 0x274   :  { %s2664_s16 = smov 128   ;;  %s2665_s17 = smov 8  }
 0x275   :  { %2139 = dma.vmem_to_hbm [thread:$0]  %s4065_s4, 8192, %s4101_s5, [#allocation4], %s2664_s16, %s2664_s16, %s2665_s17  }
 0x276   :  { %2660 = dma.done.wait [#allocation4], 8192  }
 0x277   :  { %2661 = vsyncadd [#allocation4], 4294959104 }
 0x278   :  { %2143 = vsyncpa [#allocation4], 1 }

</bundles_post_ra>
